<compile_context>
chip_gen: v5e
topology: v5e:2x2
jax: 0.10.0
libtpu: 0.0.40
codegen_flags: <defaults>
</compile_context>

<pallas_src>
import functools

import jax
import jax.numpy as jnp
from jax.experimental import pallas as pl
from jax.experimental.pallas import tpu as pltpu


# ---------------------------------------------------------------------------
# Kernel 1: fused nearest-upsample(x2) + Conv2d(Cin, Cout, 3, 1, 1)
#           (optionally fused output BatchNorm-affine + ReLU)
# Output is parity-separated: row 2*a + b holds output pixels (2i+a, 2j+b).
# ---------------------------------------------------------------------------
def _upsample_conv3x3_kernel(x_ref, w_ref, b_ref, *rest, fuse_postact):
    if fuse_postact:
        scale_ref, shift_ref, o_ref = rest
    else:
        (o_ref,) = rest

    Hp, Wp, Cin = x_ref.shape[1], x_ref.shape[2], x_ref.shape[3]
    H, W = Hp - 2, Wp - 2          # low-res spatial size
    Cout = o_ref.shape[3]

    bias = b_ref[...].astype(jnp.float32)                       # (1, Cout)

    for a in range(2):             # output-row parity
        for b in range(2):         # output-col parity
            # im2col over the 2x2 fused taps -> ONE MXU matmul, K = 4*Cin.
            taps = [x_ref[0, a + p:a + p + H, b + q:b + q + W, :]
                    for p in range(2) for q in range(2)]
            patch = jnp.concatenate(taps, axis=-1).reshape(H * W, 4 * Cin)
            acc = jnp.dot(patch, w_ref[2 * a + b],
                          preferred_element_type=jnp.float32) + bias
            if fuse_postact:       # fused bn2 (affine) + ReLU on the output
                acc = (acc * scale_ref[...].astype(jnp.float32)
                       + shift_ref[...].astype(jnp.float32))
                acc = jnp.maximum(acc, 0.0)
            o_ref[2 * a + b] = acc.reshape(H, W, Cout).astype(o_ref.dtype)


# ---------------------------------------------------------------------------
# Kernel 2: Conv2d(C, Cout, 3, 1, 1) + bias + residual add (shortcut)
# ---------------------------------------------------------------------------
def _conv3x3_residual_kernel(x_ref, res_ref, w_ref, b_ref, o_ref):
    Hp, Wp, C = x_ref.shape[1], x_ref.shape[2], x_ref.shape[3]
    H, W = Hp - 2, Wp - 2
    Cout = o_ref.shape[3]

    # im2col patch matrix -> ONE MXU matmul, K = 9*C.
    taps = [x_ref[0, kh:kh + H, kw:kw + W, :]
            for kh in range(3) for kw in range(3)]
    patch = jnp.concatenate(taps, axis=-1).reshape(H * W, 9 * C)
    acc = jnp.dot(patch, w_ref[...], preferred_element_type=jnp.float32)
    acc = acc + b_ref[...].astype(jnp.float32)
    acc = acc.reshape(H, W, Cout) + res_ref[0].astype(jnp.float32)
    o_ref[0] = acc.astype(o_ref.dtype)


# ---------------------------------------------------------------------------
# Wrapper helpers
# ---------------------------------------------------------------------------
def _combine_upsample_weights(w_oihw):
    """OIHW 3x3 weights -> parity-combined (4, 4*Cin, Cout) im2col matrices.

    For nearest-x2 upsample + 3x3/s1/p1 conv, output parity (a, b) is a 2x2
    conv on the original image with tap weights that are sums of the 3x3 taps.
    Only additions are used (exact in f32)."""
    w = jnp.transpose(w_oihw, (2, 3, 1, 0))          # (kh, kw, Cin, Cout)
    Cin, Cout = w.shape[2], w.shape[3]
    rows = [[w[0], w[1] + w[2]],                     # row parity a = 0
            [w[0] + w[1], w[2]]]                     # row parity a = 1
    mats = []
    for a in range(2):
        for b in range(2):
            taps = []
            for p in range(2):
                rp = rows[a][p]                      # (kw=3, Cin, Cout)
                if b == 0:
                    taps += [rp[0], rp[1] + rp[2]]   # col taps q = 0, 1
                else:
                    taps += [rp[0] + rp[1], rp[2]]
            mats.append(jnp.stack(taps, axis=0).reshape(4 * Cin, Cout))
    return jnp.stack(mats, axis=0)                   # (4, 4*Cin, Cout)


def _upsample_conv(xp, wcomb, bias, scale=None, shift=None):
    """xp: (N, H+2, W+2, Cin) zero-padded low-res NHWC input.
    Returns parity-separated output of shape (N*4, H, W, Cout)."""
    N, Hp, Wp, Cin = xp.shape
    H, W = Hp - 2, Wp - 2
    Cout = wcomb.shape[-1]
    fuse = scale is not None
    kernel = functools.partial(_upsample_conv3x3_kernel, fuse_postact=fuse)

    in_specs = [
        pl.BlockSpec((1, Hp, Wp, Cin), lambda n: (n, 0, 0, 0)),
        pl.BlockSpec((4, 4 * Cin, Cout), lambda n: (0, 0, 0)),
        pl.BlockSpec((1, Cout), lambda n: (0, 0)),
    ]
    args = [xp, wcomb, bias.reshape(1, Cout)]
    if fuse:
        in_specs += [pl.BlockSpec((1, Cout), lambda n: (0, 0)),
                     pl.BlockSpec((1, Cout), lambda n: (0, 0))]
        args += [scale.reshape(1, Cout), shift.reshape(1, Cout)]

    return pl.pallas_call(
        kernel,
        out_shape=jax.ShapeDtypeStruct((N * 4, H, W, Cout), xp.dtype),
        grid_spec=pltpu.PrefetchScalarGridSpec(
            num_scalar_prefetch=0,
            grid=(N,),
            in_specs=in_specs,
            out_specs=pl.BlockSpec((4, H, W, Cout), lambda n: (n, 0, 0, 0)),
        ),
        compiler_params=pltpu.CompilerParams(
            dimension_semantics=("parallel",)),
    )(*args)


def _interleave_parity(par, N):
    """(N*4, H, W, C) parity-separated -> (N, 2H, 2W, C).  Pure XLA layout."""
    _, H, W, C = par.shape
    par = par.reshape(N, 2, 2, H, W, C)              # (N, a, b, i, j, C)
    par = jnp.transpose(par, (0, 3, 1, 4, 2, 5))     # (N, i, a, j, b, C)
    return par.reshape(N, 2 * H, 2 * W, C)


def _conv3x3_residual(xp, res, w_mat, bias):
    """xp: (N, H+2, W+2, C) padded input; res: (N, H, W, Cout) shortcut."""
    N, Hp, Wp, C = xp.shape
    H, W = Hp - 2, Wp - 2
    Cout = w_mat.shape[-1]
    return pl.pallas_call(
        _conv3x3_residual_kernel,
        out_shape=jax.ShapeDtypeStruct((N, H, W, Cout), xp.dtype),
        grid_spec=pltpu.PrefetchScalarGridSpec(
            num_scalar_prefetch=0,
            grid=(N,),
            in_specs=[
                pl.BlockSpec((1, Hp, Wp, C), lambda n: (n, 0, 0, 0)),
                pl.BlockSpec((1, H, W, Cout), lambda n: (n, 0, 0, 0)),
                pl.BlockSpec((9 * C, Cout), lambda n: (0, 0)),
                pl.BlockSpec((1, Cout), lambda n: (0, 0)),
            ],
            out_specs=pl.BlockSpec((1, H, W, Cout), lambda n: (n, 0, 0, 0)),
        ),
        compiler_params=pltpu.CompilerParams(
            dimension_semantics=("parallel",)),
    )(xp, res, w_mat, bias.reshape(1, Cout))


# ---------------------------------------------------------------------------
# Full residualBlock_up forward
# ---------------------------------------------------------------------------
def residual_block_up(x_nchw, params):
    (w_sc, b_sc, w1, b1, w2, b2,
     g1, be1, m1, v1, g2, be2, m2, v2) = params
    eps = 1e-5
    N, Cin, H, W = x_nchw.shape
    Cout = w_sc.shape[0]

    # TODO(synk): BatchNorm is implemented in inference (running-stats) form,
    # folded to a per-channel affine; training-mode batch statistics would need
    # an extra cross-batch reduction pass.
    scale1 = g1 / jnp.sqrt(v1 + eps)
    shift1 = be1 - m1 * scale1
    scale2 = g2 / jnp.sqrt(v2 + eps)
    shift2 = be2 - m2 * scale2

    x_nhwc = jnp.transpose(x_nchw, (0, 2, 3, 1))
    # bn1 + ReLU commute with nearest upsample -> apply at LOW resolution.
    a1 = jnp.maximum(x_nhwc * scale1 + shift1, 0.0)

    xp = jnp.pad(x_nhwc, ((0, 0), (1, 1), (1, 1), (0, 0)))
    a1p = jnp.pad(a1, ((0, 0), (1, 1), (1, 1), (0, 0)))

    wsc_comb = _combine_upsample_weights(w_sc)
    w1_comb = _combine_upsample_weights(w1)

    # shortcut = conv_shortcut(x) = upsample + conv
    sc_par = _upsample_conv(xp, wsc_comb, b_sc)
    # main = relu(bn2(conv1(upsample(relu(bn1(x))))))  (bn2+relu fused in-kernel)
    h1_par = _upsample_conv(a1p, w1_comb, b1, scale2, shift2)

    shortcut = _interleave_parity(sc_par, N)         # (N, 2H, 2W, Cout)
    a2 = _interleave_parity(h1_par, N)               # post-activation map

    a2p = jnp.pad(a2, ((0, 0), (1, 1), (1, 1), (0, 0)))
    w2_mat = jnp.transpose(w2, (2, 3, 1, 0)).reshape(9 * Cout, Cout)

    out_nhwc = _conv3x3_residual(a2p, shortcut, w2_mat, b2)   # conv2 + shortcut
    return jnp.transpose(out_nhwc, (0, 3, 1, 2))              # back to NCHW


# ---------------------------------------------------------------------------
# Pure-JAX reference (mirrors the PyTorch forward, BN in inference form)
# ---------------------------------------------------------------------------
def _reference(x, params):
    (w_sc, b_sc, w1, b1, w2, b2,
     g1, be1, m1, v1, g2, be2, m2, v2) = params
    eps = 1e-5

    def up2(z):
        return jnp.repeat(jnp.repeat(z, 2, axis=2), 2, axis=3)

    def conv3x3(z, w, b):
        y = jax.lax.conv_general_dilated(
            z, w, window_strides=(1, 1), padding=((1, 1), (1, 1)),
            dimension_numbers=("NCHW", "OIHW", "NCHW"),
            precision=jax.lax.Precision.HIGHEST)
        return y + b[None, :, None, None]

    def bn(z, g, be, m, v):
        s = g / jnp.sqrt(v + eps)
        return z * s[None, :, None, None] + (be - m * s)[None, :, None, None]

    shortcut = conv3x3(up2(x), w_sc, b_sc)
    out = jnp.maximum(bn(x, g1, be1, m1, v1), 0.0)
    out = conv3x3(up2(out), w1, b1)
    out = jnp.maximum(bn(out, g2, be2, m2, v2), 0.0)
    out = conv3x3(out, w2, b2)
    return shortcut + out


if __name__ == "__main__":
    N, Cin, Cout, H, W = 2, 4, 8, 16, 16
    ks = jax.random.split(jax.random.PRNGKey(0), 15)

    w_sc = jax.random.normal(ks[0], (Cout, Cin, 3, 3), jnp.float32) * 0.1
    b_sc = jax.random.normal(ks[1], (Cout,), jnp.float32) * 0.1
    w1 = jax.random.normal(ks[2], (Cout, Cin, 3, 3), jnp.float32) * 0.1
    b1 = jax.random.normal(ks[3], (Cout,), jnp.float32) * 0.1
    w2 = jax.random.normal(ks[4], (Cout, Cout, 3, 3), jnp.float32) * 0.1
    b2 = jax.random.normal(ks[5], (Cout,), jnp.float32) * 0.1
    g1 = 1.0 + 0.1 * jax.random.normal(ks[6], (Cin,), jnp.float32)
    be1 = 0.1 * jax.random.normal(ks[7], (Cin,), jnp.float32)
    m1 = 0.1 * jax.random.normal(ks[8], (Cin,), jnp.float32)
    v1 = 1.0 + 0.1 * jax.random.uniform(ks[9], (Cin,), jnp.float32)
    g2 = 1.0 + 0.1 * jax.random.normal(ks[10], (Cout,), jnp.float32)
    be2 = 0.1 * jax.random.normal(ks[11], (Cout,), jnp.float32)
    m2 = 0.1 * jax.random.normal(ks[12], (Cout,), jnp.float32)
    v2 = 1.0 + 0.1 * jax.random.uniform(ks[13], (Cout,), jnp.float32)
    x = jax.random.normal(ks[14], (N, Cin, H, W), jnp.float32)

    params = (w_sc, b_sc, w1, b1, w2, b2,
              g1, be1, m1, v1, g2, be2, m2, v2)

    out = residual_block_up(x, params)
    jax.block_until_ready(out)

    ref = _reference(x, params)
    assert out.shape == (N, Cout, 2 * H, 2 * W), out.shape
    max_err = float(jnp.max(jnp.abs(out - ref)))
    assert jnp.allclose(out, ref, atol=2e-4, rtol=2e-4), max_err

    print("KERNEL_OK")
</pallas_src>

<mosaic_0001>
module attributes {stable_mosaic.version = 11 : i64} {
  func.func @_upsample_conv3x3_kernel(%arg0: i32, %arg1: memref<1x18x18x4xf32, #tpu.memory_space<vmem>>, %arg2: memref<4x16x8xf32, #tpu.memory_space<vmem>>, %arg3: memref<1x8xf32, #tpu.memory_space<vmem>>, %arg4: memref<4x16x16x8xf32, #tpu.memory_space<vmem>>) attributes {dimension_semantics = [#tpu.dimension_semantics<parallel>], iteration_bounds = array<i64: 2>, scalar_prefetch = 0 : i64, scratch_operands = 0 : i64, tpu.core_type = #tpu.core_type<tc>, window_params = [{transform_indices = @transform_0, window_bounds = array<i64: 1, 18, 18, 4>}, {pipeline_mode = #tpu.pipeline_mode<synchronous>, transform_indices = @transform_1, window_bounds = array<i64: 4, 16, 8>}, {pipeline_mode = #tpu.pipeline_mode<synchronous>, transform_indices = @transform_2, window_bounds = array<i64: 1, 8>}, {transform_indices = @transform_3, window_bounds = array<i64: 4, 16, 16, 8>}]} {
    %c0 = arith.constant 0 : index
    %c0_0 = arith.constant 0 : index
    %0 = vector.load %arg3[%c0, %c0_0] : memref<1x8xf32, #tpu.memory_space<vmem>>, vector<1x8xf32>
    %c0_1 = arith.constant 0 : index
    %c0_2 = arith.constant 0 : index
    %c0_3 = arith.constant 0 : index
    %c0_4 = arith.constant 0 : index
    %1 = vector.load %arg1[%c0_1, %c0_2, %c0_3, %c0_4] : memref<1x18x18x4xf32, #tpu.memory_space<vmem>>, vector<1x16x16x4xf32>
    %2 = vector.shape_cast %1 : vector<1x16x16x4xf32> to vector<16x16x4xf32>
    %c0_5 = arith.constant 0 : index
    %c0_6 = arith.constant 0 : index
    %c1 = arith.constant 1 : index
    %c0_7 = arith.constant 0 : index
    %3 = vector.load %arg1[%c0_5, %c0_6, %c1, %c0_7] : memref<1x18x18x4xf32, #tpu.memory_space<vmem>>, vector<1x16x16x4xf32>
    %4 = vector.shape_cast %3 : vector<1x16x16x4xf32> to vector<16x16x4xf32>
    %c0_8 = arith.constant 0 : index
    %c1_9 = arith.constant 1 : index
    %c0_10 = arith.constant 0 : index
    %c0_11 = arith.constant 0 : index
    %5 = vector.load %arg1[%c0_8, %c1_9, %c0_10, %c0_11] : memref<1x18x18x4xf32, #tpu.memory_space<vmem>>, vector<1x16x16x4xf32>
    %6 = vector.shape_cast %5 : vector<1x16x16x4xf32> to vector<16x16x4xf32>
    %c0_12 = arith.constant 0 : index
    %c1_13 = arith.constant 1 : index
    %c1_14 = arith.constant 1 : index
    %c0_15 = arith.constant 0 : index
    %7 = vector.load %arg1[%c0_12, %c1_13, %c1_14, %c0_15] : memref<1x18x18x4xf32, #tpu.memory_space<vmem>>, vector<1x16x16x4xf32>
    %8 = vector.shape_cast %7 : vector<1x16x16x4xf32> to vector<16x16x4xf32>
    %9 = tpu.concatenate %2, %4, %6, %8 in 2 : vector<16x16x4xf32>, vector<16x16x4xf32>, vector<16x16x4xf32>, vector<16x16x4xf32> -> vector<16x16x16xf32>
    %10 = vector.shape_cast %9 : vector<16x16x16xf32> to vector<256x16xf32>
    %c0_16 = arith.constant 0 : index
    %c0_17 = arith.constant 0 : index
    %c0_18 = arith.constant 0 : index
    %11 = vector.load %arg2[%c0_16, %c0_17, %c0_18] : memref<4x16x8xf32, #tpu.memory_space<vmem>>, vector<1x16x8xf32>
    %12 = vector.shape_cast %11 : vector<1x16x8xf32> to vector<16x8xf32>
    %cst = arith.constant dense<0.000000e+00> : vector<256x8xf32>
    %13 = tpu.matmul %10, %12, %cst {dimension_numbers = #tpu.dot_dimension_numbers<[1], [0], [0], [1], [0, 0, 1, 1], [], []>} : vector<256x16xf32>, vector<16x8xf32>, vector<256x8xf32> -> vector<256x8xf32>
    %14 = vector.broadcast %0 : vector<1x8xf32> to vector<256x8xf32>
    %15 = arith.addf %13, %14 : vector<256x8xf32>
    %16 = vector.shape_cast %15 : vector<256x8xf32> to vector<16x16x8xf32>
    %c0_19 = arith.constant 0 : index
    %c0_20 = arith.constant 0 : index
    %c0_21 = arith.constant 0 : index
    %c0_22 = arith.constant 0 : index
    %17 = vector.load %arg4[%c0_19, %c0_20, %c0_21, %c0_22] : memref<4x16x16x8xf32, #tpu.memory_space<vmem>>, vector<1x16x16x8xf32>
    %18 = vector.shape_cast %17 : vector<1x16x16x8xf32> to vector<16x16x8xf32>
    %19 = vector.shape_cast %16 : vector<16x16x8xf32> to vector<1x16x16x8xf32>
    tpu.vector_store %arg4[%c0_19, %c0_20, %c0_21, %c0_22], %19 {strides = array<i32>} : memref<4x16x16x8xf32, #tpu.memory_space<vmem>>, vector<1x16x16x8xf32>,
    %c0_23 = arith.constant 0 : index
    %c0_24 = arith.constant 0 : index
    %c1_25 = arith.constant 1 : index
    %c0_26 = arith.constant 0 : index
    %20 = vector.load %arg1[%c0_23, %c0_24, %c1_25, %c0_26] : memref<1x18x18x4xf32, #tpu.memory_space<vmem>>, vector<1x16x16x4xf32>
    %21 = vector.shape_cast %20 : vector<1x16x16x4xf32> to vector<16x16x4xf32>
    %c0_27 = arith.constant 0 : index
    %c0_28 = arith.constant 0 : index
    %c2 = arith.constant 2 : index
    %c0_29 = arith.constant 0 : index
    %22 = vector.load %arg1[%c0_27, %c0_28, %c2, %c0_29] : memref<1x18x18x4xf32, #tpu.memory_space<vmem>>, vector<1x16x16x4xf32>
    %23 = vector.shape_cast %22 : vector<1x16x16x4xf32> to vector<16x16x4xf32>
    %c0_30 = arith.constant 0 : index
    %c1_31 = arith.constant 1 : index
    %c1_32 = arith.constant 1 : index
    %c0_33 = arith.constant 0 : index
    %24 = vector.load %arg1[%c0_30, %c1_31, %c1_32, %c0_33] : memref<1x18x18x4xf32, #tpu.memory_space<vmem>>, vector<1x16x16x4xf32>
    %25 = vector.shape_cast %24 : vector<1x16x16x4xf32> to vector<16x16x4xf32>
    %c0_34 = arith.constant 0 : index
    %c1_35 = arith.constant 1 : index
    %c2_36 = arith.constant 2 : index
    %c0_37 = arith.constant 0 : index
    %26 = vector.load %arg1[%c0_34, %c1_35, %c2_36, %c0_37] : memref<1x18x18x4xf32, #tpu.memory_space<vmem>>, vector<1x16x16x4xf32>
    %27 = vector.shape_cast %26 : vector<1x16x16x4xf32> to vector<16x16x4xf32>
    %28 = tpu.concatenate %21, %23, %25, %27 in 2 : vector<16x16x4xf32>, vector<16x16x4xf32>, vector<16x16x4xf32>, vector<16x16x4xf32> -> vector<16x16x16xf32>
    %29 = vector.shape_cast %28 : vector<16x16x16xf32> to vector<256x16xf32>
    %c1_38 = arith.constant 1 : index
    %c0_39 = arith.constant 0 : index
    %c0_40 = arith.constant 0 : index
    %30 = vector.load %arg2[%c1_38, %c0_39, %c0_40] : memref<4x16x8xf32, #tpu.memory_space<vmem>>, vector<1x16x8xf32>
    %31 = vector.shape_cast %30 : vector<1x16x8xf32> to vector<16x8xf32>
    %cst_41 = arith.constant dense<0.000000e+00> : vector<256x8xf32>
    %32 = tpu.matmul %29, %31, %cst_41 {dimension_numbers = #tpu.dot_dimension_numbers<[1], [0], [0], [1], [0, 0, 1, 1], [], []>} : vector<256x16xf32>, vector<16x8xf32>, vector<256x8xf32> -> vector<256x8xf32>
    %33 = vector.broadcast %0 : vector<1x8xf32> to vector<256x8xf32>
    %34 = arith.addf %32, %33 : vector<256x8xf32>
    %35 = vector.shape_cast %34 : vector<256x8xf32> to vector<16x16x8xf32>
    %c1_42 = arith.constant 1 : index
    %c0_43 = arith.constant 0 : index
    %c0_44 = arith.constant 0 : index
    %c0_45 = arith.constant 0 : index
    %36 = vector.load %arg4[%c1_42, %c0_43, %c0_44, %c0_45] : memref<4x16x16x8xf32, #tpu.memory_space<vmem>>, vector<1x16x16x8xf32>
    %37 = vector.shape_cast %36 : vector<1x16x16x8xf32> to vector<16x16x8xf32>
    %38 = vector.shape_cast %35 : vector<16x16x8xf32> to vector<1x16x16x8xf32>
    tpu.vector_store %arg4[%c1_42, %c0_43, %c0_44, %c0_45], %38 {strides = array<i32>} : memref<4x16x16x8xf32, #tpu.memory_space<vmem>>, vector<1x16x16x8xf32>,
    %c0_46 = arith.constant 0 : index
    %c1_47 = arith.constant 1 : index
    %c0_48 = arith.constant 0 : index
    %c0_49 = arith.constant 0 : index
    %39 = vector.load %arg1[%c0_46, %c1_47, %c0_48, %c0_49] : memref<1x18x18x4xf32, #tpu.memory_space<vmem>>, vector<1x16x16x4xf32>
    %40 = vector.shape_cast %39 : vector<1x16x16x4xf32> to vector<16x16x4xf32>
    %c0_50 = arith.constant 0 : index
    %c1_51 = arith.constant 1 : index
    %c1_52 = arith.constant 1 : index
    %c0_53 = arith.constant 0 : index
    %41 = vector.load %arg1[%c0_50, %c1_51, %c1_52, %c0_53] : memref<1x18x18x4xf32, #tpu.memory_space<vmem>>, vector<1x16x16x4xf32>
    %42 = vector.shape_cast %41 : vector<1x16x16x4xf32> to vector<16x16x4xf32>
    %c0_54 = arith.constant 0 : index
    %c2_55 = arith.constant 2 : index
    %c0_56 = arith.constant 0 : index
    %c0_57 = arith.constant 0 : index
    %43 = vector.load %arg1[%c0_54, %c2_55, %c0_56, %c0_57] : memref<1x18x18x4xf32, #tpu.memory_space<vmem>>, vector<1x16x16x4xf32>
    %44 = vector.shape_cast %43 : vector<1x16x16x4xf32> to vector<16x16x4xf32>
    %c0_58 = arith.constant 0 : index
    %c2_59 = arith.constant 2 : index
    %c1_60 = arith.constant 1 : index
    %c0_61 = arith.constant 0 : index
    %45 = vector.load %arg1[%c0_58, %c2_59, %c1_60, %c0_61] : memref<1x18x18x4xf32, #tpu.memory_space<vmem>>, vector<1x16x16x4xf32>
    %46 = vector.shape_cast %45 : vector<1x16x16x4xf32> to vector<16x16x4xf32>
    %47 = tpu.concatenate %40, %42, %44, %46 in 2 : vector<16x16x4xf32>, vector<16x16x4xf32>, vector<16x16x4xf32>, vector<16x16x4xf32> -> vector<16x16x16xf32>
    %48 = vector.shape_cast %47 : vector<16x16x16xf32> to vector<256x16xf32>
    %c2_62 = arith.constant 2 : index
    %c0_63 = arith.constant 0 : index
    %c0_64 = arith.constant 0 : index
    %49 = vector.load %arg2[%c2_62, %c0_63, %c0_64] : memref<4x16x8xf32, #tpu.memory_space<vmem>>, vector<1x16x8xf32>
    %50 = vector.shape_cast %49 : vector<1x16x8xf32> to vector<16x8xf32>
    %cst_65 = arith.constant dense<0.000000e+00> : vector<256x8xf32>
    %51 = tpu.matmul %48, %50, %cst_65 {dimension_numbers = #tpu.dot_dimension_numbers<[1], [0], [0], [1], [0, 0, 1, 1], [], []>} : vector<256x16xf32>, vector<16x8xf32>, vector<256x8xf32> -> vector<256x8xf32>
    %52 = vector.broadcast %0 : vector<1x8xf32> to vector<256x8xf32>
    %53 = arith.addf %51, %52 : vector<256x8xf32>
    %54 = vector.shape_cast %53 : vector<256x8xf32> to vector<16x16x8xf32>
    %c2_66 = arith.constant 2 : index
    %c0_67 = arith.constant 0 : index
    %c0_68 = arith.constant 0 : index
    %c0_69 = arith.constant 0 : index
    %55 = vector.load %arg4[%c2_66, %c0_67, %c0_68, %c0_69] : memref<4x16x16x8xf32, #tpu.memory_space<vmem>>, vector<1x16x16x8xf32>
    %56 = vector.shape_cast %55 : vector<1x16x16x8xf32> to vector<16x16x8xf32>
    %57 = vector.shape_cast %54 : vector<16x16x8xf32> to vector<1x16x16x8xf32>
    tpu.vector_store %arg4[%c2_66, %c0_67, %c0_68, %c0_69], %57 {strides = array<i32>} : memref<4x16x16x8xf32, #tpu.memory_space<vmem>>, vector<1x16x16x8xf32>,
    %c0_70 = arith.constant 0 : index
    %c1_71 = arith.constant 1 : index
    %c1_72 = arith.constant 1 : index
    %c0_73 = arith.constant 0 : index
    %58 = vector.load %arg1[%c0_70, %c1_71, %c1_72, %c0_73] : memref<1x18x18x4xf32, #tpu.memory_space<vmem>>, vector<1x16x16x4xf32>
    %59 = vector.shape_cast %58 : vector<1x16x16x4xf32> to vector<16x16x4xf32>
    %c0_74 = arith.constant 0 : index
    %c1_75 = arith.constant 1 : index
    %c2_76 = arith.constant 2 : index
    %c0_77 = arith.constant 0 : index
    %60 = vector.load %arg1[%c0_74, %c1_75, %c2_76, %c0_77] : memref<1x18x18x4xf32, #tpu.memory_space<vmem>>, vector<1x16x16x4xf32>
    %61 = vector.shape_cast %60 : vector<1x16x16x4xf32> to vector<16x16x4xf32>
    %c0_78 = arith.constant 0 : index
    %c2_79 = arith.constant 2 : index
    %c1_80 = arith.constant 1 : index
    %c0_81 = arith.constant 0 : index
    %62 = vector.load %arg1[%c0_78, %c2_79, %c1_80, %c0_81] : memref<1x18x18x4xf32, #tpu.memory_space<vmem>>, vector<1x16x16x4xf32>
    %63 = vector.shape_cast %62 : vector<1x16x16x4xf32> to vector<16x16x4xf32>
    %c0_82 = arith.constant 0 : index
    %c2_83 = arith.constant 2 : index
    %c2_84 = arith.constant 2 : index
    %c0_85 = arith.constant 0 : index
    %64 = vector.load %arg1[%c0_82, %c2_83, %c2_84, %c0_85] : memref<1x18x18x4xf32, #tpu.memory_space<vmem>>, vector<1x16x16x4xf32>
    %65 = vector.shape_cast %64 : vector<1x16x16x4xf32> to vector<16x16x4xf32>
    %66 = tpu.concatenate %59, %61, %63, %65 in 2 : vector<16x16x4xf32>, vector<16x16x4xf32>, vector<16x16x4xf32>, vector<16x16x4xf32> -> vector<16x16x16xf32>
    %67 = vector.shape_cast %66 : vector<16x16x16xf32> to vector<256x16xf32>
    %c3 = arith.constant 3 : index
    %c0_86 = arith.constant 0 : index
    %c0_87 = arith.constant 0 : index
    %68 = vector.load %arg2[%c3, %c0_86, %c0_87] : memref<4x16x8xf32, #tpu.memory_space<vmem>>, vector<1x16x8xf32>
    %69 = vector.shape_cast %68 : vector<1x16x8xf32> to vector<16x8xf32>
    %cst_88 = arith.constant dense<0.000000e+00> : vector<256x8xf32>
    %70 = tpu.matmul %67, %69, %cst_88 {dimension_numbers = #tpu.dot_dimension_numbers<[1], [0], [0], [1], [0, 0, 1, 1], [], []>} : vector<256x16xf32>, vector<16x8xf32>, vector<256x8xf32> -> vector<256x8xf32>
    %71 = vector.broadcast %0 : vector<1x8xf32> to vector<256x8xf32>
    %72 = arith.addf %70, %71 : vector<256x8xf32>
    %73 = vector.shape_cast %72 : vector<256x8xf32> to vector<16x16x8xf32>
    %c3_89 = arith.constant 3 : index
    %c0_90 = arith.constant 0 : index
    %c0_91 = arith.constant 0 : index
    %c0_92 = arith.constant 0 : index
    %74 = vector.load %arg4[%c3_89, %c0_90, %c0_91, %c0_92] : memref<4x16x16x8xf32, #tpu.memory_space<vmem>>, vector<1x16x16x8xf32>
    %75 = vector.shape_cast %74 : vector<1x16x16x8xf32> to vector<16x16x8xf32>
    %76 = vector.shape_cast %73 : vector<16x16x8xf32> to vector<1x16x16x8xf32>
    tpu.vector_store %arg4[%c3_89, %c0_90, %c0_91, %c0_92], %76 {strides = array<i32>} : memref<4x16x16x8xf32, #tpu.memory_space<vmem>>, vector<1x16x16x8xf32>,
    return
  }
  func.func @transform_0(%arg0: i32) -> (i32, i32, i32, i32) {
    %c0_i32 = arith.constant 0 : i32
    %c0_i32_0 = arith.constant 0 : i32
    %c0_i32_1 = arith.constant 0 : i32
    %c0_i32_2 = arith.constant 0 : i32
    return %arg0, %c0_i32, %c0_i32_0, %c0_i32_1 : i32, i32, i32, i32
  }
  func.func @transform_1(%arg0: i32) -> (i32, i32, i32) {
    %c0_i32 = arith.constant 0 : i32
    %c0_i32_0 = arith.constant 0 : i32
    %c0_i32_1 = arith.constant 0 : i32
    %c0_i32_2 = arith.constant 0 : i32
    return %c0_i32, %c0_i32_0, %c0_i32_1 : i32, i32, i32
  }
  func.func @transform_2(%arg0: i32) -> (i32, i32) {
    %c0_i32 = arith.constant 0 : i32
    %c0_i32_0 = arith.constant 0 : i32
    %c0_i32_1 = arith.constant 0 : i32
    return %c0_i32, %c0_i32_0 : i32, i32
  }
  func.func @transform_3(%arg0: i32) -> (i32, i32, i32, i32) {
    %c0_i32 = arith.constant 0 : i32
    %c0_i32_0 = arith.constant 0 : i32
    %c0_i32_1 = arith.constant 0 : i32
    %c0_i32_2 = arith.constant 0 : i32
    return %arg0, %c0_i32, %c0_i32_0, %c0_i32_1 : i32, i32, i32, i32
  }
}

</mosaic_0001>

<bundles_post_ra>
// kernel: tpu_custom_call.1
= control target key start
LH: loop header
LB: loop body
LE: loop exit
PB: predicated region body
PF: predicated region fallthrough
CT: control target
= control target key end

     0   :  { %s4349_s12 = smov 0   ;;  %s7432_s0 = inlined_call_operand.vmem [shape: f32[2,18,18,4], index: 0, kind: input, shape index: {}]   ;;  %s7433_s1 = inlined_call_operand.vmem [shape: f32[4,16,8], index: 1, kind: input, shape index: {}]   ;;  %s7434_s2 = inlined_call_operand.vmem [shape: f32[1,8], index: 2, kind: input, shape index: {}]   ;;  %s7435_s3 = inlined_call_operand.vmem [shape: f32[8,16,16,8], index: 3, kind: output, shape index: {}]  }
   0x1 LB: > { %s4355_s13 = sadd.s32 4294967295, %s4324_s12   ;;  %p3656_p0 = scmp.ge.s32.totalorder %s4324_s12, 1  ;;  %s4324_s12 = sphi %s4349_s12, %s13_s12  }
   0x2   : > { %p137_p1 = scmp.lt.s32.totalorder %s4324_s12, 3 }
   0x4   : > { %p138_p2 = pnand %p3656_p0, %p137_p1 }
   0x6   : > { %141 = sbr.rel (%p138_p2) target bundleno = 1288 (0x508), region = 32 }
   0xb   : > { %p162_p3 = scmp.lt.s32.totalorder %s4355_s13, 1  ;;  %s4326_s19 = smov 4   ;;  %vm688_vm0 = vcmask 31744   ;;  %vm721_vm1 = vcmask 64512   ;;  %vm792_vm2 = vcmask 130048   ;;  %vm754_vm3 = vcmask 97280  }
   0xc   : > { %s4327_s20 = smov 8   ;;  %s4328_s21 = smov 12  }
   0xd   : > { %s163_s14 = scalar_select %p162_p3, %s4355_s13, 1 }
   0xe   : > { %s3658_s26 = sshll.u32 %s4355_s13, 2 }
   0xf   : > { %s4278_s15 = smul.u32 432, %s163_s14  ;;  %p168_p4 = scmp.lt.s32.totalorder %s3658_s26, 7 }
  0x11   : > { %s4364_s18 = scalar_lea.vmem %s7432_s0, %s4278_s15  ;;  %s7765_s26 = smov (!%p168_p4, %s3658_s26), 7 }
  0x12   : > { %v4367_v0 = vld [vmem:[%s4364_s18 + $0x31] sm:$0xff]  ;;  %v4370_v1 = vld [vmem:[%s4364_s18 + $0x19] sm:$0xff]  ;;  %v207_v2 = vld [vmem:[%s4364_s18 + $0x1] sm:$0xff]  ;;  %s4277_s27 = sshll.u32 %s7765_s26, 8 }
  0x13   : > { %344 = vrot.lane.b32.xlu2 %v4367_v0, %s4326_s19  ;;  %340 = vrot.lane.b32.xlu1 %v4370_v1, %s4326_s19  ;;  %v4379_v3 = vld [vmem:[%s4364_s18 + $0x39] sm:$0xff]  ;;  %v4382_v4 = vld [vmem:[%s4364_s18 + $0x21] sm:$0xff]  ;;  %s5340_s5 = scalar_lea.vmem %s7435_s3, %s4277_s27 }
  0x14   : > { %336 = vrot.lane.b32.xlu0 %v207_v2, %s4326_s19  ;;  %v208_v5 = vld [vmem:[%s4364_s18 + $0x9] sm:$0xff]  ;;  %v4391_v6 = vld [vmem:[%s4364_s18 + $0x61] sm:$0xff]  ;;  %v4394_v7 = vld [vmem:[%s4364_s18 + $0x51] sm:$0xff] }
  0x15   : > { %v4397_v8 = vld [vmem:[%s4364_s18 + $0x49] sm:$0xff]  ;;  %v4406_v9 = vld [vmem:[%s4364_s18 + $0x81] sm:$0xff]  ;;  %v4409_v10 = vld [vmem:[%s4364_s18 + $0x79] sm:$0xff] }
  0x16   : > { %v4412_v11 = vld [vmem:[%s4364_s18 + $0x69] sm:$0xff]  ;;  %v4424_v13 = vld [vmem:[%s4364_s18 + $0x99] sm:$0xff]  ;;  %v4427_v14 = vld [vmem:[%s4364_s18 + $0x91] sm:$0xff] }
  0x17   : > { %v4421_v12 = vld [vmem:[%s4364_s18 + $0xa9] sm:$0xff]  ;;  %v4439_v16 = vld [vmem:[%s4364_s18 + $0xc1] sm:$0xff]  ;;  %v4442_v17 = vld [vmem:[%s4364_s18 + $0xb1] sm:$0xff] }
  0x18   : > { %v4436_v15 = vld [vmem:[%s4364_s18 + $0xc9] sm:$0xff]  ;;  %7484 = vst [vmem:[#allocation2_spill] sm:$0xff] %v4442_v17  ;;  %v4451_v18 = vld [vmem:[%s4364_s18 + $0xf1] sm:$0xff]  ;;  %v4454_v19 = vld [vmem:[%s4364_s18 + $0xe1] sm:$0xff] }
  0x19   : > { %v4457_v20 = vld [vmem:[%s4364_s18 + $0xd9] sm:$0xff]  ;;  %v4466_v21 = vld [vmem:[%s4364_s18 + $0x111] sm:$0xff]  ;;  %v4469_v22 = vld [vmem:[%s4364_s18 + $0x109] sm:$0xff] }
  0x1a   : > { %v4472_v23 = vld [vmem:[%s4364_s18 + $0xf9] sm:$0xff]  ;;  %v4484_v25 = vld [vmem:[%s4364_s18 + $0x129] sm:$0xff]  ;;  %v4487_v26 = vld [vmem:[%s4364_s18 + $0x121] sm:$0xff] }
  0x1b   : > { %346 = vrot.lane.b32.xlu2 %v4379_v3, %s4326_s19  ;;  %342 = vrot.lane.b32.xlu1 %v4382_v4, %s4326_s19  ;;  %v4481_v24 = vld [vmem:[%s4364_s18 + $0x139] sm:$0xff]  ;;  %v4499_v28 = vld [vmem:[%s4364_s18 + $0x151] sm:$0xff] }
  0x1c   : > { %338 = vrot.lane.b32.xlu0 %v208_v5, %s4326_s19  ;;  %v4496_v27 = vld [vmem:[%s4364_s18 + $0x159] sm:$0xff]  ;;  %v4502_v29 = vld [vmem:[%s4364_s18 + $0x141] sm:$0xff]  ;;  %v4514_v31 = vld [vmem:[%s4364_s18 + $0x171] sm:$0xff] }
  0x1d   : > { %v4511_v30 = vld [vmem:[%s4364_s18 + $0x18] sm:$0xff]  ;;  %v4517_v32 = vld [vmem:[%s4364_s18 + $0x169] sm:$0xff]  ;;  %v4532_v35 = vld [vmem:[%s4364_s18 + $0x20] sm:$0xff] }
  0x1e   : > { %v4526_v33 = vld [vmem:[%s4364_s18 + $0x38] sm:$0xff]  ;;  %v4529_v34 = vld [vmem:[%s4364_s18 + $0x30] sm:$0xff]  ;;  %v4543_v37 = vld [vmem:[%s4364_s18 + $0x60] sm:$0xff] }
  0x1f   : > { %v4546_v38 = vld [vmem:[%s4364_s18 + $0x50] sm:$0xff]  ;;  %v4549_v39 = vld [vmem:[%s4364_s18 + $0x48] sm:$0xff]  ;;  %v4560_v41 = vld [vmem:[%s4364_s18 + $0x80] sm:$0xff] }
  0x20   : > { %v4563_v42 = vld [vmem:[%s4364_s18 + $0x78] sm:$0xff]  ;;  %v4566_v43 = vld [vmem:[%s4364_s18 + $0x68] sm:$0xff]  ;;  %v4583_v47 = vld [vmem:[%s4364_s18 + $0x90] sm:$0xff] }
  0x21   : > { %v4577_v45 = vld [vmem:[%s4364_s18 + $0xa8] sm:$0xff]  ;;  %v4580_v46 = vld [vmem:[%s4364_s18 + $0x98] sm:$0xff]  ;;  %v4601_v52 = vld [vmem:[%s4364_s18 + $0xc0] sm:$0xff] }
  0x22   : > { %7485 = vst [vmem:[#allocation3_spill] sm:$0xff] %v4577_v45  ;;  %v4598_v51 = vld [vmem:[%s4364_s18 + $0xc8] sm:$0xff]  ;;  %v4604_v53 = vld [vmem:[%s4364_s18 + $0xb0] sm:$0xff]  ;;  %v4622_v58 = vld [vmem:[%s4364_s18 + $0xe0] sm:$0xff] }
  0x23   : > { %352 = vrot.lane.b32.xlu2 %v4391_v6, %s4326_s19  ;;  %350 = vrot.lane.b32.xlu1 %v4394_v7, %s4326_s19  ;;  %7486 = vst [vmem:[#allocation4_spill] sm:$0xff] %v4580_v46  ;;  %v4619_v57 = vld [vmem:[%s4364_s18 + $0xf0] sm:$0xff]  ;;  %v4625_v59 = vld [vmem:[%s4364_s18 + $0xd8] sm:$0xff] }
  0x24   : > { %348 = vrot.lane.b32.xlu0 %v4397_v8, %s4326_s19  ;;  %7487 = vst [vmem:[#allocation5_spill] sm:$0xff] %v4598_v51  ;;  %v4640_v63 = vld [vmem:[%s4364_s18 + $0x110] sm:$0xff]  ;;  %v4643_v2 = vld [vmem:[%s4364_s18 + $0x108] sm:$0xff]  ;;  %v4646_v5 = vld [vmem:[%s4364_s18 + $0xf8] sm:$0xff] }
  0x25   : > { %7488 = vst [vmem:[#allocation6_spill] sm:$0xff] %v4601_v52 }
  0x26   : > { %7489 = vst [vmem:[#allocation7_spill] sm:$0xff] %v4604_v53 }
  0x27   : > { %7491 = vst [vmem:[#allocation9_spill] sm:$0xff] %v4619_v57 }
  0x28   : > { %7492 = vst [vmem:[#allocation10_spill] sm:$0xff] %v4622_v58 }
  0x29   : > { %7493 = vst [vmem:[#allocation11_spill] sm:$0xff] %v4625_v59 }
  0x2a   : > { %7495 = vst [vmem:[#allocation13_spill] sm:$0xff] %v4640_v63 }
  0x2b   : > { %358 = vrot.lane.b32.xlu2 %v4406_v9, %s4326_s19  ;;  %356 = vrot.lane.b32.xlu1 %v4409_v10, %s4326_s19  ;;  %7496 = vst [vmem:[#allocation14_spill] sm:$0xff] %v4643_v2 }
  0x2c   : > { %354 = vrot.lane.b32.xlu0 %v4412_v11, %s4326_s19  ;;  %7497 = vst [vmem:[#allocation15_spill] sm:$0xff] %v4646_v5 }
  0x33   : > { %364 = vrot.lane.b32.xlu2 %v4421_v12, %s4326_s19  ;;  %362 = vrot.lane.b32.xlu1 %v4424_v13, %s4326_s19 }
  0x34   : > { %360 = vrot.lane.b32.xlu0 %v4427_v14, %s4326_s19 }
  0x3b   : > { %370 = vrot.lane.b32.xlu2 %v4436_v15, %s4326_s19  ;;  %368 = vrot.lane.b32.xlu1 %v4439_v16, %s4326_s19 }
  0x3c   : > { %366 = vrot.lane.b32.xlu0 %v4442_v17, %s4326_s19 }
  0x43   : > { %376 = vrot.lane.b32.xlu2 %v4451_v18, %s4326_s19  ;;  %374 = vrot.lane.b32.xlu1 %v4454_v19, %s4326_s19 }
  0x44   : > { %372 = vrot.lane.b32.xlu0 %v4457_v20, %s4326_s19 }
  0x4b   : > { %382 = vrot.lane.b32.xlu2 %v4466_v21, %s4326_s19  ;;  %380 = vrot.lane.b32.xlu1 %v4469_v22, %s4326_s19 }
  0x4c   : > { %378 = vrot.lane.b32.xlu0 %v4472_v23, %s4326_s19 }
  0x53   : > { %388 = vrot.lane.b32.xlu2 %v4481_v24, %s4326_s19  ;;  %386 = vrot.lane.b32.xlu1 %v4484_v25, %s4326_s19 }
  0x54   : > { %384 = vrot.lane.b32.xlu0 %v4487_v26, %s4326_s19 }
  0x5b   : > { %394 = vrot.lane.b32.xlu2 %v4496_v27, %s4326_s19  ;;  %392 = vrot.lane.b32.xlu1 %v4499_v28, %s4326_s19 }
  0x5c   : > { %390 = vrot.lane.b32.xlu0 %v4502_v29, %s4326_s19 }
  0x63   : > { %464 = vrot.lane.b32.xlu2 %v4511_v30, %s4327_s20  ;;  %398 = vrot.lane.b32.xlu1 %v4514_v31, %s4326_s19 }
  0x64   : > { %396 = vrot.lane.b32.xlu0 %v4517_v32, %s4326_s19 }
  0x6b   : > { %470 = vrot.lane.b32.xlu2 %v4526_v33, %s4327_s20  ;;  %468 = vrot.lane.b32.xlu1 %v4529_v34, %s4327_s20 }
  0x6c   : > { %466 = vrot.lane.b32.xlu0 %v4532_v35, %s4327_s20 }
  0x6d   : > { %v4540_v36 = vpop.permute.xlu2 %344 }
  0x73   : > { %476 = vrot.lane.b32.xlu2 %v4543_v37, %s4327_s20  ;;  %474 = vrot.lane.b32.xlu1 %v4546_v38, %s4327_s20 }
  0x74   : > { %472 = vrot.lane.b32.xlu0 %v4549_v39, %s4327_s20 }
  0x75   : > { %v4557_v40 = vpop.permute.xlu2 %346 }
  0x7b   : > { %482 = vrot.lane.b32.xlu2 %v4560_v41, %s4327_s20  ;;  %480 = vrot.lane.b32.xlu1 %v4563_v42, %s4327_s20 }
  0x7c   : > { %478 = vrot.lane.b32.xlu0 %v4566_v43, %s4327_s20 }
  0x7d   : > { %v4574_v44 = vpop.permute.xlu2 %352 }
  0x83   : > { %488 = vrot.lane.b32.xlu2 %v4577_v45, %s4327_s20  ;;  %486 = vrot.lane.b32.xlu1 %v4580_v46, %s4327_s20  ;;  %v4688_v45 = vld [vmem:[%s4364_s18 + $0x140] sm:$0xff]  ;;  %v3689_v46 = vld [vmem:[%s4364_s18 + $0x168] sm:$0xff] }
  0x84   : > { %484 = vrot.lane.b32.xlu0 %v4583_v47, %s4327_s20  ;;  %7506 = vst [vmem:[#allocation24_spill] sm:$0xff] %v4688_v45 }
  0x85   : > { %v4591_v48 = vpop.permute.xlu2 %358  ;;  %v4593_v49 = vpop.permute.xlu1 %340 }
  0x86   : > { %v4595_v50 = vpop.permute.xlu0 %336 }
  0x8b   : > { %494 = vrot.lane.b32.xlu2 %v4598_v51, %s4327_s20  ;;  %492 = vrot.lane.b32.xlu1 %v4601_v52, %s4327_s20  ;;  %v4661_v51 = vld [vmem:[%s4364_s18 + $0x138] sm:$0xff]  ;;  %v4667_v52 = vld [vmem:[%s4364_s18 + $0x120] sm:$0xff] }
  0x8c   : > { %490 = vrot.lane.b32.xlu0 %v4604_v53, %s4327_s20  ;;  %7499 = vst [vmem:[#allocation17_spill] sm:$0xff] %v4661_v51  ;;  %v4685_v53 = vld [vmem:[%s4364_s18 + $0x150] sm:$0xff] }
  0x8d   : > { %v4612_v54 = vpop.permute.xlu2 %364  ;;  %v4614_v55 = vpop.permute.xlu1 %342  ;;  %7501 = vst [vmem:[#allocation19_spill] sm:$0xff] %v4667_v52 }
  0x8e   : > { %7490 = vst [vmem:[#allocation8_spill] sm:$0xff] %v4612_v54  ;;  %v4616_v56 = vpop.permute.xlu0 %338  ;;  %v3690_v54 = vld [vmem:[%s4364_s18 + $0x170] sm:$0xff] }
  0x8f   : > { %7505 = vst [vmem:[#allocation23_spill] sm:$0xff] %v4685_v53 }
  0x93   : > { %500 = vrot.lane.b32.xlu2 %v4619_v57, %s4327_s20  ;;  %498 = vrot.lane.b32.xlu1 %v4622_v58, %s4327_s20 }
  0x94   : > { %496 = vrot.lane.b32.xlu0 %v4625_v59, %s4327_s20 }
  0x95   : > { %v4633_v60 = vpop.permute.xlu2 %370  ;;  %v4635_v61 = vpop.permute.xlu1 %350 }
  0x96   : > { %7494 = vst [vmem:[#allocation12_spill] sm:$0xff] %v4633_v60  ;;  %v4637_v62 = vpop.permute.xlu0 %348  ;;  %v4664_v60 = vld [vmem:[%s4364_s18 + $0x128] sm:$0xff] }
  0x97   : > { %7500 = vst [vmem:[#allocation18_spill] sm:$0xff] %v4664_v60 }
  0x9b   : > { %506 = vrot.lane.b32.xlu2 %v4640_v63, %s4327_s20  ;;  %504 = vrot.lane.b32.xlu1 %v4643_v2, %s4327_s20 }
  0x9c   : > { %502 = vrot.lane.b32.xlu0 %v4646_v5, %s4327_s20 }
  0x9d   : > { %v4654_v57 = vpop.permute.xlu2 %376  ;;  %v4656_v58 = vpop.permute.xlu1 %356 }
  0x9e   : > { %7498 = vst [vmem:[#allocation16_spill] sm:$0xff] %v4654_v57  ;;  %v4658_v59 = vpop.permute.xlu0 %354  ;;  %v4682_v57 = vld [vmem:[%s4364_s18 + $0x158] sm:$0xff] }
  0x9f   : > { %7504 = vst [vmem:[#allocation22_spill] sm:$0xff] %v4682_v57 }
  0xa3   : > { %512 = vrot.lane.b32.xlu2 %v4661_v51, %s4327_s20  ;;  %510 = vrot.lane.b32.xlu1 %v4664_v60, %s4327_s20 }
  0xa4   : > { %508 = vrot.lane.b32.xlu0 %v4667_v52, %s4327_s20 }
  0xa5   : > { %v4675_v63 = vpop.permute.xlu2 %382  ;;  %v4677_v2 = vpop.permute.xlu1 %362 }
  0xa6   : > { %7502 = vst [vmem:[#allocation20_spill] sm:$0xff] %v4675_v63  ;;  %v4679_v5 = vpop.permute.xlu0 %360  ;;  %v3691_v63 = vld [vmem:[%s4364_s18 + $0x180] sm:$0xff] }
  0xa7   : > { %7503 = vst [vmem:[#allocation21_spill] sm:$0xff] %v4677_v2 }
  0xab   : > { %518 = vrot.lane.b32.xlu2 %v4682_v57, %s4327_s20  ;;  %516 = vrot.lane.b32.xlu1 %v4685_v53, %s4327_s20 }
  0xac   : > { %514 = vrot.lane.b32.xlu0 %v4688_v45, %s4327_s20 }
  0xad   : > { %v4696_v51 = vpop.permute.xlu2 %388  ;;  %v4698_v60 = vpop.permute.xlu1 %368 }
  0xae   : > { %7507 = vst [vmem:[#allocation25_spill] sm:$0xff] %v4696_v51  ;;  %v4700_v52 = vpop.permute.xlu0 %366  ;;  %v3692_v51 = vld [vmem:[%s4364_s18 + $0x188] sm:$0xff] }
  0xaf   : > { %7508 = vst [vmem:[#allocation26_spill] sm:$0xff] %v4698_v60 }
  0xb0   : > { %7509 = vst [vmem:[#allocation27_spill] sm:$0xff] %v4700_v52 }
  0xb3   : > { %524 = vrot.lane.b32.xlu2 %v3691_v63, %s4327_s20  ;;  %522 = vrot.lane.b32.xlu1 %v3690_v54, %s4327_s20 }
  0xb4   : > { %520 = vrot.lane.b32.xlu0 %v3689_v46, %s4327_s20 }
  0xb5   : > { %v4708_v57 = vpop.permute.xlu2 %394  ;;  %v4710_v53 = vpop.permute.xlu1 %374 }
  0xb6   : > { %7510 = vst [vmem:[#allocation28_spill] sm:$0xff] %v4708_v57  ;;  %v4712_v45 = vpop.permute.xlu0 %372 }
  0xb7   : > { %7511 = vst [vmem:[#allocation29_spill] sm:$0xff] %v4710_v53 }
  0xb8   : > { %7512 = vst [vmem:[#allocation30_spill] sm:$0xff] %v4712_v45 }
  0xbb   : > { %594 = vrot.lane.b32.xlu2 %v4382_v4, %s4328_s21  ;;  %592 = vrot.lane.b32.xlu1 %v4370_v1, %s4328_s21 }
  0xbc   : > { %526 = vrot.lane.b32.xlu0 %v3692_v51, %s4327_s20 }
  0xbd   : > { %v4720_v63 = vpop.permute.xlu2 %464  ;;  %v4722_v54 = vpop.permute.xlu1 %380 }
  0xbe   : > { %7513 = vst [vmem:[#allocation31_spill] sm:$0xff] %v4722_v54  ;;  %v4724_v46 = vpop.permute.xlu0 %378 }
  0xbf   : > { %7514 = vst [vmem:[#allocation32_spill] sm:$0xff] %v4724_v46 }
  0xc3   : > { %600 = vrot.lane.b32.xlu2 %v4397_v8, %s4328_s21  ;;  %598 = vrot.lane.b32.xlu1 %v4379_v3, %s4328_s21 }
  0xc4   : > { %596 = vrot.lane.b32.xlu0 %v4367_v0, %s4328_s21 }
  0xc5   : > { %v4732_v57 = vpop.permute.xlu2 %470  ;;  %v4734_v53 = vpop.permute.xlu1 %386 }
  0xc6   : > { %7515 = vst [vmem:[#allocation33_spill] sm:$0xff] %v4734_v53  ;;  %v4736_v51 = vpop.permute.xlu0 %384 }
  0xc7   : > { %7516 = vst [vmem:[#allocation34_spill] sm:$0xff] %v4736_v51 }
  0xcb   : > { %606 = vrot.lane.b32.xlu2 %v4412_v11, %s4328_s21  ;;  %604 = vrot.lane.b32.xlu1 %v4391_v6, %s4328_s21 }
  0xcc   : > { %602 = vrot.lane.b32.xlu0 %v4394_v7, %s4328_s21 }
  0xcd   : > { %v4744_v54 = vpop.permute.xlu2 %476  ;;  %v4746_v46 = vpop.permute.xlu1 %392 }
  0xce   : > { %7517 = vst [vmem:[#allocation35_spill] sm:$0xff] %v4746_v46  ;;  %v4748_v45 = vpop.permute.xlu0 %390 }
  0xcf   : > { %7518 = vst [vmem:[#allocation36_spill] sm:$0xff] %v4748_v45 }
  0xd3   : > { %612 = vrot.lane.b32.xlu2 %v4427_v14, %s4328_s21  ;;  %610 = vrot.lane.b32.xlu1 %v4406_v9, %s4328_s21 }
  0xd4   : > { %608 = vrot.lane.b32.xlu0 %v4409_v10, %s4328_s21 }
  0xd5   : > { %v4756_v53 = vpop.permute.xlu2 %482  ;;  %v4758_v51 = vpop.permute.xlu1 %398 }
  0xd6   : > { %7519 = vst [vmem:[#allocation37_spill] sm:$0xff] %v4758_v51  ;;  %v4760_v60 = vpop.permute.xlu0 %396 }
  0xd7   : > { %7520 = vst [vmem:[#allocation38_spill] sm:$0xff] %v4760_v60 }
  0xdb   : > { %618 = vrot.lane.b32.xlu2 %v4442_v17, %s4328_s21  ;;  %616 = vrot.lane.b32.xlu1 %v4421_v12, %s4328_s21 }
  0xdc   : > { %614 = vrot.lane.b32.xlu0 %v4424_v13, %s4328_s21 }
  0xdd   : > { %v4768_v46 = vpop.permute.xlu2 %488  ;;  %v4770_v45 = vpop.permute.xlu1 %468 }
  0xde   : > { %7521 = vst [vmem:[#allocation39_spill] sm:$0xff] %v4768_v46  ;;  %v4772_v52 = vpop.permute.xlu0 %466 }
  0xe3   : > { %624 = vrot.lane.b32.xlu2 %v4457_v20, %s4328_s21  ;;  %622 = vrot.lane.b32.xlu1 %v4436_v15, %s4328_s21 }
  0xe4   : > { %620 = vrot.lane.b32.xlu0 %v4439_v16, %s4328_s21 }
  0xe5   : > { %v4780_v51 = vpop.permute.xlu2 %494  ;;  %v4782_v60 = vpop.permute.xlu1 %474 }
  0xe6   : > { %7522 = vst [vmem:[#allocation40_spill] sm:$0xff] %v4780_v51  ;;  %v4784_v2 = vpop.permute.xlu0 %472  ;;  %v175_v51 = vld [vmem:[%s4364_s18] sm:$0xff] }
  0xeb   : > { %630 = vrot.lane.b32.xlu2 %v4472_v23, %s4328_s21  ;;  %628 = vrot.lane.b32.xlu1 %v4451_v18, %s4328_s21 }
  0xec   : > { %626 = vrot.lane.b32.xlu0 %v4454_v19, %s4328_s21 }
  0xed   : > { %v4792_v20 = vpop.permute.xlu2 %500  ;;  %v4794_v46 = vpop.permute.xlu1 %480 }
  0xee   : > { %7523 = vst [vmem:[#allocation41_spill] sm:$0xff] %v4792_v20  ;;  %v4796_v17 = vpop.permute.xlu0 %478  ;;  %v787_v20 = vld [vmem:[%s7433_s1] sm:$0xff] }
  0xf3   : > { %636 = vrot.lane.b32.xlu2 %v4487_v26, %s4328_s21  ;;  %634 = vrot.lane.b32.xlu1 %v4466_v21, %s4328_s21 }
  0xf4   : > { %632 = vrot.lane.b32.xlu0 %v4469_v22, %s4328_s21 }
  0xf5   : > { %v4804_v18 = vpop.permute.xlu2 %506  ;;  %v4806_v19 = vpop.permute.xlu1 %486 }
  0xf6   : > { %7524 = vst [vmem:[#allocation42_spill] sm:$0xff] %v4804_v18  ;;  %v4808_v23 = vpop.permute.xlu0 %484  ;;  %v4838_v18 = vld [vmem:[%s4364_s18 + $0x181] sm:$0xff] }
  0xf7   : > { %7531 = vst [vmem:[#allocation49_spill] sm:$0xff] %v4838_v18 }
  0xfb   : > { %642 = vrot.lane.b32.xlu2 %v4502_v29, %s4328_s21  ;;  %640 = vrot.lane.b32.xlu1 %v4481_v24, %s4328_s21 }
  0xfc   : > { %638 = vrot.lane.b32.xlu0 %v4484_v25, %s4328_s21 }
  0xfd   : > { %v4816_v21 = vpop.permute.xlu2 %512  ;;  %v4818_v22 = vpop.permute.xlu1 %492 }
  0xfe   : > { %7525 = vst [vmem:[#allocation43_spill] sm:$0xff] %v4816_v21  ;;  %v4820_v26 = vpop.permute.xlu0 %490  ;;  %v4835_v21 = vld [vmem:[%s4364_s18 + $0x189] sm:$0xff] }
  0xff   : > { %7526 = vst [vmem:[#allocation44_spill] sm:$0xff] %v4818_v22 }
 0x100   : > { %7530 = vst [vmem:[#allocation48_spill] sm:$0xff] %v4835_v21 }
 0x103   : > { %648 = vrot.lane.b32.xlu2 %v4517_v32, %s4328_s21  ;;  %646 = vrot.lane.b32.xlu1 %v4496_v27, %s4328_s21  ;;  %v788_v27 = vld [vmem:[%s7433_s1 + $0x8] sm:$0xff] }
 0x104   : > { %644 = vrot.lane.b32.xlu0 %v4499_v28, %s4328_s21  ;;  %903 = vmatpush.msra.mxu0 %v788_v27 }
 0x105   : > { %v4828_v24 = vpop.permute.xlu2 %518  ;;  %v4830_v25 = vpop.permute.xlu1 %498 }
 0x106   : > { %7527 = vst [vmem:[#allocation45_spill] sm:$0xff] %v4828_v24  ;;  %v4832_v29 = vpop.permute.xlu0 %496  ;;  %904 = vmatpush.msra.mxu0 %v787_v20  ;;  %v4872_v20 = vld [vmem:[%s4364_s18 + $0x3a] sm:$0xff] }
 0x107   : > { %7528 = vst [vmem:[#allocation46_spill] sm:$0xff] %v4830_v25  ;;  %v1066_v25 = vld [vmem:[%s4364_s18 + $0x2] sm:$0xff] }
 0x108   : > { %7529 = vst [vmem:[#allocation47_spill] sm:$0xff] %v4832_v29  ;;  %v4917_v29 = vld [vmem:[%s4364_s18 + $0x7a] sm:$0xff] }
 0x109   : > { %7538 = vst [vmem:[#allocation56_spill] sm:$0xff] %v4872_v20 }
 0x10a   : > { %7549 = vst [vmem:[#allocation67_spill] sm:$0xff] %v4917_v29 }
 0x10b   : > { %654 = vrot.lane.b32.xlu2 %v4835_v21, %s4328_s21  ;;  %652 = vrot.lane.b32.xlu1 %v4838_v18, %s4328_s21  ;;  %v1067_v21 = vld [vmem:[%s4364_s18 + $0xa] sm:$0xff]  ;;  %v4878_v18 = vld [vmem:[%s4364_s18 + $0x22] sm:$0xff] }
 0x10c   : > { %650 = vrot.lane.b32.xlu0 %v4514_v31, %s4328_s21  ;;  %v4859_v31 = vld [vmem:[%s4364_s18 + $0x1a] sm:$0xff]  ;;  %7540 = vst [vmem:[#allocation58_spill] sm:$0xff] %v4878_v18 }
 0x10d   : > { %v4849_v28 = vpop.permute.xlu2 %524  ;;  %v4851_v32 = vpop.permute.xlu1 %504  ;;  %7535 = vst [vmem:[#allocation53_spill] sm:$0xff] %v4859_v31 }
 0x10e   : > { %7532 = vst [vmem:[#allocation50_spill] sm:$0xff] %v4849_v28  ;;  %v4853_v24 = vpop.permute.xlu0 %502 }
 0x10f   : > { %7533 = vst [vmem:[#allocation51_spill] sm:$0xff] %v4851_v32 }
 0x110   : > { %7534 = vst [vmem:[#allocation52_spill] sm:$0xff] %v4853_v24  ;;  %v4875_v24 = vld [vmem:[%s4364_s18 + $0x32] sm:$0xff] }
 0x111   : > { %7539 = vst [vmem:[#allocation57_spill] sm:$0xff] %v4875_v24 }
 0x113   : > { %1198 = vrot.lane.b32.xlu2 %v4859_v31, %s4326_s19  ;;  %1196 = vrot.lane.b32.xlu1 %v1067_v21, %s4326_s19  ;;  %v4896_v31 = vld [vmem:[%s4364_s18 + $0x52] sm:$0xff] }
 0x114   : > { %1194 = vrot.lane.b32.xlu0 %v1066_v25, %s4326_s19  ;;  %7544 = vst [vmem:[#allocation62_spill] sm:$0xff] %v4896_v31 }
 0x115   : > { %v595_v27 = vpop.permute.xlu2 %594  ;;  %v4867_v28 = vpop.permute.xlu1 %510 }
 0x116   : > { %7536 = vst [vmem:[#allocation54_spill] sm:$0xff] %v4867_v28  ;;  %v4869_v32 = vpop.permute.xlu0 %508 }
 0x117   : > { %7537 = vst [vmem:[#allocation55_spill] sm:$0xff] %v4869_v32  ;;  %v4893_v32 = vld [vmem:[%s4364_s18 + $0x62] sm:$0xff] }
 0x118   : > { %7543 = vst [vmem:[#allocation61_spill] sm:$0xff] %v4893_v32 }
 0x11b   : > { %1204 = vrot.lane.b32.xlu2 %v4872_v20, %s4326_s19  ;;  %1202 = vrot.lane.b32.xlu1 %v4875_v24, %s4326_s19  ;;  %v4899_v20 = vld [vmem:[%s4364_s18 + $0x4a] sm:$0xff] }
 0x11c   : > { %1200 = vrot.lane.b32.xlu0 %v4878_v18, %s4326_s19  ;;  %7545 = vst [vmem:[#allocation63_spill] sm:$0xff] %v4899_v20  ;;  %v4914_v18 = vld [vmem:[%s4364_s18 + $0x82] sm:$0xff] }
 0x11d   : > { %v4886_v21 = vpop.permute.xlu2 %600  ;;  %v4888_v25 = vpop.permute.xlu1 %516  ;;  %7548 = vst [vmem:[#allocation66_spill] sm:$0xff] %v4914_v18 }
 0x11e   : > { %7541 = vst [vmem:[#allocation59_spill] sm:$0xff] %v4888_v25  ;;  %v4890_v28 = vpop.permute.xlu0 %514 }
 0x11f   : > { %7542 = vst [vmem:[#allocation60_spill] sm:$0xff] %v4890_v28 }
 0x123   : > { %1210 = vrot.lane.b32.xlu2 %v4893_v32, %s4326_s19  ;;  %1208 = vrot.lane.b32.xlu1 %v4896_v31, %s4326_s19  ;;  %v4921_v32 = vld [vmem:[%s4364_s18 + $0x6a] sm:$0xff] }
 0x124   : > { %1206 = vrot.lane.b32.xlu0 %v4899_v20, %s4326_s19  ;;  %7550 = vst [vmem:[#allocation68_spill] sm:$0xff] %v4921_v32 }
 0x125   : > { %v4907_v24 = vpop.permute.xlu2 %606  ;;  %v4909_v25 = vpop.permute.xlu1 %522 }
 0x126   : > { %7546 = vst [vmem:[#allocation64_spill] sm:$0xff] %v4909_v25  ;;  %v4911_v28 = vpop.permute.xlu0 %520  ;;  %v689_v25 = vsel %vm688_vm0, %v175_v51, %v4595_v50  ;;  %v4940_v50 = vld [vmem:[%s4364_s18 + $0xaa] sm:$0xff]  ;;  %v4943_v51 = vld [vmem:[%s4364_s18 + $0x9a] sm:$0xff] }
 0x127   : > { %7547 = vst [vmem:[#allocation65_spill] sm:$0xff] %v4911_v28  ;;  %v722_v28 = vsel %vm721_vm1, %v689_v25, %v4720_v63 }
 0x128   : > { %7552 = vst [vmem:[#allocation70_spill] sm:$0xff] %v4943_v51 }
 0x12b   : > { %1216 = vrot.lane.b32.xlu2 %v4914_v18, %s4326_s19  ;;  %1214 = vrot.lane.b32.xlu1 %v4917_v29, %s4326_s19  ;;  %v176_v29 = vld [vmem:[%s4364_s18 + $0x8] sm:$0xff] }
 0x12c   : > { %1212 = vrot.lane.b32.xlu0 %v4921_v32, %s4326_s19  ;;  %v4947_v32 = vld [vmem:[%s4364_s18 + $0x92] sm:$0xff]  ;;  %v690_v63 = vsel %vm688_vm0, %v176_v29, %v4616_v56  ;;  %v4967_v56 = vld [vmem:[%s4364_s18 + $0xc2] sm:$0xff] }
 0x12d   : > { %v4933_v31 = vpop.permute.xlu2 %612  ;;  %v593_v20 = vpop.permute.xlu1 %592  ;;  %7554 = vst [vmem:[#allocation72_spill] sm:$0xff] %v4967_v56  ;;  %v4970_v29 = vld [vmem:[%s4364_s18 + $0xb2] sm:$0xff] }
 0x12e   : > { %v4935_v22 = vpop.permute.xlu0 %526  ;;  %v755_v18 = vsel %vm754_vm3, %v722_v28, %v593_v20 }
 0x12f   : > { %7551 = vst [vmem:[#allocation69_spill] sm:$0xff] %v4935_v22  ;;  %3725 = vmatmul.msk.f32.vlgmr.msra.gmra.mxu0 %vm792_vm2, %v755_v18  ;;  %v723_v18 = vsel %vm721_vm1, %v690_v63, %v4772_v52  ;;  %v691_v52 = vsel %vm688_vm0, %v4511_v30, %v4593_v49  ;;  %v4991_v30 = vld [vmem:[%s4364_s18 + $0xe2] sm:$0xff]  ;;  %v4994_v49 = vld [vmem:[%s4364_s18 + $0xda] sm:$0xff] }
 0x130   : > { %v756_v22 = vsel %vm754_vm3, %v723_v18, %v595_v27  ;;  %7556 = vst [vmem:[#allocation74_spill] sm:$0xff] %v4991_v30 }
 0x133   : > { %1222 = vrot.lane.b32.xlu2 %v4940_v50, %s4326_s19  ;;  %1220 = vrot.lane.b32.xlu1 %v4943_v51, %s4326_s19  ;;  %v4964_v51 = vld [vmem:[%s4364_s18 + $0xca] sm:$0xff] }
 0x134   : > { %1218 = vrot.lane.b32.xlu0 %v4947_v32, %s4326_s19  ;;  %7553 = vst [vmem:[#allocation71_spill] sm:$0xff] %v4964_v51 }
 0x135   : > { %v4959_v28 = vpop.permute.xlu2 %618  ;;  %v599_v20 = vpop.permute.xlu1 %598 }
 0x136   : > { %v597_v25 = vpop.permute.xlu0 %596 }
 0x137   : > { %3726 = vmatmul.msk.f32.gmra.mxu0 %vm792_vm2, %v756_v22  ;;  %v724_v22 = vsel %vm721_vm1, %v691_v52, %v4770_v45  ;;  %v692_v45 = vsel %vm688_vm0, %v4532_v35, %v4614_v55  ;;  %v5016_v35 = vld [vmem:[%s4364_s18 + $0x112] sm:$0xff]  ;;  %v5019_v55 = vld [vmem:[%s4364_s18 + $0x10a] sm:$0xff] }
 0x138   : > { %7557 = vst [vmem:[#allocation75_spill] sm:$0xff] %v5016_v35 }
 0x139   : > { %7558 = vst [vmem:[#allocation76_spill] sm:$0xff] %v5019_v55 }
 0x13b   : > { %1228 = vrot.lane.b32.xlu2 %v4964_v51, %s4326_s19  ;;  %1226 = vrot.lane.b32.xlu1 %v4967_v56, %s4326_s19  ;;  %v757_v51 = vsel %vm754_vm3, %v724_v22, %v597_v25  ;;  %v4988_v56 = vld [vmem:[%s4364_s18 + $0xf2] sm:$0xff] }
 0x13c   : > { %1224 = vrot.lane.b32.xlu0 %v4970_v29, %s4326_s19  ;;  %7555 = vst [vmem:[#allocation73_spill] sm:$0xff] %v4988_v56 }
 0x13d   : > { %v4983_v27 = vpop.permute.xlu2 %624  ;;  %v605_v63 = vpop.permute.xlu1 %604 }
 0x13e   : > { %v603_v18 = vpop.permute.xlu0 %602 }
 0x13f   : > { %3727 = vmatmul.msk.f32.gmra.mxu0 %vm792_vm2, %v757_v51  ;;  %v725_v51 = vsel %vm721_vm1, %v692_v45, %v4732_v57  ;;  %v693_v57 = vsel %vm688_vm0, %v4529_v34, %v4540_v36  ;;  %v5045_v34 = vld [vmem:[%s4364_s18 + $0x13a] sm:$0xff]  ;;  %v5048_v36 = vld [vmem:[%s4364_s18 + $0x12a] sm:$0xff] }
 0x140   : > { %7559 = vst [vmem:[#allocation77_spill] sm:$0xff] %v5045_v34 }
 0x141   : > { %7560 = vst [vmem:[#allocation78_spill] sm:$0xff] %v5048_v36 }
 0x143   : > { %1234 = vrot.lane.b32.xlu2 %v4988_v56, %s4326_s19  ;;  %1232 = vrot.lane.b32.xlu1 %v4991_v30, %s4326_s19  ;;  %v758_v56 = vsel %vm754_vm3, %v725_v51, %v599_v20  ;;  %v5022_v30 = vld [vmem:[%s4364_s18 + $0xfa] sm:$0xff]  ;;  %v726_v20 = vsel %vm721_vm1, %v693_v57, %v4784_v2  ;;  %v694_v2 = vsel %vm688_vm0, %v4526_v33, %v4557_v40  ;;  %v5076_v33 = vld [vmem:[%s4364_s18 + $0x152] sm:$0xff] }
 0x144   : > { %1230 = vrot.lane.b32.xlu0 %v4994_v49, %s4326_s19  ;;  %7563 = vst [vmem:[#allocation81_spill] sm:$0xff] %v5076_v33  ;;  %v5079_v40 = vld [vmem:[%s4364_s18 + $0x142] sm:$0xff] }
 0x145   : > { %v5007_v25 = vpop.permute.xlu2 %630  ;;  %v5009_v52 = vpop.permute.xlu1 %610 }
 0x146   : > { %v5011_v22 = vpop.permute.xlu0 %608 }
 0x147   : > { %3728 = vmatmul.msk.f32.gmra.mxu0 %vm792_vm2, %v758_v56 }
 0x14b   : > { %1240 = vrot.lane.b32.xlu2 %v5016_v35, %s4326_s19  ;;  %1238 = vrot.lane.b32.xlu1 %v5019_v55, %s4326_s19  ;;  %v759_v55 = vsel %vm754_vm3, %v726_v20, %v4886_v21  ;;  %v5051_v35 = vld [vmem:[%s4364_s18 + $0x122] sm:$0xff]  ;;  %v727_v21 = vsel %vm721_vm1, %v694_v2, %v4782_v60  ;;  %v695_v60 = vsel %vm688_vm0, %v4549_v39, %v4637_v62 }
 0x14c   : > { %1236 = vrot.lane.b32.xlu0 %v5022_v30, %s4326_s19  ;;  %v696_v39 = vsel %vm688_vm0, %v4546_v38, %v4635_v61 }
 0x14d   : > { %v5035_v56 = vpop.permute.xlu2 %636  ;;  %v5037_v45 = vpop.permute.xlu1 %616  ;;  %v729_v62 = vsel %vm721_vm1, %v696_v39, %v4796_v17  ;;  %v697_v17 = vsel %vm688_vm0, %v4543_v37, %v4574_v44 }
 0x14e   : > { %v5039_v51 = vpop.permute.xlu0 %614  ;;  %v730_v38 = vsel %vm721_vm1, %v697_v17, %v4794_v46 }
 0x14f   : > { %3729 = vmatmul.msk.f32.gmra.mxu0 %vm792_vm2, %v759_v55 }
 0x153   : > { %1246 = vrot.lane.b32.xlu2 %v5045_v34, %s4326_s19  ;;  %1244 = vrot.lane.b32.xlu1 %v5048_v36, %s4326_s19  ;;  %v760_v34 = vsel %vm754_vm3, %v727_v21, %v603_v18  ;;  %v5073_v36 = vld [vmem:[%s4364_s18 + $0x15a] sm:$0xff]  ;;  %v728_v18 = vsel %vm721_vm1, %v695_v60, %v4744_v54 }
 0x154   : > { %1242 = vrot.lane.b32.xlu0 %v5051_v35, %s4326_s19  ;;  %7562 = vst [vmem:[#allocation80_spill] sm:$0xff] %v5073_v36 }
 0x155   : > { %v5064_v55 = vpop.permute.xlu2 %642  ;;  %v5066_v57 = vpop.permute.xlu1 %622 }
 0x156   : > { %7561 = vst [vmem:[#allocation79_spill] sm:$0xff] %v5064_v55  ;;  %v5068_v20 = vpop.permute.xlu0 %620  ;;  %v5104_v55 = vld [vmem:[%s4364_s18 + $0x16a] sm:$0xff] }
 0x157   : > { %3730 = vmatmul.msk.f32.gmra.mxu0 %vm792_vm2, %v760_v34 }
 0x15b   : > { %1252 = vrot.lane.b32.xlu2 %v5073_v36, %s4326_s19  ;;  %1250 = vrot.lane.b32.xlu1 %v5076_v33, %s4326_s19  ;;  %v761_v36 = vsel %vm754_vm3, %v728_v18, %v605_v63  ;;  %v5101_v33 = vld [vmem:[%s4364_s18 + $0x172] sm:$0xff] }
 0x15c   : > { %1248 = vrot.lane.b32.xlu0 %v5079_v40, %s4326_s19 }
 0x15d   : > { %v5092_v34 = vpop.permute.xlu2 %648  ;;  %v5094_v2 = vpop.permute.xlu1 %628 }
 0x15e   : > { %v5096_v21 = vpop.permute.xlu0 %626 }
 0x15f   : > { %3731 = vmatmul.msk.f32.gmra.mxu0 %vm792_vm2, %v761_v36 }
 0x163   : > { %1322 = vrot.lane.b32.xlu2 %v4370_v1, %s4327_s20  ;;  %1256 = vrot.lane.b32.xlu1 %v5101_v33, %s4326_s19  ;;  %v762_v1 = vsel %vm754_vm3, %v729_v62, %v4907_v24 }
 0x164   : > { %1254 = vrot.lane.b32.xlu0 %v5104_v55, %s4326_s19 }
 0x165   : > { %v5117_v54 = vpop.permute.xlu2 %654  ;;  %v5119_v63 = vpop.permute.xlu1 %634 }
 0x166   : > { %v5121_v36 = vpop.permute.xlu0 %632 }
 0x167   : > { %3732 = vmatmul.msk.f32.gmra.mxu0 %vm792_vm2, %v762_v1 }
 0x16b   : > { %1328 = vrot.lane.b32.xlu2 %v4379_v3, %s4327_s20  ;;  %1326 = vrot.lane.b32.xlu1 %v4367_v0, %s4327_s20  ;;  %v763_v3 = vsel %vm754_vm3, %v730_v38, %v5011_v22  ;;  %v698_v0 = vsel %vm688_vm0, %v4566_v43, %v4658_v59  ;;  %v7567_v22 = vld [vmem:[#allocation21_spill] sm:$0xff] }
 0x16c   : > { %1324 = vrot.lane.b32.xlu0 %v4382_v4, %s4327_s20  ;;  %v731_v4 = vsel %vm721_vm1, %v698_v0, %v4756_v53  ;;  %v5256_v38 = vld [vmem:[%s4364_s18 + $0x111] sm:$0xff] }
 0x16d   : > { %v5137_v61 = vpop.permute.xlu2 %1198  ;;  %v5139_v24 = vpop.permute.xlu1 %640  ;;  %v7570_v0 = vld [vmem:[#allocation8_spill] sm:$0xff] }
 0x16e   : > { %v5141_v60 = vpop.permute.xlu0 %638 }
 0x16f   : > { %3733 = vmatmul.msk.f32.gmra.mxu0 %vm792_vm2, %v763_v3  ;;  %v5259_v3 = vld [vmem:[%s4364_s18 + $0x109] sm:$0xff] }
 0x173   : > { %1334 = vrot.lane.b32.xlu2 %v4391_v6, %s4327_s20  ;;  %1332 = vrot.lane.b32.xlu1 %v4394_v7, %s4327_s20  ;;  %v764_v6 = vsel %vm754_vm3, %v731_v4, %v5009_v52  ;;  %v699_v7 = vsel %vm688_vm0, %v4563_v42, %v4656_v58  ;;  %v7571_v4 = vld [vmem:[#allocation3_spill] sm:$0xff] }
 0x174   : > { %1330 = vrot.lane.b32.xlu0 %v4397_v8, %s4327_s20  ;;  %v732_v8 = vsel %vm721_vm1, %v699_v7, %v4808_v23 }
 0x175   : > { %v5157_v37 = vpop.permute.xlu2 %1204  ;;  %v5159_v44 = vpop.permute.xlu1 %646 }
 0x176   : > { %v5161_v46 = vpop.permute.xlu0 %644 }
 0x177   : > { %3734 = vmatmul.msk.f32.gmra.mxu0 %vm792_vm2, %v764_v6  ;;  %v7572_v6 = vld [vmem:[#allocation44_spill] sm:$0xff] }
 0x17b   : > { %1340 = vrot.lane.b32.xlu2 %v4406_v9, %s4327_s20  ;;  %1338 = vrot.lane.b32.xlu1 %v4409_v10, %s4327_s20  ;;  %v765_v9 = vsel %vm754_vm3, %v732_v8, %v4933_v31  ;;  %v700_v10 = vsel %vm688_vm0, %v4560_v41, %v4591_v48  ;;  %v7564_v41 = vld [vmem:[#allocation2_spill] sm:$0xff]  ;;  %v7565_v48 = vld [vmem:[#allocation39_spill] sm:$0xff] }
 0x17c   : > { %1336 = vrot.lane.b32.xlu0 %v4412_v11, %s4327_s20  ;;  %v733_v11 = vsel %vm721_vm1, %v700_v10, %v4806_v19 }
 0x17d   : > { %v5177_v43 = vpop.permute.xlu2 %1210  ;;  %v5179_v53 = vpop.permute.xlu1 %652 }
 0x17e   : > { %v5181_v59 = vpop.permute.xlu0 %650 }
 0x17f   : > { %3735 = vmatmul.msk.f32.gmra.mxu0 %vm792_vm2, %v765_v9 }
 0x183   : > { %1346 = vrot.lane.b32.xlu2 %v4421_v12, %s4327_s20  ;;  %1344 = vrot.lane.b32.xlu1 %v4424_v13, %s4327_s20  ;;  %v766_v13 = vsel %vm754_vm3, %v733_v11, %v5039_v51  ;;  %v7568_v51 = vld [vmem:[#allocation4_spill] sm:$0xff] }
 0x184   : > { %1342 = vrot.lane.b32.xlu0 %v4427_v14, %s4327_s20  ;;  %v701_v14 = vsel %vm688_vm0, %v4583_v47, %v4679_v5  ;;  %v5230_v47 = vld [vmem:[%s4364_s18 + $0xe1] sm:$0xff]  ;;  %v5233_v5 = vld [vmem:[%s4364_s18 + $0xd9] sm:$0xff] }
 0x185   : > { %v5197_v42 = vpop.permute.xlu2 %1216  ;;  %v5199_v58 = vpop.permute.xlu1 %1196  ;;  %v734_v19 = vsel %vm721_vm1, %v701_v14, %v7565_v48  ;;  %v5289_v14 = vld [vmem:[%s4364_s18 + $0x129] sm:$0xff] }
 0x186   : > { %v5201_v12 = vpop.permute.xlu0 %1194  ;;  %v7575_v48 = vld [vmem:[#allocation7_spill] sm:$0xff] }
 0x187   : > { %3736 = vmatmul.msk.f32.gmra.mxu0 %vm792_vm2, %v766_v13  ;;  %v5286_v13 = vld [vmem:[%s4364_s18 + $0x139] sm:$0xff] }
 0x18b   : > { %1352 = vrot.lane.b32.xlu2 %v4436_v15, %s4327_s20  ;;  %1350 = vrot.lane.b32.xlu1 %v4439_v16, %s4327_s20  ;;  %v767_v15 = vsel %vm754_vm3, %v734_v19, %v5037_v45  ;;  %v5227_v16 = vld [vmem:[%s4364_s18 + $0xf1] sm:$0xff]  ;;  %v702_v45 = vsel %vm688_vm0, %v7568_v51, %v7567_v22 }
 0x18c   : > { %1348 = vrot.lane.b32.xlu0 %v7564_v41, %s4327_s20  ;;  %v735_v18 = vsel %vm721_vm1, %v702_v45, %v4820_v26  ;;  %v5262_v26 = vld [vmem:[%s4364_s18 + $0xf9] sm:$0xff]  ;;  %v5292_v41 = vld [vmem:[%s4364_s18 + $0x121] sm:$0xff] }
 0x18d   : > { %v5217_v23 = vpop.permute.xlu2 %1222  ;;  %v5219_v31 = vpop.permute.xlu1 %1202  ;;  %v768_v17 = vsel %vm754_vm3, %v735_v18, %v4959_v28  ;;  %v703_v28 = vsel %vm688_vm0, %v7571_v4, %v7570_v0  ;;  %v5315_v0 = vld [vmem:[%s4364_s18 + $0x159] sm:$0xff]  ;;  %v5318_v4 = vld [vmem:[%s4364_s18 + $0x151] sm:$0xff] }
 0x18e   : > { %7566 = vst [vmem:[#allocation2_spill] sm:$0xff] %v5217_v23  ;;  %v5221_v52 = vpop.permute.xlu0 %1200  ;;  %v736_v7 = vsel %vm721_vm1, %v703_v28, %v7572_v6  ;;  %v5321_v28 = vld [vmem:[%s4364_s18 + $0x141] sm:$0xff]  ;;  %v5326_v6 = vld [vmem:[%s7434_s2] ss:$0 sm:$0xff] }
 0x18f   : > { %3737 = vmatmul.msk.f32.gmra.mxu0 %vm792_vm2, %v767_v15  ;;  %v769_v11 = vsel %vm754_vm3, %v736_v7, %v5068_v20  ;;  %v7574_v20 = vld [vmem:[#allocation27_spill] sm:$0xff]  ;;  %v7576_v15 = vld [vmem:[#allocation40_spill] sm:$0xff]  ;;  %v7579_v7 = vld [vmem:[#allocation6_spill] sm:$0xff] }
 0x190   : > { %v704_v19 = vsel %vm688_vm0, %v7575_v48, %v7574_v20  ;;  %v7580_v48 = vld [vmem:[#allocation47_spill] sm:$0xff] }
 0x191   : > { %v737_v22 = vsel %vm721_vm1, %v704_v19, %v7576_v15 }
 0x193   : > { %1358 = vrot.lane.b32.xlu2 %v5227_v16, %s4327_s20  ;;  %1356 = vrot.lane.b32.xlu1 %v5230_v47, %s4327_s20 }
 0x194   : > { %1354 = vrot.lane.b32.xlu0 %v5233_v5, %s4327_s20 }
 0x195   : > { %v5246_v39 = vpop.permute.xlu2 %1228  ;;  %v5248_v62 = vpop.permute.xlu1 %1208 }
 0x196   : > { %7569 = vst [vmem:[#allocation39_spill] sm:$0xff] %v5246_v39  ;;  %v5250_v1 = vpop.permute.xlu0 %1206 }
 0x197   : > { %3738 = vmatmul.msk.f32.gmra.mxu0 %vm792_vm2, %v768_v17  ;;  %v770_v17 = vsel %vm754_vm3, %v737_v22, %v5066_v57  ;;  %v7578_v57 = vld [vmem:[#allocation26_spill] sm:$0xff] }
 0x19b   : > { %1364 = vrot.lane.b32.xlu2 %v5256_v38, %s4327_s20  ;;  %1362 = vrot.lane.b32.xlu1 %v5259_v3, %s4327_s20 }
 0x19c   : > { %1360 = vrot.lane.b32.xlu0 %v5262_v26, %s4327_s20 }
 0x19d   : > { %v5275_v8 = vpop.permute.xlu2 %1234  ;;  %v5277_v9 = vpop.permute.xlu1 %1214 }
 0x19e   : > { %7573 = vst [vmem:[#allocation21_spill] sm:$0xff] %v5275_v8  ;;  %v5279_v10 = vpop.permute.xlu0 %1212  ;;  %v5360_v8 = vld [vmem:[%s4364_s18 + $0x169] sm:$0xff] }
 0x19f   : > { %3739 = vmatmul.msk.f32.gmra.mxu0 %vm792_vm2, %v769_v11  ;;  %v705_v11 = vsel %vm688_vm0, %v7579_v7, %v7578_v57 }
 0x1a0   : > { %v738_v19 = vsel %vm721_vm1, %v705_v11, %v7580_v48  ;;  %v7584_v11 = vld [vmem:[#allocation49_spill] sm:$0xff] }
 0x1a1   : > { %v771_v7 = vsel %vm754_vm3, %v738_v19, %v4983_v27  ;;  %v7586_v48 = vld [vmem:[#allocation5_spill] sm:$0xff]  ;;  %v7587_v19 = vld [vmem:[#allocation46_spill] sm:$0xff] }
 0x1a3   : > { %1370 = vrot.lane.b32.xlu2 %v5286_v13, %s4327_s20  ;;  %1368 = vrot.lane.b32.xlu1 %v5289_v14, %s4327_s20 }
 0x1a4   : > { %1366 = vrot.lane.b32.xlu0 %v5292_v41, %s4327_s20 }
 0x1a5   : > { %v5305_v51 = vpop.permute.xlu2 %1240  ;;  %v5307_v45 = vpop.permute.xlu1 %1220 }
 0x1a6   : > { %7577 = vst [vmem:[#allocation4_spill] sm:$0xff] %v5305_v51  ;;  %v5309_v18 = vpop.permute.xlu0 %1218  ;;  %v5357_v51 = vld [vmem:[%s4364_s18 + $0x171] sm:$0xff] }
 0x1a7   : > { %3740 = vmatmul.msk.f32.gmra.mxu0 %vm792_vm2, %v770_v17 }
 0x1ab   : > { %1376 = vrot.lane.b32.xlu2 %v5315_v0, %s4327_s20  ;;  %1374 = vrot.lane.b32.xlu1 %v5318_v4, %s4327_s20 }
 0x1ac   : > { %1372 = vrot.lane.b32.xlu0 %v5321_v28, %s4327_s20  ;;  %v906_v20 = vpop.f32.mrf.mxu0 }
 0x1ad   : > { %v907_v15 = vadd.f32 %v5326_v6, %v906_v20  ;;  %v5345_v22 = vpop.permute.xlu2 %1246  ;;  %v5347_v17 = vpop.permute.xlu1 %1226  ;;  %v7585_v20 = vld [vmem:[#allocation12_spill] sm:$0xff] }
 0x1ae   : > { %7581 = vst [vmem:[#allocation8_spill] sm:$0xff] %v5345_v22  ;;  %v5349_v57 = vpop.permute.xlu0 %1224  ;;  %v706_v22 = vsel %vm688_vm0, %v7586_v48, %v7585_v20  ;;  %v7591_v20 = vld [vmem:[#allocation58_spill] sm:$0xff] }
 0x1af   : > { %7582 = vst [vmem:[#allocation3_spill] sm:$0xff] %v5347_v17  ;;  %3741 = vmatmul.msk.f32.gmra.mxu0 %vm792_vm2, %v771_v7  ;;  %v7593_v48 = vld [vmem:[#allocation30_spill] sm:$0xff] }
 0x1b0   : > { %7583 = vst [vmem:[#allocation44_spill] sm:$0xff] %v5349_v57 }
 0x1b1   : > { %1002 = vst.msk [vmem:[%s5340_s5] sm:$0xff] %vm721_vm1, %v907_v15  ;;  %v739_v15 = vsel %vm721_vm1, %v706_v22, %v7587_v19  ;;  %v7592_v22 = vld [vmem:[#allocation53_spill] sm:$0xff] }
 0x1b2   : > { %v772_v57 = vsel %vm754_vm3, %v739_v15, %v5096_v21 }
 0x1b3   : > { %1382 = vrot.lane.b32.xlu2 %v7584_v11, %s4327_s20  ;;  %1380 = vrot.lane.b32.xlu1 %v5357_v51, %s4327_s20 }
 0x1b4   : > { %1378 = vrot.lane.b32.xlu0 %v5360_v8, %s4327_s20  ;;  %v909_v27 = vpop.f32.mrf.mxu0 }
 0x1b5   : > { %v910_v7 = vadd.f32 %v5326_v6, %v909_v27  ;;  %v5374_v39 = vpop.permute.xlu2 %1252  ;;  %v5376_v17 = vpop.permute.xlu1 %1232  ;;  %v7594_v27 = vld [vmem:[#allocation11_spill] sm:$0xff] }
 0x1b6   : > { %7588 = vst [vmem:[#allocation27_spill] sm:$0xff] %v5374_v39  ;;  %v5378_v11 = vpop.permute.xlu0 %1230  ;;  %v707_v19 = vsel %vm688_vm0, %v7594_v27, %v7593_v48  ;;  %v7595_v39 = vld [vmem:[#allocation48_spill] sm:$0xff]  ;;  %v7602_v48 = vld [vmem:[#allocation10_spill] sm:$0xff] }
 0x1b7   : > { %7589 = vst [vmem:[#allocation7_spill] sm:$0xff] %v5376_v17  ;;  %3742 = vmatmul.msk.f32.gmra.mxu0 %vm792_vm2, %v772_v57 }
 0x1b8   : > { %7590 = vst [vmem:[#allocation40_spill] sm:$0xff] %v5378_v11  ;;  %v7596_v11 = vld [vmem:[#allocation41_spill] sm:$0xff] }
 0x1b9   : > { %1003 = vst.msk [vmem:[%s5340_s5 + $0x8] sm:$0xff] %vm721_vm1, %v910_v7  ;;  %v740_v21 = vsel %vm721_vm1, %v707_v19, %v7596_v11  ;;  %v7600_v11 = vld [vmem:[#allocation56_spill] sm:$0xff]  ;;  %v7603_v19 = vld [vmem:[#allocation57_spill] sm:$0xff] }
 0x1bb   : > { %1452 = vrot.lane.b32.xlu2 %v7591_v20, %s4328_s21  ;;  %1450 = vrot.lane.b32.xlu1 %v7592_v22, %s4328_s21  ;;  %v773_v22 = vsel %vm754_vm3, %v740_v21, %v5094_v2 }
 0x1bc   : > { %1384 = vrot.lane.b32.xlu0 %v7595_v39, %s4327_s20  ;;  %v912_v17 = vpop.f32.mrf.mxu0  ;;  %v7599_v39 = vld [vmem:[#allocation63_spill] sm:$0xff] }
 0x1bd   : > { %v913_v15 = vadd.f32 %v5326_v6, %v912_v17  ;;  %v5397_v57 = vpop.permute.xlu2 %1322  ;;  %v5399_v7 = vpop.permute.xlu1 %1238  ;;  %v7601_v17 = vld [vmem:[#allocation29_spill] sm:$0xff] }
 0x1be   : > { %7597 = vst [vmem:[#allocation26_spill] sm:$0xff] %v5399_v7  ;;  %v5401_v20 = vpop.permute.xlu0 %1236  ;;  %v708_v27 = vsel %vm688_vm0, %v7602_v48, %v7601_v17  ;;  %v7607_v17 = vld [vmem:[#allocation68_spill] sm:$0xff]  ;;  %v7610_v48 = vld [vmem:[#allocation9_spill] sm:$0xff] }
 0x1bf   : > { %7598 = vst [vmem:[#allocation6_spill] sm:$0xff] %v5401_v20  ;;  %3743 = vmatmul.msk.f32.gmra.mxu0 %vm792_vm2, %v773_v22  ;;  %v7604_v20 = vld [vmem:[#allocation52_spill] sm:$0xff] }
 0x1c0   : > { %1004 = vst.msk [vmem:[%s5340_s5 + $0x10] sm:$0xff] %vm721_vm1, %v913_v15  ;;  %v741_v2 = vsel %vm721_vm1, %v708_v27, %v7604_v20  ;;  %v7608_v20 = vld [vmem:[#allocation61_spill] sm:$0xff] }
 0x1c3   : > { %1458 = vrot.lane.b32.xlu2 %v7599_v39, %s4328_s21  ;;  %1456 = vrot.lane.b32.xlu1 %v7600_v11, %s4328_s21  ;;  %v774_v11 = vsel %vm754_vm3, %v741_v2, %v5007_v25 }
 0x1c4   : > { %1454 = vrot.lane.b32.xlu0 %v7603_v19, %s4328_s21  ;;  %v915_v7 = vpop.f32.mrf.mxu0  ;;  %v7611_v19 = vld [vmem:[#allocation62_spill] sm:$0xff] }
 0x1c5   : > { %v916_v21 = vadd.f32 %v5326_v6, %v915_v7  ;;  %v5420_v15 = vpop.permute.xlu2 %1328  ;;  %v5422_v22 = vpop.permute.xlu1 %1244  ;;  %v7609_v7 = vld [vmem:[#allocation16_spill] sm:$0xff] }
 0x1c6   : > { %7605 = vst [vmem:[#allocation47_spill] sm:$0xff] %v5422_v22  ;;  %v5424_v39 = vpop.permute.xlu0 %1242  ;;  %v709_v27 = vsel %vm688_vm0, %v7610_v48, %v7609_v7  ;;  %v7617_v7 = vld [vmem:[#allocation15_spill] sm:$0xff] }
 0x1c7   : > { %7606 = vst [vmem:[#allocation49_spill] sm:$0xff] %v5424_v39  ;;  %3744 = vmatmul.msk.f32.gmra.mxu0 %vm792_vm2, %v774_v11  ;;  %v7612_v39 = vld [vmem:[#allocation51_spill] sm:$0xff] }
 0x1c8   : > { %1005 = vst.msk [vmem:[%s5340_s5 + $0x18] sm:$0xff] %vm721_vm1, %v916_v21  ;;  %v742_v25 = vsel %vm721_vm1, %v709_v27, %v7612_v39  ;;  %v7615_v39 = vld [vmem:[#allocation66_spill] sm:$0xff]  ;;  %v7618_v27 = vld [vmem:[#allocation67_spill] sm:$0xff] }
 0x1cb   : > { %1464 = vrot.lane.b32.xlu2 %v7607_v17, %s4328_s21  ;;  %1462 = vrot.lane.b32.xlu1 %v7608_v20, %s4328_s21  ;;  %v775_v20 = vsel %vm754_vm3, %v742_v25, %v5121_v36 }
 0x1cc   : > { %1460 = vrot.lane.b32.xlu0 %v7611_v19, %s4328_s21  ;;  %v918_v22 = vpop.f32.mrf.mxu0 }
 0x1cd   : > { %v919_v2 = vadd.f32 %v5326_v6, %v918_v22  ;;  %v5443_v21 = vpop.permute.xlu2 %1334  ;;  %v5445_v11 = vpop.permute.xlu1 %1250  ;;  %v7616_v22 = vld [vmem:[#allocation32_spill] sm:$0xff] }
 0x1ce   : > { %7613 = vst [vmem:[#allocation12_spill] sm:$0xff] %v5445_v11  ;;  %v5447_v17 = vpop.permute.xlu0 %1248  ;;  %v710_v48 = vsel %vm688_vm0, %v7617_v7, %v7616_v22  ;;  %v7619_v11 = vld [vmem:[#allocation42_spill] sm:$0xff] }
 0x1cf   : > { %7614 = vst [vmem:[#allocation5_spill] sm:$0xff] %v5447_v17  ;;  %3745 = vmatmul.msk.f32.gmra.mxu0 %vm792_vm2, %v775_v20  ;;  %v743_v36 = vsel %vm721_vm1, %v710_v48, %v7619_v11  ;;  %v7622_v11 = vld [vmem:[#allocation31_spill] sm:$0xff]  ;;  %v7623_v22 = vld [vmem:[#allocation14_spill] sm:$0xff] }
 0x1d0   : > { %1006 = vst.msk [vmem:[%s5340_s5 + $0x20] sm:$0xff] %vm721_vm1, %v919_v2  ;;  %v711_v7 = vsel %vm688_vm0, %v7623_v22, %v7622_v11  ;;  %v7624_v48 = vld [vmem:[#allocation70_spill] sm:$0xff]  ;;  %v7626_v11 = vld [vmem:[#allocation71_spill] sm:$0xff]  ;;  %v7627_v22 = vld [vmem:[#allocation20_spill] sm:$0xff] }
 0x1d3   : > { %1470 = vrot.lane.b32.xlu2 %v4947_v32, %s4328_s21  ;;  %1468 = vrot.lane.b32.xlu1 %v7615_v39, %s4328_s21  ;;  %v776_v39 = vsel %vm754_vm3, %v743_v36, %v5119_v63 }
 0x1d4   : > { %1466 = vrot.lane.b32.xlu0 %v7618_v27, %s4328_s21  ;;  %v921_v19 = vpop.f32.mrf.mxu0 }
 0x1d5   : > { %v922_v25 = vadd.f32 %v5326_v6, %v921_v19  ;;  %v5466_v2 = vpop.permute.xlu2 %1340  ;;  %v5468_v20 = vpop.permute.xlu1 %1256  ;;  %v7625_v19 = vld [vmem:[#allocation55_spill] sm:$0xff] }
 0x1d6   : > { %7620 = vst [vmem:[#allocation46_spill] sm:$0xff] %v5468_v20  ;;  %v5470_v32 = vpop.permute.xlu0 %1254  ;;  %v744_v63 = vsel %vm721_vm1, %v711_v7, %v7625_v19  ;;  %v7628_v7 = vld [vmem:[#allocation13_spill] sm:$0xff]  ;;  %v7630_v20 = vld [vmem:[#allocation54_spill] sm:$0xff] }
 0x1d7   : > { %7621 = vst [vmem:[#allocation58_spill] sm:$0xff] %v5470_v32  ;;  %3746 = vmatmul.msk.f32.gmra.mxu0 %vm792_vm2, %v776_v39  ;;  %v7636_v32 = vld [vmem:[#allocation43_spill] sm:$0xff] }
 0x1d8   : > { %1007 = vst.msk [vmem:[%s5340_s5 + $0x28] sm:$0xff] %vm721_vm1, %v922_v25 }
 0x1db   : > { %1476 = vrot.lane.b32.xlu2 %v4970_v29, %s4328_s21  ;;  %1474 = vrot.lane.b32.xlu1 %v4940_v50, %s4328_s21  ;;  %v777_v50 = vsel %vm754_vm3, %v744_v63, %v5035_v56 }
 0x1dc   : > { %1472 = vrot.lane.b32.xlu0 %v7624_v48, %s4328_s21  ;;  %v924_v27 = vpop.f32.mrf.mxu0  ;;  %v712_v48 = vsel %vm688_vm0, %v7628_v7, %v7627_v22  ;;  %v7633_v22 = vld [vmem:[#allocation34_spill] sm:$0xff]  ;;  %v7634_v7 = vld [vmem:[#allocation19_spill] sm:$0xff] }
 0x1dd   : > { %v925_v36 = vadd.f32 %v5326_v6, %v924_v27  ;;  %v5489_v25 = vpop.permute.xlu2 %1346  ;;  %v5491_v39 = vpop.permute.xlu1 %1326  ;;  %v7629_v27 = vld [vmem:[#allocation72_spill] sm:$0xff]  ;;  %v745_v56 = vsel %vm721_vm1, %v712_v48, %v7630_v20  ;;  %v7632_v20 = vld [vmem:[#allocation73_spill] sm:$0xff]  ;;  %v713_v48 = vsel %vm688_vm0, %v7634_v7, %v7633_v22  ;;  %v7640_v7 = vld [vmem:[#allocation18_spill] sm:$0xff] }
 0x1de   : > { %v5493_v29 = vpop.permute.xlu0 %1324  ;;  %v7639_v22 = vld [vmem:[#allocation33_spill] sm:$0xff] }
 0x1df   : > { %1008 = vst.msk [vmem:[%s5340_s5 + $0x30] sm:$0xff] %vm721_vm1, %v925_v36  ;;  %3747 = vmatmul.msk.f32.gmra.mxu0 %vm792_vm2, %v777_v50 }
 0x1e3   : > { %1482 = vrot.lane.b32.xlu2 %v4994_v49, %s4328_s21  ;;  %1480 = vrot.lane.b32.xlu1 %v7626_v11, %s4328_s21  ;;  %v778_v11 = vsel %vm754_vm3, %v745_v56, %v5141_v60  ;;  %v746_v60 = vsel %vm721_vm1, %v713_v48, %v7636_v32  ;;  %v7638_v32 = vld [vmem:[#allocation75_spill] sm:$0xff]  ;;  %v714_v48 = vsel %vm688_vm0, %v7640_v7, %v7639_v22  ;;  %v7645_v22 = vld [vmem:[#allocation77_spill] sm:$0xff] }
 0x1e4   : > { %1478 = vrot.lane.b32.xlu0 %v7629_v27, %s4328_s21  ;;  %v927_v19 = vpop.f32.mrf.mxu0  ;;  %v7635_v27 = vld [vmem:[#allocation74_spill] sm:$0xff]  ;;  %v7646_v7 = vld [vmem:[#allocation25_spill] sm:$0xff] }
 0x1e5   : > { %v928_v63 = vadd.f32 %v5326_v6, %v927_v19  ;;  %v5512_v36 = vpop.permute.xlu2 %1352  ;;  %v5514_v50 = vpop.permute.xlu1 %1332 }
 0x1e6   : > { %7631 = vst [vmem:[#allocation53_spill] sm:$0xff] %v5512_v36  ;;  %v5516_v49 = vpop.permute.xlu0 %1330 }
 0x1e7   : > { %1009 = vst.msk [vmem:[%s5340_s5 + $0x38] sm:$0xff] %vm721_vm1, %v928_v63  ;;  %3748 = vmatmul.msk.f32.gmra.mxu0 %vm792_vm2, %v778_v11 }
 0x1eb   : > { %1488 = vrot.lane.b32.xlu2 %v5022_v30, %s4328_s21  ;;  %1486 = vrot.lane.b32.xlu1 %v7632_v20, %s4328_s21  ;;  %v779_v30 = vsel %vm754_vm3, %v746_v60, %v5139_v24 }
 0x1ec   : > { %1484 = vrot.lane.b32.xlu0 %v7635_v27, %s4328_s21  ;;  %v930_v19 = vpop.f32.mrf.mxu0  ;;  %v7641_v27 = vld [vmem:[#allocation76_spill] sm:$0xff] }
 0x1ed   : > { %v931_v56 = vadd.f32 %v5326_v6, %v930_v19  ;;  %v5535_v63 = vpop.permute.xlu2 %1358  ;;  %v5537_v11 = vpop.permute.xlu1 %1338  ;;  %v7642_v19 = vld [vmem:[#allocation60_spill] sm:$0xff] }
 0x1ee   : > { %7637 = vst [vmem:[#allocation30_spill] sm:$0xff] %v5535_v63  ;;  %v5541_v20 = vpop.permute.xlu0 %1336  ;;  %v747_v60 = vsel %vm721_vm1, %v714_v48, %v7642_v19  ;;  %v7647_v48 = vld [vmem:[#allocation17_spill] sm:$0xff] }
 0x1ef   : > { %1010 = vst.msk [vmem:[%s5340_s5 + $0x40] sm:$0xff] %vm721_vm1, %v931_v56  ;;  %3749 = vmatmul.msk.f32.gmra.mxu0 %vm792_vm2, %v779_v30 }
 0x1f3   : > { %1494 = vrot.lane.b32.xlu2 %v5051_v35, %s4328_s21  ;;  %1492 = vrot.lane.b32.xlu1 %v7638_v32, %s4328_s21  ;;  %v7644_v35 = vld [vmem:[#allocation79_spill] sm:$0xff] }
 0x1f4   : > { %1490 = vrot.lane.b32.xlu0 %v7641_v27, %s4328_s21  ;;  %v933_v24 = vpop.f32.mrf.mxu0  ;;  %v780_v32 = vsel %vm754_vm3, %v747_v60, %v7644_v35  ;;  %v715_v27 = vsel %vm688_vm0, %v7647_v48, %v7646_v7  ;;  %v7649_v60 = vld [vmem:[#allocation59_spill] sm:$0xff]  ;;  %v7652_v7 = vld [vmem:[#allocation80_spill] sm:$0xff] }
 0x1f5   : > { %v934_v56 = vadd.f32 %v5326_v6, %v933_v24  ;;  %v5558_v30 = vpop.permute.xlu2 %1364  ;;  %v5560_v17 = vpop.permute.xlu1 %1344  ;;  %v7648_v24 = vld [vmem:[#allocation78_spill] sm:$0xff]  ;;  %v748_v35 = vsel %vm721_vm1, %v715_v27, %v7649_v60  ;;  %v7653_v48 = vld [vmem:[#allocation36_spill] sm:$0xff]  ;;  %v7656_v60 = vld [vmem:[#allocation45_spill] sm:$0xff] }
 0x1f6   : > { %7643 = vst [vmem:[#allocation11_spill] sm:$0xff] %v5558_v30  ;;  %v5564_v63 = vpop.permute.xlu0 %1342  ;;  %v7654_v27 = vld [vmem:[#allocation24_spill] sm:$0xff] }
 0x1f7   : > { %1011 = vst.msk [vmem:[%s5340_s5 + $0x48] sm:$0xff] %vm721_vm1, %v934_v56  ;;  %3750 = vmatmul.msk.f32.gmra.mxu0 %vm792_vm2, %v780_v32 }
 0x1fb   : > { %1500 = vrot.lane.b32.xlu2 %v5079_v40, %s4328_s21  ;;  %1498 = vrot.lane.b32.xlu1 %v7645_v22, %s4328_s21  ;;  %v781_v40 = vsel %vm754_vm3, %v748_v35, %v5161_v46  ;;  %v7655_v46 = vld [vmem:[#allocation81_spill] sm:$0xff] }
 0x1fc   : > { %1496 = vrot.lane.b32.xlu0 %v7648_v24, %s4328_s21  ;;  %v936_v19 = vpop.f32.mrf.mxu0  ;;  %v716_v24 = vsel %vm688_vm0, %v7654_v27, %v7653_v48  ;;  %v3820_v48 = vld [vmem:[%s4364_s18 + $0x18a] sm:$0xff]  ;;  %v3819_v27 = vld [vmem:[%s4364_s18 + $0x182] sm:$0xff] }
 0x1fd   : > { %v937_v56 = vadd.f32 %v5326_v6, %v936_v19  ;;  %v5581_v32 = vpop.permute.xlu2 %1370  ;;  %v5583_v30 = vpop.permute.xlu1 %1350  ;;  %v749_v35 = vsel %vm721_vm1, %v716_v24, %v7656_v60  ;;  %v7660_v24 = vld [vmem:[#allocation35_spill] sm:$0xff]  ;;  %v3822_v60 = vld [vmem:[%s7433_s1 + $0x18] sm:$0xff] }
 0x1fe   : > { %7650 = vst [vmem:[#allocation48_spill] sm:$0xff] %v5581_v32  ;;  %v5587_v22 = vpop.permute.xlu0 %1348  ;;  %1755 = vmatpush.msra.mxu1 %v3822_v60  ;;  %v5649_v60 = vld [vmem:[%s4364_s18 + $0x21] sm:$0xff] }
 0x1ff   : > { %7651 = vst [vmem:[#allocation41_spill] sm:$0xff] %v5583_v30  ;;  %3751 = vmatmul.msk.f32.gmra.mxu0 %vm792_vm2, %v781_v40 }
 0x200   : > { %1012 = vst.msk [vmem:[%s5340_s5 + $0x50] sm:$0xff] %vm721_vm1, %v937_v56 }
 0x203   : > { %1506 = vrot.lane.b32.xlu2 %v5104_v55, %s4328_s21  ;;  %1504 = vrot.lane.b32.xlu1 %v7652_v7, %s4328_s21  ;;  %v782_v55 = vsel %vm754_vm3, %v749_v35, %v5159_v44  ;;  %v7662_v35 = vld [vmem:[#allocation65_spill] sm:$0xff] }
 0x204   : > { %1502 = vrot.lane.b32.xlu0 %v7655_v46, %s4328_s21  ;;  %v939_v19 = vpop.f32.mrf.mxu0  ;;  %v7661_v46 = vld [vmem:[#allocation23_spill] sm:$0xff] }
 0x205   : > { %v940_v56 = vadd.f32 %v5326_v6, %v939_v19  ;;  %v5604_v40 = vpop.permute.xlu2 %1376  ;;  %v5606_v32 = vpop.permute.xlu1 %1356  ;;  %v717_v19 = vsel %vm688_vm0, %v7661_v46, %v7660_v24  ;;  %v3821_v46 = vld [vmem:[%s7433_s1 + $0x10] sm:$0xff] }
 0x206   : > { %7657 = vst [vmem:[#allocation63_spill] sm:$0xff] %v5604_v40  ;;  %v5610_v7 = vpop.permute.xlu0 %1354  ;;  %1756 = vmatpush.msra.mxu1 %v3821_v46 }
 0x207   : > { %7658 = vst [vmem:[#allocation56_spill] sm:$0xff] %v5606_v32  ;;  %3752 = vmatmul.msk.f32.gmra.mxu0 %vm792_vm2, %v782_v55 }
 0x208   : > { %7659 = vst [vmem:[#allocation29_spill] sm:$0xff] %v5610_v7 }
 0x209   : > { %1013 = vst.msk [vmem:[%s5340_s5 + $0x58] sm:$0xff] %vm721_vm1, %v940_v56  ;;  %v750_v56 = vsel %vm721_vm1, %v717_v19, %v7662_v35  ;;  %v3919_v19 = vld [vmem:[%s4364_s18 + $0x19] sm:$0xff] }
 0x20a   : > { %v783_v24 = vsel %vm754_vm3, %v750_v56, %v5092_v34  ;;  %v7666_v34 = vld [vmem:[#allocation28_spill] sm:$0xff]  ;;  %v7667_v35 = vld [vmem:[#allocation22_spill] sm:$0xff] }
 0x20b   : > { %1512 = vrot.lane.b32.xlu2 %v3820_v48, %s4328_s21  ;;  %1510 = vrot.lane.b32.xlu1 %v3819_v27, %s4328_s21  ;;  %v718_v56 = vsel %vm688_vm0, %v7667_v35, %v7666_v34  ;;  %v5677_v34 = vld [vmem:[%s4364_s18 + $0x51] sm:$0xff]  ;;  %v5680_v35 = vld [vmem:[%s4364_s18 + $0x49] sm:$0xff] }
 0x20c   : > { %1508 = vrot.lane.b32.xlu0 %v5101_v33, %s4328_s21  ;;  %v942_v44 = vpop.f32.mrf.mxu0 }
 0x20d   : > { %v943_v55 = vadd.f32 %v5326_v6, %v942_v44  ;;  %v5630_v48 = vpop.permute.xlu2 %1382  ;;  %v5632_v27 = vpop.permute.xlu1 %1362  ;;  %v5646_v44 = vld [vmem:[%s4364_s18 + $0x31] sm:$0xff] }
 0x20e   : > { %7663 = vst [vmem:[#allocation10_spill] sm:$0xff] %v5630_v48  ;;  %v5636_v33 = vpop.permute.xlu0 %1360 }
 0x20f   : > { %7664 = vst [vmem:[#allocation57_spill] sm:$0xff] %v5632_v27  ;;  %3753 = vmatmul.msk.f32.gmra.mxu0 %vm792_vm2, %v783_v24  ;;  %v7668_v24 = vld [vmem:[#allocation64_spill] sm:$0xff] }
 0x210   : > { %7665 = vst [vmem:[#allocation52_spill] sm:$0xff] %v5636_v33  ;;  %v751_v46 = vsel %vm721_vm1, %v718_v56, %v7668_v24 }
 0x211   : > { %1014 = vst.msk [vmem:[%s5340_s5 + $0x60] sm:$0xff] %vm721_vm1, %v943_v55  ;;  %v784_v33 = vsel %vm754_vm3, %v751_v46, %v5181_v59  ;;  %v4291_v59 = vld [vmem:[%s4364_s18 + $0x168] sm:$0xff] }
 0x213   : > { %2052 = vrot.lane.b32.xlu2 %v5646_v44, %s4326_s19  ;;  %2050 = vrot.lane.b32.xlu1 %v5649_v60, %s4326_s19 }
 0x214   : > { %2048 = vrot.lane.b32.xlu0 %v3919_v19, %s4326_s19  ;;  %v945_v55 = vpop.f32.mrf.mxu0  ;;  %v5674_v19 = vld [vmem:[%s4364_s18 + $0x39] sm:$0xff] }
 0x215   : > { %v946_v48 = vadd.f32 %v5326_v6, %v945_v55  ;;  %v5662_v40 = vpop.permute.xlu2 %1452  ;;  %v5664_v27 = vpop.permute.xlu1 %1368  ;;  %7671 = vst [vmem:[#allocation16_spill] sm:$0xff] %v5674_v19  ;;  %v7673_v55 = vld [vmem:[#allocation50_spill] sm:$0xff] }
 0x216   : > { %7669 = vst [vmem:[#allocation68_spill] sm:$0xff] %v5664_v27  ;;  %v5668_v32 = vpop.permute.xlu0 %1366 }
 0x217   : > { %7670 = vst [vmem:[#allocation61_spill] sm:$0xff] %v5668_v32  ;;  %3754 = vmatmul.msk.f32.gmra.mxu0 %vm792_vm2, %v784_v33 }
 0x218   : > { %1015 = vst.msk [vmem:[%s5340_s5 + $0x68] sm:$0xff] %vm721_vm1, %v946_v48  ;;  %v7672_v48 = vld [vmem:[#allocation38_spill] sm:$0xff] }
 0x219   : > { %v719_v33 = vsel %vm688_vm0, %v4291_v59, %v7672_v48  ;;  %v5706_v59 = vld [vmem:[%s4364_s18 + $0x61] sm:$0xff]  ;;  %v5709_v48 = vld [vmem:[%s4364_s18 + $0x79] sm:$0xff] }
 0x21a   : > { %v752_v24 = vsel %vm721_vm1, %v719_v33, %v7673_v55  ;;  %7676 = vst [vmem:[#allocation51_spill] sm:$0xff] %v5706_v59  ;;  %v5712_v33 = vld [vmem:[%s4364_s18 + $0x69] sm:$0xff] }
 0x21b   : > { %2058 = vrot.lane.b32.xlu2 %v5677_v34, %s4326_s19  ;;  %2056 = vrot.lane.b32.xlu1 %v5680_v35, %s4326_s19  ;;  %v785_v7 = vsel %vm754_vm3, %v752_v24, %v5179_v53  ;;  %v4292_v53 = vld [vmem:[%s4364_s18 + $0x170] sm:$0xff]  ;;  %v7678_v24 = vld [vmem:[#allocation69_spill] sm:$0xff] }
 0x21c   : > { %2054 = vrot.lane.b32.xlu0 %v5674_v19, %s4326_s19  ;;  %v948_v56 = vpop.f32.mrf.mxu0 }
 0x21d   : > { %v949_v46 = vadd.f32 %v5326_v6, %v948_v56  ;;  %v5694_v27 = vpop.permute.xlu2 %1458  ;;  %v5696_v32 = vpop.permute.xlu1 %1374  ;;  %v7677_v56 = vld [vmem:[#allocation37_spill] sm:$0xff] }
 0x21e   : > { %7674 = vst [vmem:[#allocation9_spill] sm:$0xff] %v5696_v32  ;;  %v5700_v36 = vpop.permute.xlu0 %1372 }
 0x21f   : > { %7675 = vst [vmem:[#allocation62_spill] sm:$0xff] %v5700_v36  ;;  %3755 = vmatmul.msk.f32.gmra.mxu0 %vm792_vm2, %v785_v7  ;;  %v720_v7 = vsel %vm688_vm0, %v4292_v53, %v7677_v56  ;;  %v1034_v53 = vld [vmem:[%s4364_s18 + $0x1] sm:$0xff] }
 0x220   : > { %1016 = vst.msk [vmem:[%s5340_s5 + $0x70] sm:$0xff] %vm721_vm1, %v949_v46  ;;  %v753_v46 = vsel %vm721_vm1, %v720_v7, %v7678_v24  ;;  %v5739_v56 = vld [vmem:[%s4364_s18 + $0x81] sm:$0xff]  ;;  %v5742_v7 = vld [vmem:[%s4364_s18 + $0x99] sm:$0xff] }
 0x221   : > { %v786_v30 = vsel %vm754_vm3, %v753_v46, %v5117_v54  ;;  %7681 = vst [vmem:[#allocation15_spill] sm:$0xff] %v5739_v56  ;;  %v1546_v54 = vsel %vm688_vm0, %v1034_v53, %v5201_v12  ;;  %v1035_v12 = vld [vmem:[%s4364_s18 + $0x9] sm:$0xff]  ;;  %v5768_v53 = vld [vmem:[%s4364_s18 + $0xc1] sm:$0xff] }
 0x222   : > { %7683 = vst [vmem:[#allocation42_spill] sm:$0xff] %v5768_v53 }
 0x223   : > { %2064 = vrot.lane.b32.xlu2 %v5709_v48, %s4326_s19  ;;  %2062 = vrot.lane.b32.xlu1 %v5712_v33, %s4326_s19 }
 0x224   : > { %2060 = vrot.lane.b32.xlu0 %v5706_v59, %s4326_s19  ;;  %v951_v55 = vpop.f32.mrf.mxu0 }
 0x225   : > { %v952_v32 = vadd.f32 %v5326_v6, %v951_v55  ;;  %v5726_v36 = vpop.permute.xlu2 %1464  ;;  %v5728_v19 = vpop.permute.xlu1 %1380  ;;  %v5745_v55 = vld [vmem:[%s4364_s18 + $0x91] sm:$0xff] }
 0x226   : > { %7679 = vst [vmem:[#allocation66_spill] sm:$0xff] %v5728_v19  ;;  %v5732_v23 = vpop.permute.xlu0 %1378 }
 0x227   : > { %7680 = vst [vmem:[#allocation32_spill] sm:$0xff] %v5732_v23  ;;  %3756 = vmatmul.msk.f32.gmra.mxu0 %vm792_vm2, %v786_v30 }
 0x228   : > { %1017 = vst.msk [vmem:[%s5340_s5 + $0x78] sm:$0xff] %vm721_vm1, %v952_v32  ;;  %v1578_v32 = vsel %vm721_vm1, %v1546_v54, %v5397_v57  ;;  %v5774_v57 = vld [vmem:[%s4364_s18 + $0xa9] sm:$0xff] }
 0x22b   : > { %2070 = vrot.lane.b32.xlu2 %v5742_v7, %s4326_s19  ;;  %2068 = vrot.lane.b32.xlu1 %v5745_v55, %s4326_s19 }
 0x22c   : > { %2066 = vrot.lane.b32.xlu0 %v5739_v56, %s4326_s19  ;;  %v954_v30 = vpop.f32.mrf.mxu0  ;;  %v5771_v56 = vld [vmem:[%s4364_s18 + $0xb1] sm:$0xff] }
 0x22d   : > { %v955_v24 = vadd.f32 %v5326_v6, %v954_v30  ;;  %v5758_v46 = vpop.permute.xlu2 %1470  ;;  %v1451_v19 = vpop.permute.xlu1 %1450 }
 0x22e   : > { %v5760_v23 = vpop.permute.xlu0 %1384  ;;  %v1610_v59 = vsel %vm754_vm3, %v1578_v32, %v1451_v19  ;;  %v1547_v19 = vsel %vm688_vm0, %v1035_v12, %v5199_v58  ;;  %v5795_v58 = vld [vmem:[%s4364_s18 + $0xc9] sm:$0xff] }
 0x22f   : > { %7682 = vst [vmem:[#allocation67_spill] sm:$0xff] %v5760_v23  ;;  %3823 = vmatmul.msk.f32.vlgmr.msra.gmra.mxu1 %vm792_vm2, %v1610_v59  ;;  %v1579_v54 = vsel %vm721_vm1, %v1547_v19, %v5493_v29  ;;  %v4293_v29 = vld [vmem:[%s4364_s18 + $0x19] sm:$0xff] }
 0x230   : > { %1018 = vst.msk [vmem:[%s5340_s5 + $0x80] sm:$0xff] %vm721_vm1, %v955_v24  ;;  %v1548_v12 = vsel %vm688_vm0, %v4293_v29, %v5137_v61  ;;  %v1549_v61 = vsel %vm688_vm0, %v5649_v60, %v5221_v52  ;;  %v1550_v52 = vsel %vm688_vm0, %v5646_v44, %v5219_v31  ;;  %v4294_v31 = vld [vmem:[%s4364_s18 + $0x39] sm:$0xff] }
 0x231   : > { %v1580_v19 = vsel %vm721_vm1, %v1548_v12, %v5491_v39 }
 0x233   : > { %2076 = vrot.lane.b32.xlu2 %v5768_v53, %s4326_s19  ;;  %2074 = vrot.lane.b32.xlu1 %v5771_v56, %s4326_s19  ;;  %v1611_v53 = vsel %vm754_vm3, %v1579_v54, %v5662_v40 }
 0x234   : > { %2072 = vrot.lane.b32.xlu0 %v5774_v57, %s4326_s19  ;;  %v957_v59 = vpop.f32.mrf.mxu0 }
 0x235   : > { %v958_v30 = vadd.f32 %v5326_v6, %v957_v59  ;;  %v5787_v32 = vpop.permute.xlu2 %1476  ;;  %v1457_v24 = vpop.permute.xlu1 %1456 }
 0x236   : > { %v1455_v23 = vpop.permute.xlu0 %1454 }
 0x237   : > { %1019 = vst.msk [vmem:[%s5340_s5 + $0x88] sm:$0xff] %vm721_vm1, %v958_v30  ;;  %3824 = vmatmul.msk.f32.gmra.mxu1 %vm792_vm2, %v1611_v53 }
 0x23b   : > { %2082 = vrot.lane.b32.xlu2 %v5230_v47, %s4326_s19  ;;  %2080 = vrot.lane.b32.xlu1 %v5233_v5, %s4326_s19  ;;  %v1612_v5 = vsel %vm754_vm3, %v1580_v19, %v1455_v23  ;;  %v1581_v23 = vsel %vm721_vm1, %v1549_v61, %v5420_v15  ;;  %v1582_v15 = vsel %vm721_vm1, %v1550_v52, %v5516_v49 }
 0x23c   : > { %2078 = vrot.lane.b32.xlu0 %v5795_v58, %s4326_s19  ;;  %v960_v40 = vpop.f32.mrf.mxu0 }
 0x23d   : > { %v961_v53 = vadd.f32 %v5326_v6, %v960_v40  ;;  %v5809_v59 = vpop.permute.xlu2 %1482  ;;  %v1463_v54 = vpop.permute.xlu1 %1462 }
 0x23e   : > { %v1461_v47 = vpop.permute.xlu0 %1460 }
 0x23f   : > { %1020 = vst.msk [vmem:[%s5340_s5 + $0x90] sm:$0xff] %vm721_vm1, %v961_v53  ;;  %3825 = vmatmul.msk.f32.gmra.mxu1 %vm792_vm2, %v1612_v5 }
 0x243   : > { %2088 = vrot.lane.b32.xlu2 %v5259_v3, %s4326_s19  ;;  %2086 = vrot.lane.b32.xlu1 %v5262_v26, %s4326_s19  ;;  %v1613_v26 = vsel %vm754_vm3, %v1581_v23, %v1457_v24 }
 0x244   : > { %2084 = vrot.lane.b32.xlu0 %v5227_v16, %s4326_s19  ;;  %v963_v39 = vpop.f32.mrf.mxu0 }
 0x245   : > { %v964_v30 = vadd.f32 %v5326_v6, %v963_v39  ;;  %v5827_v29 = vpop.permute.xlu2 %1488  ;;  %v5829_v12 = vpop.permute.xlu1 %1468 }
 0x246   : > { %v5831_v3 = vpop.permute.xlu0 %1466 }
 0x247   : > { %1021 = vst.msk [vmem:[%s5340_s5 + $0x98] sm:$0xff] %vm721_vm1, %v964_v30  ;;  %3826 = vmatmul.msk.f32.gmra.mxu1 %vm792_vm2, %v1613_v26 }
 0x24b   : > { %2094 = vrot.lane.b32.xlu2 %v5289_v14, %s4326_s19  ;;  %2092 = vrot.lane.b32.xlu1 %v5292_v41, %s4326_s19  ;;  %v1614_v41 = vsel %vm754_vm3, %v1582_v15, %v5694_v27 }
 0x24c   : > { %2090 = vrot.lane.b32.xlu0 %v5256_v38, %s4326_s19  ;;  %v966_v16 = vpop.f32.mrf.mxu0  ;;  %v1551_v38 = vsel %vm688_vm0, %v4294_v31, %v5157_v37  ;;  %v1552_v37 = vsel %vm688_vm0, %v5680_v35, %v5250_v1  ;;  %v5905_v1 = vld [vmem:[%s4364_s18 + $0x30] sm:$0xff]  ;;  %v1553_v35 = vsel %vm688_vm0, %v5677_v34, %v5248_v62  ;;  %v5934_v34 = vld [vmem:[%s4364_s18 + $0x48] sm:$0xff] }
 0x24d   : > { %v967_v60 = vadd.f32 %v5326_v6, %v966_v16  ;;  %v5849_v24 = vpop.permute.xlu2 %1494  ;;  %v5851_v40 = vpop.permute.xlu1 %1474  ;;  %v1583_v27 = vsel %vm721_vm1, %v1551_v38, %v5514_v50  ;;  %v1584_v50 = vsel %vm721_vm1, %v1552_v37, %v5443_v21  ;;  %v3949_v21 = vld [vmem:[%s4364_s18 + $0x181] sm:$0xff]  ;;  %v1585_v39 = vsel %vm721_vm1, %v1553_v35, %v5541_v20  ;;  %v5931_v62 = vld [vmem:[%s4364_s18 + $0x50] sm:$0xff]  ;;  %v5937_v20 = vld [vmem:[%s4364_s18 + $0x38] sm:$0xff] }
 0x24e   : > { %v5853_v14 = vpop.permute.xlu0 %1472  ;;  %v1617_v16 = vsel %vm754_vm3, %v1585_v39, %v5726_v36  ;;  %v4295_v36 = vld [vmem:[%s4364_s18 + $0x61] sm:$0xff] }
 0x24f   : > { %1022 = vst.msk [vmem:[%s5340_s5 + $0xa0] sm:$0xff] %vm721_vm1, %v967_v60  ;;  %3827 = vmatmul.msk.f32.gmra.mxu1 %vm792_vm2, %v1614_v41  ;;  %v1554_v15 = vsel %vm688_vm0, %v4295_v36, %v5177_v43  ;;  %v5963_v43 = vld [vmem:[%s4364_s18 + $0x78] sm:$0xff] }
 0x250   : > { %v1586_v41 = vsel %vm721_vm1, %v1554_v15, %v5537_v11  ;;  %v5966_v11 = vld [vmem:[%s4364_s18 + $0x68] sm:$0xff] }
 0x253   : > { %2100 = vrot.lane.b32.xlu2 %v5318_v4, %s4326_s19  ;;  %2098 = vrot.lane.b32.xlu1 %v5321_v28, %s4326_s19  ;;  %v1615_v28 = vsel %vm754_vm3, %v1583_v27, %v1461_v47 }
 0x254   : > { %2096 = vrot.lane.b32.xlu0 %v5286_v13, %s4326_s19  ;;  %v969_v49 = vpop.f32.mrf.mxu0 }
 0x255   : > { %v970_v44 = vadd.f32 %v5326_v6, %v969_v49  ;;  %v5872_v19 = vpop.permute.xlu2 %1500  ;;  %v5874_v53 = vpop.permute.xlu1 %1480 }
 0x256   : > { %v5876_v4 = vpop.permute.xlu0 %1478 }
 0x257   : > { %1023 = vst.msk [vmem:[%s5340_s5 + $0xa8] sm:$0xff] %vm721_vm1, %v970_v44  ;;  %3828 = vmatmul.msk.f32.gmra.mxu1 %vm792_vm2, %v1615_v28  ;;  %v1618_v44 = vsel %vm754_vm3, %v1586_v41, %v5831_v3  ;;  %v5969_v28 = vld [vmem:[%s4364_s18 + $0x60] sm:$0xff]  ;;  %v1555_v3 = vsel %vm688_vm0, %v5712_v33, %v5279_v10  ;;  %v3960_v10 = vld [vmem:[%s4364_s18 + $0x98] sm:$0xff]  ;;  %v3959_v33 = vld [vmem:[%s4364_s18 + $0x90] sm:$0xff] }
 0x25b   : > { %2106 = vrot.lane.b32.xlu2 %v5357_v51, %s4326_s19  ;;  %2104 = vrot.lane.b32.xlu1 %v5360_v8, %s4326_s19  ;;  %v1616_v8 = vsel %vm754_vm3, %v1584_v50, %v1463_v54 }
 0x25c   : > { %2102 = vrot.lane.b32.xlu0 %v5315_v0, %s4326_s19  ;;  %v972_v13 = vpop.f32.mrf.mxu0  ;;  %v3950_v0 = vld [vmem:[%s4364_s18 + $0x189] sm:$0xff] }
 0x25d   : > { %v973_v47 = vadd.f32 %v5326_v6, %v972_v13  ;;  %v5894_v5 = vpop.permute.xlu2 %1506  ;;  %v5896_v61 = vpop.permute.xlu1 %1486  ;;  %v1587_v13 = vsel %vm721_vm1, %v1555_v3, %v5466_v2  ;;  %v5997_v2 = vld [vmem:[%s4364_s18 + $0x80] sm:$0xff] }
 0x25e   : > { %v5898_v51 = vpop.permute.xlu0 %1484 }
 0x25f   : > { %1024 = vst.msk [vmem:[%s5340_s5 + $0xb0] sm:$0xff] %vm721_vm1, %v973_v47  ;;  %3829 = vmatmul.msk.f32.gmra.mxu1 %vm792_vm2, %v1616_v8 }
 0x263   : > { %2176 = vrot.lane.b32.xlu2 %v5905_v1, %s4327_s20  ;;  %2110 = vrot.lane.b32.xlu1 %v3950_v0, %s4326_s19 }
 0x264   : > { %2108 = vrot.lane.b32.xlu0 %v3949_v21, %s4326_s19  ;;  %v975_v54 = vpop.f32.mrf.mxu0  ;;  %v1619_v21 = vsel %vm754_vm3, %v1587_v13, %v5829_v12  ;;  %v1556_v12 = vsel %vm688_vm0, %v5709_v48, %v5277_v9  ;;  %v6021_v9 = vld [vmem:[%s4364_s18 + $0xc0] sm:$0xff]  ;;  %v6024_v48 = vld [vmem:[%s4364_s18 + $0xb0] sm:$0xff] }
 0x265   : > { %v976_v23 = vadd.f32 %v5326_v6, %v975_v54  ;;  %v5919_v30 = vpop.permute.xlu2 %1512  ;;  %v5921_v26 = vpop.permute.xlu1 %1492  ;;  %v1588_v54 = vsel %vm721_vm1, %v1556_v12, %v5564_v63  ;;  %v3961_v63 = vld [vmem:[%s4364_s18 + $0xa8] sm:$0xff] }
 0x266   : > { %v5923_v52 = vpop.permute.xlu0 %1490  ;;  %v1620_v15 = vsel %vm754_vm3, %v1588_v54, %v5758_v46  ;;  %v4296_v46 = vld [vmem:[%s4364_s18 + $0x81] sm:$0xff] }
 0x267   : > { %1025 = vst.msk [vmem:[%s5340_s5 + $0xb8] sm:$0xff] %vm721_vm1, %v976_v23  ;;  %3830 = vmatmul.msk.f32.gmra.mxu1 %vm792_vm2, %v1617_v16 }
 0x26b   : > { %2182 = vrot.lane.b32.xlu2 %v5931_v62, %s4327_s20  ;;  %2180 = vrot.lane.b32.xlu1 %v5934_v34, %s4327_s20 }
 0x26c   : > { %2178 = vrot.lane.b32.xlu0 %v5937_v20, %s4327_s20  ;;  %v978_v60 = vpop.f32.mrf.mxu0 }
 0x26d   : > { %v979_v31 = vadd.f32 %v5326_v6, %v978_v60  ;;  %v5951_v38 = vpop.permute.xlu2 %2052  ;;  %v5953_v49 = vpop.permute.xlu1 %1498  ;;  %v1557_v60 = vsel %vm688_vm0, %v4296_v46, %v5197_v42  ;;  %v6050_v42 = vld [vmem:[%s4364_s18 + $0xe0] sm:$0xff] }
 0x26e   : > { %v5955_v27 = vpop.permute.xlu0 %1496 }
 0x26f   : > { %1026 = vst.msk [vmem:[%s5340_s5 + $0xc0] sm:$0xff] %vm721_vm1, %v979_v31  ;;  %3831 = vmatmul.msk.f32.gmra.mxu1 %vm792_vm2, %v1618_v44  ;;  %v1589_v31 = vsel %vm721_vm1, %v1557_v60, %v5560_v17  ;;  %v6053_v17 = vld [vmem:[%s4364_s18 + $0xd8] sm:$0xff] }
 0x273   : > { %2188 = vrot.lane.b32.xlu2 %v5963_v43, %s4327_s20  ;;  %2186 = vrot.lane.b32.xlu1 %v5966_v11, %s4327_s20 }
 0x274   : > { %2184 = vrot.lane.b32.xlu0 %v5969_v28, %s4327_s20  ;;  %v981_v37 = vpop.f32.mrf.mxu0 }
 0x275   : > { %v982_v50 = vadd.f32 %v5326_v6, %v981_v37  ;;  %v5983_v47 = vpop.permute.xlu2 %2058  ;;  %v5985_v8 = vpop.permute.xlu1 %1504 }
 0x276   : > { %v5987_v0 = vpop.permute.xlu0 %1502 }
 0x277   : > { %1027 = vst.msk [vmem:[%s5340_s5 + $0xc8] sm:$0xff] %vm721_vm1, %v982_v50  ;;  %3832 = vmatmul.msk.f32.gmra.mxu1 %vm792_vm2, %v1619_v21  ;;  %v1621_v50 = vsel %vm754_vm3, %v1589_v31, %v5853_v14  ;;  %v6056_v21 = vld [vmem:[%s4364_s18 + $0xc8] sm:$0xff]  ;;  %v1558_v14 = vsel %vm688_vm0, %v5745_v55, %v5309_v18  ;;  %v3968_v55 = vld [vmem:[%s4364_s18 + $0xf8] sm:$0xff] }
 0x278   : > { %v3969_v18 = vld [vmem:[%s4364_s18 + $0x108] sm:$0xff] }
 0x27b   : > { %2194 = vrot.lane.b32.xlu2 %v3960_v10, %s4327_s20  ;;  %2192 = vrot.lane.b32.xlu1 %v3959_v33, %s4327_s20  ;;  %v1590_v33 = vsel %vm721_vm1, %v1558_v14, %v5489_v25  ;;  %v6084_v25 = vld [vmem:[%s4364_s18 + $0xf0] sm:$0xff] }
 0x27c   : > { %2190 = vrot.lane.b32.xlu0 %v5997_v2, %s4327_s20  ;;  %v984_v35 = vpop.f32.mrf.mxu0 }
 0x27d   : > { %v985_v39 = vadd.f32 %v5326_v6, %v984_v35  ;;  %v6009_v23 = vpop.permute.xlu2 %2064  ;;  %v6011_v16 = vpop.permute.xlu1 %1510 }
 0x27e   : > { %v6013_v36 = vpop.permute.xlu0 %1508 }
 0x27f   : > { %1028 = vst.msk [vmem:[%s5340_s5 + $0xd0] sm:$0xff] %vm721_vm1, %v985_v39  ;;  %3833 = vmatmul.msk.f32.gmra.mxu1 %vm792_vm2, %v1620_v15  ;;  %v1622_v15 = vsel %vm754_vm3, %v1590_v33, %v5851_v40 }
 0x283   : > { %2200 = vrot.lane.b32.xlu2 %v6021_v9, %s4327_s20  ;;  %2198 = vrot.lane.b32.xlu1 %v6024_v48, %s4327_s20 }
 0x284   : > { %2196 = vrot.lane.b32.xlu0 %v3961_v63, %s4327_s20  ;;  %v987_v41 = vpop.f32.mrf.mxu0  ;;  %v1559_v63 = vsel %vm688_vm0, %v5742_v7, %v5307_v45  ;;  %v6108_v45 = vld [vmem:[%s4364_s18 + $0x31] sm:$0xff]  ;;  %v7685_v7 = vld [vmem:[#allocation2_spill] sm:$0xff] }
 0x285   : > { %v988_v44 = vadd.f32 %v5326_v6, %v987_v41  ;;  %v6038_v3 = vpop.permute.xlu2 %2070  ;;  %v6040_v37 = vpop.permute.xlu1 %2050  ;;  %v1591_v46 = vsel %vm721_vm1, %v1559_v63, %v5587_v22  ;;  %v4113_v22 = vld [vmem:[%s4364_s18 + $0x1a] sm:$0xff] }
 0x286   : > { %7684 = vst [vmem:[#allocation31_spill] sm:$0xff] %v6038_v3  ;;  %v6042_v13 = vpop.permute.xlu0 %2048 }
 0x287   : > { %1029 = vst.msk [vmem:[%s5340_s5 + $0xd8] sm:$0xff] %vm721_vm1, %v988_v44  ;;  %3834 = vmatmul.msk.f32.gmra.mxu1 %vm792_vm2, %v1621_v50  ;;  %v1623_v50 = vsel %vm754_vm3, %v1591_v46, %v5787_v32  ;;  %v1560_v32 = vsel %vm688_vm0, %v5774_v57, %v7685_v7  ;;  %v4114_v57 = vld [vmem:[%s4364_s18 + $0x22] sm:$0xff]  ;;  %v7689_v46 = vld [vmem:[#allocation16_spill] sm:$0xff] }
 0x28b   : > { %2206 = vrot.lane.b32.xlu2 %v6050_v42, %s4327_s20  ;;  %2204 = vrot.lane.b32.xlu1 %v6053_v17, %s4327_s20 }
 0x28c   : > { %2202 = vrot.lane.b32.xlu0 %v6056_v21, %s4327_s20  ;;  %v990_v10 = vpop.f32.mrf.mxu0 }
 0x28d   : > { %v991_v12 = vadd.f32 %v5326_v6, %v990_v10  ;;  %v6070_v35 = vpop.permute.xlu2 %2076  ;;  %v6072_v54 = vpop.permute.xlu1 %2056  ;;  %v7686_v10 = vld [vmem:[#allocation41_spill] sm:$0xff] }
 0x28e   : > { %v6074_v39 = vpop.permute.xlu0 %2054  ;;  %v1592_v33 = vsel %vm721_vm1, %v1560_v32, %v7686_v10 }
 0x28f   : > { %1030 = vst.msk [vmem:[%s5340_s5 + $0xe0] sm:$0xff] %vm721_vm1, %v991_v12  ;;  %3835 = vmatmul.msk.f32.gmra.mxu1 %vm792_vm2, %v1622_v15  ;;  %v1624_v63 = vsel %vm754_vm3, %v1592_v33, %v5876_v4 }
 0x293   : > { %2212 = vrot.lane.b32.xlu2 %v3969_v18, %s4327_s20  ;;  %2210 = vrot.lane.b32.xlu1 %v3968_v55, %s4327_s20 }
 0x294   : > { %2208 = vrot.lane.b32.xlu0 %v6084_v25, %s4327_s20  ;;  %v993_v40 = vpop.f32.mrf.mxu0 }
 0x295   : > { %v994_v60 = vadd.f32 %v5326_v6, %v993_v40  ;;  %v6096_v41 = vpop.permute.xlu2 %2082  ;;  %v6098_v31 = vpop.permute.xlu1 %2062  ;;  %v4177_v40 = vld [vmem:[%s4364_s18 + $0x32] sm:$0xff] }
 0x296   : > { %v6100_v44 = vpop.permute.xlu0 %2060 }
 0x297   : > { %1031 = vst.msk [vmem:[%s5340_s5 + $0xe8] sm:$0xff] %vm721_vm1, %v994_v60  ;;  %3836 = vmatmul.msk.f32.gmra.mxu1 %vm792_vm2, %v1623_v50  ;;  %v7690_v60 = vld [vmem:[#allocation44_spill] sm:$0xff] }
 0x298   : > { %v1561_v50 = vsel %vm688_vm0, %v5771_v56, %v7690_v60  ;;  %v4178_v56 = vld [vmem:[%s4364_s18 + $0x3a] sm:$0xff] }
 0x29b   : > { %3029 = vrot.lane.b32.xlu2 %v6108_v45, %s4327_s20  ;;  %2304 = vrot.lane.b32.xlu1 %v6108_v45, %s4328_s21 }
 0x29c   : > { %2901 = vrot.lane.b32.xlu0 %v4113_v22, %s4326_s19  ;;  %v996_v14 = vpop.f32.mrf.mxu0  ;;  %v7691_v22 = vld [vmem:[#allocation53_spill] sm:$0xff] }
 0x29d   : > { %v997_v12 = vadd.f32 %v5326_v6, %v996_v14  ;;  %v6122_v15 = vpop.permute.xlu2 %2088  ;;  %v6124_v18 = vpop.permute.xlu1 %2068  ;;  %v1593_v7 = vsel %vm721_vm1, %v1561_v50, %v7691_v22 }
 0x29e   : > { %7687 = vst [vmem:[#allocation14_spill] sm:$0xff] %v6122_v15  ;;  %v6126_v55 = vpop.permute.xlu0 %2066 }
 0x29f   : > { %7688 = vst [vmem:[#allocation70_spill] sm:$0xff] %v6124_v18  ;;  %3837 = vmatmul.msk.f32.gmra.mxu1 %vm792_vm2, %v1624_v63  ;;  %v7694_v63 = vld [vmem:[#allocation3_spill] sm:$0xff] }
 0x2a0   : > { %1032 = vst.msk [vmem:[%s5340_s5 + $0xf0] sm:$0xff] %vm721_vm1, %v997_v12  ;;  %v1625_v12 = vsel %vm754_vm3, %v1593_v7, %v5874_v53  ;;  %v7696_v53 = vld [vmem:[#allocation29_spill] sm:$0xff] }
 0x2a3   : > { %2306 = vrot.lane.b32.xlu2 %v7689_v46, %s4328_s21  ;;  %2903 = vrot.lane.b32.xlu1 %v4114_v57, %s4326_s19  ;;  %v7695_v57 = vld [vmem:[#allocation42_spill] sm:$0xff] }
 0x2a4   : > { %3157 = vrot.lane.b32.xlu0 %v4177_v40, %s4328_s21  ;;  %v999_v4 = vpop.f32.mrf.mxu0  ;;  %v1562_v60 = vsel %vm688_vm0, %v7695_v57, %v7694_v63  ;;  %v6180_v63 = vld [vmem:[%s4364_s18 + $0x49] sm:$0xff] }
 0x2a5   : > { %v1000_v32 = vadd.f32 %v5326_v6, %v999_v4  ;;  %v6145_v14 = vpop.permute.xlu2 %2094  ;;  %v6147_v10 = vpop.permute.xlu1 %2074  ;;  %v1594_v4 = vsel %vm721_vm1, %v1562_v60, %v7696_v53  ;;  %v7698_v57 = vld [vmem:[#allocation39_spill] sm:$0xff] }
 0x2a6   : > { %7692 = vst [vmem:[#allocation55_spill] sm:$0xff] %v6145_v14  ;;  %v6149_v33 = vpop.permute.xlu0 %2072  ;;  %v1563_v60 = vsel %vm688_vm0, %v5795_v58, %v7698_v57  ;;  %v6205_v58 = vld [vmem:[%s4364_s18 + $0x51] sm:$0xff]  ;;  %v4297_v57 = vld [vmem:[%s4364_s18 + $0xd9] sm:$0xff] }
 0x2a7   : > { %7693 = vst [vmem:[#allocation71_spill] sm:$0xff] %v6149_v33  ;;  %3838 = vmatmul.msk.f32.gmra.mxu1 %vm792_vm2, %v1625_v12  ;;  %v1626_v12 = vsel %vm754_vm3, %v1594_v4, %v5809_v59 }
 0x2a8   : > { %1033 = vst.msk [vmem:[%s5340_s5 + $0xf8] sm:$0xff] %vm721_vm1, %v1000_v32 }
 0x2ab   : > { %2905 = vrot.lane.b32.xlu2 %v4177_v40, %s4326_s19  ;;  %3159 = vrot.lane.b32.xlu1 %v4178_v56, %s4328_s21 }
 0x2ac   : > { %3031 = vrot.lane.b32.xlu0 %v7689_v46, %s4327_s20  ;;  %v1758_v50 = vpop.f32.mrf.mxu1  ;;  %v4179_v46 = vld [vmem:[%s4364_s18 + $0x4a] sm:$0xff] }
 0x2ad   : > { %v1759_v22 = vadd.f32 %v5326_v6, %v1758_v50  ;;  %v6167_v7 = vpop.permute.xlu2 %2100  ;;  %v6169_v32 = vpop.permute.xlu1 %2080  ;;  %v7699_v50 = vld [vmem:[#allocation56_spill] sm:$0xff] }
 0x2ae   : > { %7697 = vst [vmem:[#allocation20_spill] sm:$0xff] %v6167_v7  ;;  %v6171_v40 = vpop.permute.xlu0 %2078  ;;  %v1595_v53 = vsel %vm721_vm1, %v1563_v60, %v7699_v50  ;;  %v7702_v60 = vld [vmem:[#allocation40_spill] sm:$0xff]  ;;  %v7703_v50 = vld [vmem:[#allocation30_spill] sm:$0xff] }
 0x2af   : > { %3855 = vst.msk [vmem:[%s5340_s5 + $0x100] sm:$0xff] %vm721_vm1, %v1759_v22  ;;  %3839 = vmatmul.msk.f32.gmra.mxu1 %vm792_vm2, %v1626_v12  ;;  %v1627_v14 = vsel %vm754_vm3, %v1595_v53, %v5898_v51 }
 0x2b3   : > { %3161 = vrot.lane.b32.xlu2 %v4179_v46, %s4328_s21  ;;  %3033 = vrot.lane.b32.xlu1 %v6180_v63, %s4327_s20 }
 0x2b4   : > { %2308 = vrot.lane.b32.xlu0 %v6180_v63, %s4328_s21  ;;  %v1761_v59 = vpop.f32.mrf.mxu1 }
 0x2b5   : > { %v1762_v4 = vadd.f32 %v5326_v6, %v1761_v59  ;;  %v6193_v22 = vpop.permute.xlu2 %2106  ;;  %v6195_v12 = vpop.permute.xlu1 %2086  ;;  %v1564_v59 = vsel %vm688_vm0, %v4297_v57, %v7702_v60  ;;  %v7706_v57 = vld [vmem:[#allocation51_spill] sm:$0xff] }
 0x2b6   : > { %7700 = vst [vmem:[#allocation13_spill] sm:$0xff] %v6193_v22  ;;  %v6197_v7 = vpop.permute.xlu0 %2084  ;;  %v7707_v60 = vld [vmem:[#allocation7_spill] sm:$0xff] }
 0x2b7   : > { %7701 = vst [vmem:[#allocation72_spill] sm:$0xff] %v6195_v12  ;;  %3840 = vmatmul.msk.f32.gmra.mxu1 %vm792_vm2, %v1627_v14  ;;  %v1596_v14 = vsel %vm721_vm1, %v1564_v59, %v7703_v50 }
 0x2b8   : > { %3856 = vst.msk [vmem:[%s5340_s5 + $0x108] sm:$0xff] %vm721_vm1, %v1762_v4  ;;  %v1628_v12 = vsel %vm754_vm3, %v1596_v14, %v5896_v61 }
 0x2bb   : > { %3035 = vrot.lane.b32.xlu2 %v6205_v58, %s4327_s20  ;;  %2310 = vrot.lane.b32.xlu1 %v6205_v58, %s4328_s21 }
 0x2bc   : > { %2907 = vrot.lane.b32.xlu0 %v4178_v56, %s4326_s19  ;;  %v1764_v51 = vpop.f32.mrf.mxu1  ;;  %v4180_v56 = vld [vmem:[%s4364_s18 + $0x52] sm:$0xff] }
 0x2bd   : > { %v1765_v53 = vadd.f32 %v5326_v6, %v1764_v51  ;;  %v6218_v4 = vpop.permute.xlu2 %2176  ;;  %v6220_v22 = vpop.permute.xlu1 %2092  ;;  %v4298_v6 = vld [vmem:[%s4364_s18 + $0xe1] sm:$0xff]  ;;  %v7708_v51 = vld [vmem:[#allocation52_spill] sm:$0xff] }
 0x2be   : > { %7704 = vst [vmem:[#allocation54_spill] sm:$0xff] %v6220_v22  ;;  %v6222_v15 = vpop.permute.xlu0 %2090  ;;  %v1565_v59 = vsel %vm688_vm0, %v4298_v6, %v7707_v60  ;;  %v4181_v60 = vld [vmem:[%s4364_s18 + $0x62] sm:$0xff] }
 0x2bf   : > { %7705 = vst [vmem:[#allocation73_spill] sm:$0xff] %v6222_v15  ;;  %3841 = vmatmul.msk.f32.gmra.mxu1 %vm792_vm2, %v1628_v12  ;;  %v1597_v50 = vsel %vm721_vm1, %v1565_v59, %v7708_v51  ;;  %v6242_v12 = vld [vmem:[%s7434_s2] ss:$0 sm:$0xff]  ;;  %v4300_v59 = vld [vmem:[%s4364_s18 + $0xf1] sm:$0xff] }
 0x2c0   : > { %3857 = vst.msk [vmem:[%s5340_s5 + $0x110] sm:$0xff] %vm721_vm1, %v1765_v53  ;;  %v1629_v6 = vsel %vm754_vm3, %v1597_v50, %v5827_v29  ;;  %v7712_v50 = vld [vmem:[#allocation57_spill] sm:$0xff] }
 0x2c3   : > { %2312 = vrot.lane.b32.xlu2 %v7706_v57, %s4328_s21  ;;  %2909 = vrot.lane.b32.xlu1 %v4179_v46, %s4326_s19 }
 0x2c4   : > { %3163 = vrot.lane.b32.xlu0 %v4180_v56, %s4328_s21  ;;  %v1767_v61 = vpop.f32.mrf.mxu1 }
 0x2c5   : > { %v1768_v14 = vadd.f32 %v6242_v12, %v1767_v61  ;;  %v6245_v53 = vpop.permute.xlu2 %2182  ;;  %v6247_v46 = vpop.permute.xlu1 %2098  ;;  %v7711_v61 = vld [vmem:[#allocation21_spill] sm:$0xff] }
 0x2c6   : > { %7709 = vst [vmem:[#allocation34_spill] sm:$0xff] %v6247_v46  ;;  %v6249_v22 = vpop.permute.xlu0 %2096  ;;  %v1566_v51 = vsel %vm688_vm0, %v4300_v59, %v7711_v61  ;;  %v6280_v59 = vld [vmem:[%s4364_s18 + $0x69] sm:$0xff]  ;;  %v4301_v61 = vld [vmem:[%s4364_s18 + $0xf9] sm:$0xff] }
 0x2c7   : > { %7710 = vst [vmem:[#allocation19_spill] sm:$0xff] %v6249_v22  ;;  %3842 = vmatmul.msk.f32.gmra.mxu1 %vm792_vm2, %v1629_v6 }
 0x2c8   : > { %3858 = vst.msk [vmem:[%s5340_s5 + $0x118] sm:$0xff] %vm721_vm1, %v1768_v14  ;;  %v1598_v14 = vsel %vm721_vm1, %v1566_v51, %v7712_v50  ;;  %v7715_v51 = vld [vmem:[#allocation6_spill] sm:$0xff]  ;;  %v7716_v50 = vld [vmem:[#allocation11_spill] sm:$0xff] }
 0x2c9   : > { %v1630_v15 = vsel %vm754_vm3, %v1598_v14, %v5923_v52 }
 0x2cb   : > { %2911 = vrot.lane.b32.xlu2 %v4180_v56, %s4326_s19  ;;  %3165 = vrot.lane.b32.xlu1 %v4181_v60, %s4328_s21 }
 0x2cc   : > { %3037 = vrot.lane.b32.xlu0 %v7706_v57, %s4327_s20  ;;  %v1770_v29 = vpop.f32.mrf.mxu1  ;;  %v4182_v57 = vld [vmem:[%s4364_s18 + $0x6a] sm:$0xff] }
 0x2cd   : > { %v1771_v6 = vadd.f32 %v6242_v12, %v1770_v29  ;;  %v6267_v46 = vpop.permute.xlu2 %2188  ;;  %v6269_v22 = vpop.permute.xlu1 %2104  ;;  %v1567_v29 = vsel %vm688_vm0, %v4301_v61, %v7715_v51  ;;  %v6305_v61 = vld [vmem:[%s4364_s18 + $0x79] sm:$0xff]  ;;  %v4302_v51 = vld [vmem:[%s4364_s18 + $0x109] sm:$0xff] }
 0x2ce   : > { %7713 = vst [vmem:[#allocation74_spill] sm:$0xff] %v6269_v22  ;;  %v6271_v56 = vpop.permute.xlu0 %2102 }
 0x2cf   : > { %7714 = vst [vmem:[#allocation43_spill] sm:$0xff] %v6271_v56  ;;  %3843 = vmatmul.msk.f32.gmra.mxu1 %vm792_vm2, %v1630_v15  ;;  %v1599_v15 = vsel %vm721_vm1, %v1567_v29, %v7716_v50  ;;  %v7719_v29 = vld [vmem:[#allocation26_spill] sm:$0xff]  ;;  %v7720_v50 = vld [vmem:[#allocation61_spill] sm:$0xff] }
 0x2d0   : > { %3859 = vst.msk [vmem:[%s5340_s5 + $0x120] sm:$0xff] %vm721_vm1, %v1771_v6  ;;  %v1631_v33 = vsel %vm754_vm3, %v1599_v15, %v5921_v26 }
 0x2d3   : > { %3167 = vrot.lane.b32.xlu2 %v4182_v57, %s4328_s21  ;;  %3039 = vrot.lane.b32.xlu1 %v6280_v59, %s4327_s20 }
 0x2d4   : > { %2314 = vrot.lane.b32.xlu0 %v6280_v59, %s4328_s21  ;;  %v1773_v52 = vpop.f32.mrf.mxu1 }
 0x2d5   : > { %v1774_v14 = vadd.f32 %v6242_v12, %v1773_v52  ;;  %v6293_v6 = vpop.permute.xlu2 %2194  ;;  %v6295_v22 = vpop.permute.xlu1 %2110  ;;  %v1568_v52 = vsel %vm688_vm0, %v4302_v51, %v7719_v29  ;;  %v7722_v51 = vld [vmem:[#allocation15_spill] sm:$0xff]  ;;  %v4303_v29 = vld [vmem:[%s4364_s18 + $0x111] sm:$0xff] }
 0x2d6   : > { %7717 = vst [vmem:[#allocation75_spill] sm:$0xff] %v6295_v22  ;;  %v6297_v56 = vpop.permute.xlu0 %2108 }
 0x2d7   : > { %7718 = vst [vmem:[#allocation33_spill] sm:$0xff] %v6297_v56  ;;  %3844 = vmatmul.msk.f32.gmra.mxu1 %vm792_vm2, %v1631_v33  ;;  %v1600_v33 = vsel %vm721_vm1, %v1568_v52, %v7720_v50  ;;  %v7723_v52 = vld [vmem:[#allocation4_spill] sm:$0xff] }
 0x2d8   : > { %3860 = vst.msk [vmem:[%s5340_s5 + $0x128] sm:$0xff] %vm721_vm1, %v1774_v14  ;;  %v1632_v3 = vsel %vm754_vm3, %v1600_v33, %v5849_v24  ;;  %v7724_v50 = vld [vmem:[#allocation68_spill] sm:$0xff] }
 0x2db   : > { %3041 = vrot.lane.b32.xlu2 %v6305_v61, %s4327_s20  ;;  %2316 = vrot.lane.b32.xlu1 %v6305_v61, %s4328_s21 }
 0x2dc   : > { %2913 = vrot.lane.b32.xlu0 %v4181_v60, %s4326_s19  ;;  %v1776_v26 = vpop.f32.mrf.mxu1  ;;  %v4183_v60 = vld [vmem:[%s4364_s18 + $0x7a] sm:$0xff] }
 0x2dd   : > { %v1777_v15 = vadd.f32 %v6242_v12, %v1776_v26  ;;  %v6318_v14 = vpop.permute.xlu2 %2200  ;;  %v6320_v22 = vpop.permute.xlu1 %2180  ;;  %v1569_v26 = vsel %vm688_vm0, %v4303_v29, %v7723_v52 }
 0x2de   : > { %7721 = vst [vmem:[#allocation18_spill] sm:$0xff] %v6318_v14  ;;  %v6322_v56 = vpop.permute.xlu0 %2178  ;;  %v1601_v33 = vsel %vm721_vm1, %v1569_v26, %v7724_v50  ;;  %v4184_v26 = vld [vmem:[%s4364_s18 + $0x82] sm:$0xff]  ;;  %v7727_v50 = vld [vmem:[#allocation48_spill] sm:$0xff] }
 0x2df   : > { %3861 = vst.msk [vmem:[%s5340_s5 + $0x130] sm:$0xff] %vm721_vm1, %v1777_v15  ;;  %3845 = vmatmul.msk.f32.gmra.mxu1 %vm792_vm2, %v1632_v3  ;;  %v2415_v3 = vsel %vm688_vm0, %v6056_v21, %v6171_v40  ;;  %v1633_v52 = vsel %vm754_vm3, %v1601_v33, %v5955_v27  ;;  %v4304_v21 = vld [vmem:[%s4364_s18 + $0x121] sm:$0xff]  ;;  %v7726_v40 = vld [vmem:[#allocation49_spill] sm:$0xff]  ;;  %v2418_v33 = vsel %vm688_vm0, %v6084_v25, %v6197_v7 }
 0x2e0   : > { %v4016_v27 = vld [vmem:[%s7433_s1 + $0x28] sm:$0xff]  ;;  %v4185_v25 = vld [vmem:[%s4364_s18 + $0x92] sm:$0xff] }
 0x2e1   : > { %2609 = vmatpush.msra.mxu2 %v4016_v27  ;;  %v6389_v7 = vld [vmem:[%s4364_s18 + $0x91] sm:$0xff] }
 0x2e3   : > { %2318 = vrot.lane.b32.xlu2 %v7722_v51, %s4328_s21  ;;  %2915 = vrot.lane.b32.xlu1 %v4182_v57, %s4326_s19 }
 0x2e4   : > { %3169 = vrot.lane.b32.xlu0 %v4183_v60, %s4328_s21  ;;  %v1779_v24 = vpop.f32.mrf.mxu1 }
 0x2e5   : > { %v1780_v15 = vadd.f32 %v6242_v12, %v1779_v24  ;;  %v2207_v14 = vpop.permute.xlu2 %2206  ;;  %v6343_v18 = vpop.permute.xlu1 %2186 }
 0x2e6   : > { %v6346_v57 = vsel %vm721_vm1, %v2415_v3, %v2207_v14  ;;  %v6348_v29 = vpop.permute.xlu0 %2184  ;;  %v1570_v14 = vsel %vm688_vm0, %v4304_v21, %v7726_v40 }
 0x2e7   : > { %7725 = vst [vmem:[#allocation76_spill] sm:$0xff] %v6346_v57  ;;  %3846 = vmatmul.msk.f32.gmra.mxu1 %vm792_vm2, %v1633_v52 }
 0x2e8   : > { %3862 = vst.msk [vmem:[%s5340_s5 + $0x138] sm:$0xff] %vm721_vm1, %v1780_v15 }
 0x2eb   : > { %2917 = vrot.lane.b32.xlu2 %v4183_v60, %s4326_s19  ;;  %3171 = vrot.lane.b32.xlu1 %v4184_v26, %s4328_s21  ;;  %v1602_v60 = vsel %vm721_vm1, %v1570_v14, %v7727_v50  ;;  %v4015_v14 = vld [vmem:[%s7433_s1 + $0x20] sm:$0xff] }
 0x2ec   : > { %3043 = vrot.lane.b32.xlu0 %v7722_v51, %s4327_s20  ;;  %v1782_v24 = vpop.f32.mrf.mxu1  ;;  %v1634_v51 = vsel %vm754_vm3, %v1602_v60, %v5953_v49  ;;  %2610 = vmatpush.msra.mxu2 %v4015_v14  ;;  %v4305_v49 = vld [vmem:[%s4364_s18 + $0x129] sm:$0xff]  ;;  %v4210_v60 = vld [vmem:[%s7433_s1 + $0x38] sm:$0xff] }
 0x2ed   : > { %v1783_v3 = vadd.f32 %v6242_v12, %v1782_v24  ;;  %v2213_v15 = vpop.permute.xlu2 %2212  ;;  %v6372_v52 = vpop.permute.xlu1 %2192  ;;  %v7729_v24 = vld [vmem:[#allocation47_spill] sm:$0xff]  ;;  %3462 = vmatpush.msra.mxu3 %v4210_v60 }
 0x2ee   : > { %v6377_v21 = vsel %vm721_vm1, %v2418_v33, %v2213_v15  ;;  %v6379_v40 = vpop.permute.xlu0 %2190  ;;  %v1571_v27 = vsel %vm688_vm0, %v4305_v49, %v7729_v24  ;;  %v7730_v33 = vld [vmem:[#allocation62_spill] sm:$0xff] }
 0x2ef   : > { %7728 = vst [vmem:[#allocation60_spill] sm:$0xff] %v6377_v21  ;;  %3847 = vmatmul.msk.f32.gmra.mxu1 %vm792_vm2, %v1634_v51  ;;  %v4209_v21 = vld [vmem:[%s7433_s1 + $0x30] sm:$0xff] }
 0x2f0   : > { %3863 = vst.msk [vmem:[%s5340_s5 + $0x140] sm:$0xff] %vm721_vm1, %v1783_v3  ;;  %v1603_v3 = vsel %vm721_vm1, %v1571_v27, %v7730_v33  ;;  %3463 = vmatpush.msra.mxu3 %v4209_v21  ;;  %v6420_v27 = vld [vmem:[%s4364_s18 + $0x99] sm:$0xff] }
 0x2f1   : > { %v1635_v49 = vsel %vm754_vm3, %v1603_v3, %v5872_v19  ;;  %v4306_v19 = vld [vmem:[%s4364_s18 + $0x139] sm:$0xff] }
 0x2f2   : > { %v7733_v3 = vld [vmem:[#allocation9_spill] sm:$0xff] }
 0x2f3   : > { %3173 = vrot.lane.b32.xlu2 %v4185_v25, %s4328_s21  ;;  %3045 = vrot.lane.b32.xlu1 %v6389_v7, %s4327_s20 }
 0x2f4   : > { %2320 = vrot.lane.b32.xlu0 %v6389_v7, %s4328_s21  ;;  %v1785_v50 = vpop.f32.mrf.mxu1 }
 0x2f5   : > { %v1786_v15 = vadd.f32 %v6242_v12, %v1785_v50  ;;  %v6405_v51 = vpop.permute.xlu2 %3029  ;;  %v6407_v14 = vpop.permute.xlu1 %2198  ;;  %v7732_v50 = vld [vmem:[#allocation8_spill] sm:$0xff] }
 0x2f6   : > { %7731 = vst [vmem:[#allocation79_spill] sm:$0xff] %v6407_v14  ;;  %v6411_v24 = vpop.permute.xlu0 %2196  ;;  %v1572_v60 = vsel %vm688_vm0, %v4306_v19, %v7732_v50 }
 0x2f7   : > { %3864 = vst.msk [vmem:[%s5340_s5 + $0x148] sm:$0xff] %vm721_vm1, %v1786_v15  ;;  %3848 = vmatmul.msk.f32.gmra.mxu1 %vm792_vm2, %v1635_v49  ;;  %v1604_v21 = vsel %vm721_vm1, %v1572_v60, %v7733_v3  ;;  %v2414_v15 = vsel %vm688_vm0, %v6021_v9, %v6070_v35  ;;  %v6453_v35 = vld [vmem:[%s4364_s18 + $0xa9] sm:$0xff] }
 0x2f8   : > { %v1636_v19 = vsel %vm754_vm3, %v1604_v21, %v5987_v0  ;;  %v4307_v0 = vld [vmem:[%s4364_s18 + $0x141] sm:$0xff] }
 0x2f9   : > { %v7735_v3 = vld [vmem:[#allocation63_spill] sm:$0xff] }
 0x2fb   : > { %3047 = vrot.lane.b32.xlu2 %v6420_v27, %s4327_s20  ;;  %2322 = vrot.lane.b32.xlu1 %v6420_v27, %s4328_s21 }
 0x2fc   : > { %2919 = vrot.lane.b32.xlu0 %v4184_v26, %s4326_s19  ;;  %v1788_v33 = vpop.f32.mrf.mxu1  ;;  %v2413_v26 = vsel %vm688_vm0, %v6024_v48, %v6147_v10  ;;  %v7734_v48 = vld [vmem:[#allocation5_spill] sm:$0xff] }
 0x2fd   : > { %v1789_v49 = vadd.f32 %v6242_v12, %v1788_v33  ;;  %v6436_v57 = vpop.permute.xlu2 %2306  ;;  %v2205_v14 = vpop.permute.xlu1 %2204  ;;  %v4186_v33 = vld [vmem:[%s4364_s18 + $0x9a] sm:$0xff]  ;;  %v1573_v10 = vsel %vm688_vm0, %v4307_v0, %v7734_v48 }
 0x2fe   : > { %v6444_v50 = vsel %vm721_vm1, %v2414_v15, %v2205_v14  ;;  %v2203_v60 = vpop.permute.xlu0 %2202  ;;  %v1605_v21 = vsel %vm721_vm1, %v1573_v10, %v7735_v3  ;;  %v2417_v15 = vsel %vm688_vm0, %v6050_v42, %v6096_v41  ;;  %v4187_v41 = vld [vmem:[%s4364_s18 + $0xaa] sm:$0xff]  ;;  %v3887_v10 = vld [vmem:[%s4364_s18 + $0x18] sm:$0xff] }
 0x2ff   : > { %3865 = vst.msk [vmem:[%s5340_s5 + $0x150] sm:$0xff] %vm721_vm1, %v1789_v49  ;;  %v6449_v9 = vsel %vm721_vm1, %v2413_v26, %v2203_v60  ;;  %3849 = vmatmul.msk.f32.gmra.mxu1 %vm792_vm2, %v1636_v19  ;;  %v1637_v26 = vsel %vm754_vm3, %v1605_v21, %v5985_v8  ;;  %v2416_v60 = vsel %vm688_vm0, %v6053_v17, %v6169_v32  ;;  %v4308_v8 = vld [vmem:[%s4364_s18 + $0x151] sm:$0xff] }
 0x300   : > { %v7736_v17 = vld [vmem:[#allocation12_spill] sm:$0xff] }
 0x301   : > { %v1574_v32 = vsel %vm688_vm0, %v4308_v8, %v7736_v17  ;;  %v7737_v21 = vld [vmem:[#allocation32_spill] sm:$0xff]  ;;  %v3888_v17 = vld [vmem:[%s4364_s18 + $0x20] sm:$0xff] }
 0x302   : > { %v6513_v8 = vld [vmem:[%s4364_s18 + $0xb1] sm:$0xff] }
 0x303   : > { %2324 = vrot.lane.b32.xlu2 %v6453_v35, %s4328_s21  ;;  %2921 = vrot.lane.b32.xlu1 %v4185_v25, %s4326_s19 }
 0x304   : > { %3175 = vrot.lane.b32.xlu0 %v4186_v33, %s4328_s21  ;;  %v1791_v14 = vpop.f32.mrf.mxu1 }
 0x305   : > { %v1792_v49 = vadd.f32 %v6242_v12, %v1791_v14  ;;  %v6469_v25 = vpop.permute.xlu2 %2905  ;;  %v2211_v19 = vpop.permute.xlu1 %2210  ;;  %v2400_v14 = vsel %vm688_vm0, %v3887_v10, %v6042_v13  ;;  %v4081_v10 = vld [vmem:[%s4364_s18 + $0x19] sm:$0xff] }
 0x306   : > { %v6477_v0 = vsel %vm721_vm1, %v2417_v15, %v2211_v19  ;;  %v2209_v48 = vpop.permute.xlu0 %2208  ;;  %v2432_v15 = vsel %vm721_vm1, %v2400_v14, %v6218_v4  ;;  %v4188_v4 = vld [vmem:[%s4364_s18 + $0xb2] sm:$0xff]  ;;  %v7738_v14 = vld [vmem:[#allocation27_spill] sm:$0xff] }
 0x307   : > { %3866 = vst.msk [vmem:[%s5340_s5 + $0x158] sm:$0xff] %vm721_vm1, %v1792_v49  ;;  %v6482_v42 = vsel %vm721_vm1, %v2416_v60, %v2209_v48  ;;  %3850 = vmatmul.msk.f32.gmra.mxu1 %vm792_vm2, %v1637_v26 }
 0x30b   : > { %2923 = vrot.lane.b32.xlu2 %v4186_v33, %s4326_s19  ;;  %3177 = vrot.lane.b32.xlu1 %v4187_v41, %s4328_s21  ;;  %v1606_v33 = vsel %vm721_vm1, %v1574_v32, %v7737_v21  ;;  %v2401_v21 = vsel %vm688_vm0, %v3888_v17, %v6040_v37 }
 0x30c   : > { %3049 = vrot.lane.b32.xlu0 %v6453_v35, %s4327_s20  ;;  %v1794_v3 = vpop.f32.mrf.mxu1  ;;  %v1638_v13 = vsel %vm754_vm3, %v1606_v33, %v5894_v5  ;;  %v4309_v5 = vld [vmem:[%s4364_s18 + $0x159] sm:$0xff] }
 0x30d   : > { %v1795_v49 = vadd.f32 %v6242_v12, %v1794_v3  ;;  %v6501_v19 = vpop.permute.xlu2 %3161  ;;  %v2305_v26 = vpop.permute.xlu1 %2304  ;;  %v1575_v3 = vsel %vm688_vm0, %v4309_v5, %v7738_v14  ;;  %v6547_v14 = vld [vmem:[%s4364_s18 + $0xc1] sm:$0xff] }
 0x30e   : > { %v2902_v60 = vpop.permute.xlu0 %2901  ;;  %v2464_v48 = vsel %vm754_vm3, %v2432_v15, %v2305_v26  ;;  %v7739_v15 = vld [vmem:[#allocation66_spill] sm:$0xff]  ;;  %v2433_v26 = vsel %vm721_vm1, %v2401_v21, %v6322_v56 }
 0x30f   : > { %3867 = vst.msk [vmem:[%s5340_s5 + $0x160] sm:$0xff] %vm721_vm1, %v1795_v49  ;;  %3851 = vmatmul.msk.f32.gmra.mxu1 %vm792_vm2, %v1638_v13  ;;  %4017 = vmatmul.msk.f32.vlgmr.msra.gmra.mxu2 %vm792_vm2, %v2464_v48  ;;  %v3253_v32 = vsel %vm688_vm0, %v4081_v10, %v2902_v60  ;;  %v1607_v49 = vsel %vm721_vm1, %v1575_v3, %v7739_v15  ;;  %v7741_v21 = vld [vmem:[#allocation10_spill] sm:$0xff] }
 0x310   : > { %v1639_v37 = vsel %vm754_vm3, %v1607_v49, %v6013_v36  ;;  %v2465_v17 = vsel %vm754_vm3, %v2433_v26, %v6436_v57  ;;  %v3285_v5 = vsel %vm721_vm1, %v3253_v32, %v6405_v51  ;;  %v4082_v36 = vld [vmem:[%s4364_s18 + $0x21] sm:$0xff]  ;;  %v4310_v57 = vld [vmem:[%s4364_s18 + $0x169] sm:$0xff] }
 0x311   : > { %v7740_v51 = vld [vmem:[#allocation58_spill] sm:$0xff] }
 0x312   : > { %v1576_v32 = vsel %vm688_vm0, %v4310_v57, %v7740_v51  ;;  %v7743_v51 = vld [vmem:[#allocation67_spill] sm:$0xff] }
 0x313   : > { %3179 = vrot.lane.b32.xlu2 %v4188_v4, %s4328_s21  ;;  %3051 = vrot.lane.b32.xlu1 %v6513_v8, %s4327_s20 }
 0x314   : > { %2326 = vrot.lane.b32.xlu0 %v6513_v8, %s4328_s21  ;;  %v1797_v33 = vpop.f32.mrf.mxu1 }
 0x315   : > { %v1798_v13 = vadd.f32 %v6242_v12, %v1797_v33  ;;  %v6532_v60 = vpop.permute.xlu2 %3035  ;;  %v2904_v48 = vpop.permute.xlu1 %2903  ;;  %v1608_v33 = vsel %vm721_vm1, %v1576_v32, %v7741_v21  ;;  %v3255_v21 = vsel %vm688_vm0, %v6108_v45, %v6469_v25  ;;  %v2403_v45 = vsel %vm688_vm0, %v5937_v20, %v6074_v39  ;;  %v4191_v20 = vld [vmem:[%s4364_s18 + $0xda] sm:$0xff] }
 0x316   : > { %v3158_v10 = vpop.permute.xlu0 %3157  ;;  %v2435_v25 = vsel %vm721_vm1, %v2403_v45, %v6245_v53  ;;  %v6625_v39 = vld [vmem:[%s4364_s18 + $0xd9] sm:$0xff]  ;;  %v6666_v45 = vld [vmem:[%s4364_s18 + $0xf1] sm:$0xff] }
 0x317   : > { %3868 = vst.msk [vmem:[%s5340_s5 + $0x168] sm:$0xff] %vm721_vm1, %v1798_v13  ;;  %3852 = vmatmul.msk.f32.gmra.mxu1 %vm792_vm2, %v1639_v37  ;;  %4018 = vmatmul.msk.f32.gmra.mxu2 %vm792_vm2, %v2465_v17  ;;  %v3317_v56 = vsel %vm754_vm3, %v3285_v5, %v3158_v10  ;;  %v1640_v13 = vsel %vm754_vm3, %v1608_v33, %v6011_v16  ;;  %v6572_v5 = vld [vmem:[%s4364_s18 + $0xc9] sm:$0xff]  ;;  %v4311_v16 = vld [vmem:[%s4364_s18 + $0x171] sm:$0xff] }
 0x318   : > { %4211 = vmatmul.msk.f32.vlgmr.msra.gmra.mxu3 %vm792_vm2, %v3317_v56  ;;  %v3254_v37 = vsel %vm688_vm0, %v4082_v36, %v2904_v48  ;;  %v4189_v56 = vld [vmem:[%s4364_s18 + $0xc2] sm:$0xff] }
 0x319   : > { %v7742_v48 = vld [vmem:[#allocation46_spill] sm:$0xff] }
 0x31a   : > { %v1577_v36 = vsel %vm688_vm0, %v4311_v16, %v7742_v48  ;;  %v4084_v48 = vld [vmem:[%s4364_s18 + $0x39] sm:$0xff] }
 0x31b   : > { %3053 = vrot.lane.b32.xlu2 %v6547_v14, %s4327_s20  ;;  %2328 = vrot.lane.b32.xlu1 %v6547_v14, %s4328_s21  ;;  %v1609_v32 = vsel %vm721_vm1, %v1577_v36, %v7743_v51 }
 0x31c   : > { %2925 = vrot.lane.b32.xlu0 %v4187_v41, %s4326_s19  ;;  %v1800_v3 = vpop.f32.mrf.mxu1 }
 0x31d   : > { %v1801_v15 = vadd.f32 %v6242_v12, %v1800_v3  ;;  %v6561_v49 = vpop.permute.xlu2 %2312  ;;  %v3160_v26 = vpop.permute.xlu1 %3159  ;;  %v2402_v3 = vsel %vm688_vm0, %v5905_v1, %v5951_v38 }
 0x31e   : > { %v3032_v10 = vpop.permute.xlu0 %3031 }
 0x31f   : > { %3869 = vst.msk [vmem:[%s5340_s5 + $0x170] sm:$0xff] %vm721_vm1, %v1801_v15  ;;  %v3286_v41 = vsel %vm721_vm1, %v3254_v37, %v3032_v10  ;;  %3853 = vmatmul.msk.f32.gmra.mxu1 %vm792_vm2, %v1640_v13  ;;  %v2434_v13 = vsel %vm721_vm1, %v2402_v3, %v6320_v22 }
 0x320   : > { %v3318_v17 = vsel %vm754_vm3, %v3286_v41, %v3160_v26  ;;  %v1641_v26 = vsel %vm754_vm3, %v1609_v32, %v5919_v30  ;;  %v4190_v30 = vld [vmem:[%s4364_s18 + $0xca] sm:$0xff] }
 0x321   : > { %4212 = vmatmul.msk.f32.gmra.mxu3 %vm792_vm2, %v3318_v17 }
 0x323   : > { %2330 = vrot.lane.b32.xlu2 %v6572_v5, %s4328_s21  ;;  %2927 = vrot.lane.b32.xlu1 %v4188_v4, %s4326_s19 }
 0x324   : > { %3181 = vrot.lane.b32.xlu0 %v4189_v56, %s4328_s21  ;;  %v1803_v57 = vpop.f32.mrf.mxu1 }
 0x325   : > { %v1804_v4 = vadd.f32 %v6242_v12, %v1803_v57  ;;  %v6592_v33 = vpop.permute.xlu2 %2911  ;;  %v3034_v15 = vpop.permute.xlu1 %3033  ;;  %v2404_v57 = vsel %vm688_vm0, %v5934_v34, %v6072_v54  ;;  %v6651_v54 = vld [vmem:[%s4364_s18 + $0xe1] sm:$0xff] }
 0x326   : > { %v3287_v37 = vsel %vm721_vm1, %v3255_v21, %v3034_v15  ;;  %v2309_v10 = vpop.permute.xlu0 %2308  ;;  %v2436_v21 = vsel %vm721_vm1, %v2404_v57, %v6348_v29 }
 0x327   : > { %3870 = vst.msk [vmem:[%s5340_s5 + $0x178] sm:$0xff] %vm721_vm1, %v1804_v4  ;;  %3854 = vmatmul.msk.f32.gmra.mxu1 %vm792_vm2, %v1641_v26  ;;  %v2466_v1 = vsel %vm754_vm3, %v2434_v13, %v2309_v10  ;;  %v3319_v38 = vsel %vm754_vm3, %v3287_v37, %v6501_v19  ;;  %v2468_v26 = vsel %vm754_vm3, %v2436_v21, %v6561_v49  ;;  %v4087_v21 = vld [vmem:[%s4364_s18 + $0x61] sm:$0xff] }
 0x328   : > { %4019 = vmatmul.msk.f32.gmra.mxu2 %vm792_vm2, %v2466_v1 }
 0x329   : > { %4213 = vmatmul.msk.f32.gmra.mxu3 %vm792_vm2, %v3319_v38 }
 0x32b   : > { %2929 = vrot.lane.b32.xlu2 %v4189_v56, %s4326_s19  ;;  %3183 = vrot.lane.b32.xlu1 %v4190_v30, %s4328_s21 }
 0x32c   : > { %3055 = vrot.lane.b32.xlu0 %v6572_v5, %s4327_s20  ;;  %v1806_v22 = vpop.f32.mrf.mxu1 }
 0x32d   : > { %v1807_v19 = vadd.f32 %v6242_v12, %v1806_v22  ;;  %v3168_v41 = vpop.permute.xlu2 %3167  ;;  %v2311_v17 = vpop.permute.xlu1 %2310  ;;  %v2405_v22 = vsel %vm688_vm0, %v5931_v62, %v5983_v47  ;;  %v4193_v47 = vld [vmem:[%s4364_s18 + $0xf2] sm:$0xff] }
 0x32e   : > { %v2908_v16 = vpop.permute.xlu0 %2907  ;;  %v2467_v56 = vsel %vm754_vm3, %v2435_v25, %v2311_v17  ;;  %v3258_v25 = vsel %vm688_vm0, %v6205_v58, %v6592_v33 }
 0x32f   : > { %3871 = vst.msk [vmem:[%s5340_s5 + $0x180] sm:$0xff] %vm721_vm1, %v1807_v19  ;;  %v3256_v36 = vsel %vm688_vm0, %v4084_v48, %v2908_v16 }
 0x330   : > { %4020 = vmatmul.msk.f32.gmra.mxu2 %vm792_vm2, %v2467_v56  ;;  %v3288_v15 = vsel %vm721_vm1, %v3256_v36, %v6532_v60  ;;  %v2437_v56 = vsel %vm721_vm1, %v2405_v22, %v6343_v18  ;;  %v2406_v18 = vsel %vm688_vm0, %v5969_v28, %v6100_v44  ;;  %v4194_v28 = vld [vmem:[%s4364_s18 + $0xfa] sm:$0xff] }
 0x331   : > { %v2438_v33 = vsel %vm721_vm1, %v2406_v18, %v6267_v46  ;;  %v6710_v44 = vld [vmem:[%s4364_s18 + $0xf9] sm:$0xff] }
 0x333   : > { %3185 = vrot.lane.b32.xlu2 %v4191_v20, %s4328_s21  ;;  %3057 = vrot.lane.b32.xlu1 %v6625_v39, %s4327_s20 }
 0x334   : > { %2332 = vrot.lane.b32.xlu0 %v6625_v39, %s4328_s21  ;;  %v1809_v53 = vpop.f32.mrf.mxu1 }
 0x335   : > { %v1810_v51 = vadd.f32 %v6242_v12, %v1809_v53  ;;  %v6637_v32 = vpop.permute.xlu2 %3041  ;;  %v2910_v3 = vpop.permute.xlu1 %2909 }
 0x336   : > { %v3164_v4 = vpop.permute.xlu0 %3163  ;;  %v3257_v37 = vsel %vm688_vm0, %v6180_v63, %v2910_v3 }
 0x337   : > { %3872 = vst.msk [vmem:[%s5340_s5 + $0x188] sm:$0xff] %vm721_vm1, %v1810_v51  ;;  %v3320_v34 = vsel %vm754_vm3, %v3288_v15, %v3164_v4  ;;  %v2407_v15 = vsel %vm688_vm0, %v5966_v11, %v6098_v31  ;;  %v6735_v11 = vld [vmem:[%s4364_s18 + $0x109] sm:$0xff] }
 0x338   : > { %4021 = vmatmul.msk.f32.gmra.mxu2 %vm792_vm2, %v2468_v26  ;;  %4214 = vmatmul.msk.f32.gmra.mxu3 %vm792_vm2, %v3320_v34 }
 0x33b   : > { %3059 = vrot.lane.b32.xlu2 %v6651_v54, %s4327_s20  ;;  %2334 = vrot.lane.b32.xlu1 %v6651_v54, %s4328_s21 }
 0x33c   : > { %2931 = vrot.lane.b32.xlu0 %v4190_v30, %s4326_s19  ;;  %v1812_v29 = vpop.f32.mrf.mxu1  ;;  %v4192_v30 = vld [vmem:[%s4364_s18 + $0xe2] sm:$0xff] }
 0x33d   : > { %v1813_v60 = vadd.f32 %v6242_v12, %v1812_v29  ;;  %v2319_v49 = vpop.permute.xlu2 %2318  ;;  %v3166_v13 = vpop.permute.xlu1 %3165 }
 0x33e   : > { %v3038_v10 = vpop.permute.xlu0 %3037 }
 0x33f   : > { %3873 = vst.msk [vmem:[%s5340_s5 + $0x190] sm:$0xff] %vm721_vm1, %v1813_v60  ;;  %v3289_v1 = vsel %vm721_vm1, %v3257_v37, %v3038_v10  ;;  %v2439_v60 = vsel %vm721_vm1, %v2407_v15, %v6379_v40 }
 0x340   : > { %v3321_v38 = vsel %vm754_vm3, %v3289_v1, %v3166_v13  ;;  %v2471_v10 = vsel %vm754_vm3, %v2439_v60, %v2319_v49 }
 0x341   : > { %4215 = vmatmul.msk.f32.gmra.mxu3 %vm792_vm2, %v3321_v38 }
 0x343   : > { %2336 = vrot.lane.b32.xlu2 %v6666_v45, %s4328_s21  ;;  %2933 = vrot.lane.b32.xlu1 %v4191_v20, %s4326_s19 }
 0x344   : > { %3187 = vrot.lane.b32.xlu0 %v4192_v30, %s4328_s21  ;;  %v1815_v63 = vpop.f32.mrf.mxu1 }
 0x345   : > { %v1816_v19 = vadd.f32 %v6242_v12, %v1815_v63  ;;  %v6681_v17 = vpop.permute.xlu2 %2917  ;;  %v3040_v16 = vpop.permute.xlu1 %3039 }
 0x346   : > { %v3290_v48 = vsel %vm721_vm1, %v3258_v25, %v3040_v16  ;;  %v2315_v20 = vpop.permute.xlu0 %2314  ;;  %v4195_v25 = vld [vmem:[%s4364_s18 + $0x10a] sm:$0xff]  ;;  %v2408_v16 = vsel %vm688_vm0, %v5963_v43, %v6009_v23  ;;  %v4196_v23 = vld [vmem:[%s4364_s18 + $0x112] sm:$0xff] }
 0x347   : > { %3874 = vst.msk [vmem:[%s5340_s5 + $0x198] sm:$0xff] %vm721_vm1, %v1816_v19  ;;  %v2469_v36 = vsel %vm754_vm3, %v2437_v56, %v2315_v20  ;;  %v3322_v62 = vsel %vm754_vm3, %v3290_v48, %v3168_v41  ;;  %v6752_v19 = vld [vmem:[%s4364_s18 + $0x110] sm:$0xff]  ;;  %v3261_v56 = vsel %vm688_vm0, %v6305_v61, %v6681_v17 }
 0x348   : > { %4022 = vmatmul.msk.f32.gmra.mxu2 %vm792_vm2, %v2469_v36  ;;  %v6777_v61 = vld [vmem:[%s4364_s18 + $0x111] sm:$0xff] }
 0x349   : > { %4216 = vmatmul.msk.f32.gmra.mxu3 %vm792_vm2, %v3322_v62  ;;  %v2440_v62 = vsel %vm721_vm1, %v2408_v16, %v6372_v52  ;;  %v2409_v52 = vsel %vm688_vm0, %v5997_v2, %v6126_v55  ;;  %v6797_v2 = vld [vmem:[%s4364_s18 + $0x121] sm:$0xff]  ;;  %v4313_v16 = vld [vmem:[%s4364_s18 + $0x98] sm:$0xff] }
 0x34a   : > { %v6800_v55 = vld [vmem:[%s4364_s18 + $0x120] sm:$0xff] }
 0x34b   : > { %2935 = vrot.lane.b32.xlu2 %v4192_v30, %s4326_s19  ;;  %3189 = vrot.lane.b32.xlu1 %v4193_v47, %s4328_s21 }
 0x34c   : > { %3061 = vrot.lane.b32.xlu0 %v6666_v45, %s4327_s20  ;;  %v1818_v58 = vpop.f32.mrf.mxu1 }
 0x34d   : > { %v1819_v41 = vadd.f32 %v6242_v12, %v1818_v58  ;;  %v3174_v53 = vpop.permute.xlu2 %3173  ;;  %v2317_v57 = vpop.permute.xlu1 %2316 }
 0x34e   : > { %v2914_v51 = vpop.permute.xlu0 %2913  ;;  %v2470_v3 = vsel %vm754_vm3, %v2438_v33, %v2317_v57  ;;  %v2441_v33 = vsel %vm721_vm1, %v2409_v52, %v6293_v6 }
 0x34f   : > { %3875 = vst.msk [vmem:[%s5340_s5 + $0x1a0] sm:$0xff] %vm721_vm1, %v1819_v41  ;;  %v3259_v4 = vsel %vm688_vm0, %v4087_v21, %v2914_v51  ;;  %v4090_v21 = vld [vmem:[%s4364_s18 + $0x81] sm:$0xff] }
 0x350   : > { %4023 = vmatmul.msk.f32.gmra.mxu2 %vm792_vm2, %v2470_v3  ;;  %v3291_v37 = vsel %vm721_vm1, %v3259_v4, %v6637_v32  ;;  %v4312_v4 = vld [vmem:[%s4364_s18 + $0x90] sm:$0xff] }
 0x353   : > { %3191 = vrot.lane.b32.xlu2 %v4194_v28, %s4328_s21  ;;  %3063 = vrot.lane.b32.xlu1 %v6710_v44, %s4327_s20 }
 0x354   : > { %2338 = vrot.lane.b32.xlu0 %v6710_v44, %s4328_s21  ;;  %v1821_v46 = vpop.f32.mrf.mxu1 }
 0x355   : > { %v1822_v26 = vadd.f32 %v6242_v12, %v1821_v46  ;;  %v6722_v34 = vpop.permute.xlu2 %3047  ;;  %v2916_v29 = vpop.permute.xlu1 %2915  ;;  %v7744_v46 = vld [vmem:[#allocation70_spill] sm:$0xff] }
 0x356   : > { %v3170_v13 = vpop.permute.xlu0 %3169  ;;  %v3260_v38 = vsel %vm688_vm0, %v6280_v59, %v2916_v29  ;;  %v2410_v15 = vsel %vm688_vm0, %v4312_v4, %v7744_v46 }
 0x357   : > { %3876 = vst.msk [vmem:[%s5340_s5 + $0x1a8] sm:$0xff] %vm721_vm1, %v1822_v26  ;;  %v3323_v1 = vsel %vm754_vm3, %v3291_v37, %v3170_v13  ;;  %v2442_v13 = vsel %vm721_vm1, %v2410_v15, %v6411_v24 }
 0x358   : > { %4024 = vmatmul.msk.f32.gmra.mxu2 %vm792_vm2, %v2471_v10  ;;  %4217 = vmatmul.msk.f32.gmra.mxu3 %vm792_vm2, %v3323_v1 }
 0x35b   : > { %3065 = vrot.lane.b32.xlu2 %v6735_v11, %s4327_s20  ;;  %2340 = vrot.lane.b32.xlu1 %v6735_v11, %s4328_s21 }
 0x35c   : > { %2937 = vrot.lane.b32.xlu0 %v4193_v47, %s4326_s19  ;;  %v1824_v31 = vpop.f32.mrf.mxu1 }
 0x35d   : > { %v1825_v40 = vadd.f32 %v6242_v12, %v1824_v31  ;;  %v2325_v32 = vpop.permute.xlu2 %2324  ;;  %v3172_v49 = vpop.permute.xlu1 %3171 }
 0x35e   : > { %v3044_v30 = vpop.permute.xlu0 %3043  ;;  %v2474_v1 = vsel %vm754_vm3, %v2442_v13, %v2325_v32 }
 0x35f   : > { %3877 = vst.msk [vmem:[%s5340_s5 + $0x1b0] sm:$0xff] %vm721_vm1, %v1825_v40  ;;  %v3292_v63 = vsel %vm721_vm1, %v3260_v38, %v3044_v30  ;;  %v4197_v40 = vld [vmem:[%s4364_s18 + $0x122] sm:$0xff] }
 0x360   : > { %v3324_v22 = vsel %vm754_vm3, %v3292_v63, %v3172_v49  ;;  %v6826_v49 = vld [vmem:[%s4364_s18 + $0x128] sm:$0xff] }
 0x361   : > { %4218 = vmatmul.msk.f32.gmra.mxu3 %vm792_vm2, %v3324_v22 }
 0x363   : > { %2939 = vrot.lane.b32.xlu2 %v4194_v28, %s4326_s19  ;;  %2214 = vrot.lane.b32.xlu1 %v6752_v19, %s4327_s20 }
 0x364   : > { %3193 = vrot.lane.b32.xlu0 %v4195_v25, %s4328_s21  ;;  %v1827_v59 = vpop.f32.mrf.mxu1 }
 0x365   : > { %v1828_v48 = vadd.f32 %v6242_v12, %v1827_v59  ;;  %v6765_v20 = vpop.permute.xlu2 %2923  ;;  %v3046_v36 = vpop.permute.xlu1 %3045  ;;  %v6841_v59 = vld [vmem:[%s4364_s18 + $0x129] sm:$0xff] }
 0x366   : > { %v3293_v47 = vsel %vm721_vm1, %v3261_v56, %v3046_v36  ;;  %v2321_v18 = vpop.permute.xlu0 %2320  ;;  %v7745_v56 = vld [vmem:[#allocation31_spill] sm:$0xff]  ;;  %v3264_v36 = vsel %vm688_vm0, %v6420_v27, %v6765_v20  ;;  %v6869_v20 = vld [vmem:[%s4364_s18 + $0x138] sm:$0xff] }
 0x367   : > { %3878 = vst.msk [vmem:[%s5340_s5 + $0x1b8] sm:$0xff] %vm721_vm1, %v1828_v48  ;;  %v2472_v58 = vsel %vm754_vm3, %v2440_v62, %v2321_v18  ;;  %v3325_v43 = vsel %vm754_vm3, %v3293_v47, %v3174_v53  ;;  %v2411_v48 = vsel %vm688_vm0, %v4313_v16, %v7745_v56  ;;  %v4198_v27 = vld [vmem:[%s4364_s18 + $0x12a] sm:$0xff] }
 0x368   : > { %4025 = vmatmul.msk.f32.gmra.mxu2 %vm792_vm2, %v2472_v58  ;;  %v7746_v58 = vld [vmem:[#allocation79_spill] sm:$0xff] }
 0x369   : > { %4219 = vmatmul.msk.f32.gmra.mxu3 %vm792_vm2, %v3325_v43  ;;  %v2443_v43 = vsel %vm721_vm1, %v2411_v48, %v7746_v58 }
 0x36b   : > { %3195 = vrot.lane.b32.xlu2 %v4196_v23, %s4328_s21  ;;  %3067 = vrot.lane.b32.xlu1 %v6777_v61, %s4327_s20 }
 0x36c   : > { %2342 = vrot.lane.b32.xlu0 %v6777_v61, %s4328_s21  ;;  %v1830_v17 = vpop.f32.mrf.mxu1 }
 0x36d   : > { %v1831_v41 = vadd.f32 %v6242_v12, %v1830_v17  ;;  %v3180_v53 = vpop.permute.xlu2 %3179  ;;  %v2323_v57 = vpop.permute.xlu1 %2322 }
 0x36e   : > { %v2920_v51 = vpop.permute.xlu0 %2919  ;;  %v2473_v3 = vsel %vm754_vm3, %v2441_v33, %v2323_v57  ;;  %v7747_v57 = vld [vmem:[#allocation71_spill] sm:$0xff] }
 0x36f   : > { %3879 = vst.msk [vmem:[%s5340_s5 + $0x1c0] sm:$0xff] %vm721_vm1, %v1831_v41  ;;  %v3262_v6 = vsel %vm688_vm0, %v4090_v21, %v2920_v51  ;;  %v4314_v41 = vld [vmem:[%s4364_s18 + $0xa8] sm:$0xff] }
 0x370   : > { %4026 = vmatmul.msk.f32.gmra.mxu2 %vm792_vm2, %v2473_v3  ;;  %v3294_v10 = vsel %vm721_vm1, %v3262_v6, %v6722_v34  ;;  %v2412_v51 = vsel %vm688_vm0, %v4314_v41, %v7747_v57  ;;  %v7748_v3 = vld [vmem:[#allocation18_spill] sm:$0xff] }
 0x371   : > { %v2444_v21 = vsel %vm721_vm1, %v2412_v51, %v7748_v3 }
 0x373   : > { %2344 = vrot.lane.b32.xlu2 %v6797_v2, %s4328_s21  ;;  %2941 = vrot.lane.b32.xlu1 %v4195_v25, %s4326_s19 }
 0x374   : > { %2216 = vrot.lane.b32.xlu0 %v6800_v55, %s4327_s20  ;;  %v1833_v28 = vpop.f32.mrf.mxu1 }
 0x375   : > { %v1834_v26 = vadd.f32 %v6242_v12, %v1833_v28  ;;  %v6812_v29 = vpop.permute.xlu2 %3053  ;;  %v2922_v60 = vpop.permute.xlu1 %2921 }
 0x376   : > { %v3176_v37 = vpop.permute.xlu0 %3175  ;;  %v3263_v30 = vsel %vm688_vm0, %v6389_v7, %v2922_v60  ;;  %v6891_v60 = vld [vmem:[%s4364_s18 + $0x139] sm:$0xff] }
 0x377   : > { %3880 = vst.msk [vmem:[%s5340_s5 + $0x1c8] sm:$0xff] %vm721_vm1, %v1834_v26  ;;  %v3326_v31 = vsel %vm754_vm3, %v3294_v10, %v3176_v37  ;;  %v6888_v26 = vld [vmem:[%s4364_s18 + $0x13a] sm:$0xff] }
 0x378   : > { %4027 = vmatmul.msk.f32.gmra.mxu2 %vm792_vm2, %v2474_v1  ;;  %4220 = vmatmul.msk.f32.gmra.mxu3 %vm792_vm2, %v3326_v31 }
 0x37b   : > { %2218 = vrot.lane.b32.xlu2 %v6826_v49, %s4327_s20  ;;  %3197 = vrot.lane.b32.xlu1 %v4197_v40, %s4328_s21 }
 0x37c   : > { %3069 = vrot.lane.b32.xlu0 %v6797_v2, %s4327_s20  ;;  %v1836_v24 = vpop.f32.mrf.mxu1 }
 0x37d   : > { %v1837_v34 = vadd.f32 %v6242_v12, %v1836_v24  ;;  %v2331_v32 = vpop.permute.xlu2 %2330  ;;  %v3178_v38 = vpop.permute.xlu1 %3177 }
 0x37e   : > { %v3050_v63 = vpop.permute.xlu0 %3049 }
 0x37f   : > { %3881 = vst.msk [vmem:[%s5340_s5 + $0x1d0] sm:$0xff] %vm721_vm1, %v1837_v34  ;;  %v3295_v22 = vsel %vm721_vm1, %v3263_v30, %v3050_v63  ;;  %v6917_v63 = vld [vmem:[%s4364_s18 + $0x141] sm:$0xff] }
 0x380   : > { %v3327_v25 = vsel %vm754_vm3, %v3295_v22, %v3178_v38  ;;  %v2477_v38 = vsel %vm754_vm3, %v6449_v9, %v2331_v32 }
 0x381   : > { %4221 = vmatmul.msk.f32.gmra.mxu3 %vm792_vm2, %v3327_v25  ;;  %v6920_v25 = vld [vmem:[%s4364_s18 + $0x140] sm:$0xff] }
 0x383   : > { %3071 = vrot.lane.b32.xlu2 %v6841_v59, %s4327_s20  ;;  %2346 = vrot.lane.b32.xlu1 %v6841_v59, %s4328_s21 }
 0x384   : > { %2943 = vrot.lane.b32.xlu0 %v4196_v23, %s4326_s19  ;;  %v1839_v7 = vpop.f32.mrf.mxu1 }
 0x385   : > { %v1840_v62 = vadd.f32 %v6242_v12, %v1839_v7  ;;  %v6856_v47 = vpop.permute.xlu2 %2929  ;;  %v3052_v18 = vpop.permute.xlu1 %3051 }
 0x386   : > { %v3296_v23 = vsel %vm721_vm1, %v3264_v36, %v3052_v18  ;;  %v2327_v52 = vpop.permute.xlu0 %2326 }
 0x387   : > { %3882 = vst.msk [vmem:[%s5340_s5 + $0x1d8] sm:$0xff] %vm721_vm1, %v1840_v62  ;;  %v2475_v17 = vsel %vm754_vm3, %v2443_v43, %v2327_v52  ;;  %v3328_v33 = vsel %vm754_vm3, %v3296_v23, %v3180_v53  ;;  %v3975_v43 = vld [vmem:[%s4364_s18 + $0x150] sm:$0xff]  ;;  %v4200_v23 = vld [vmem:[%s4364_s18 + $0x142] sm:$0xff] }
 0x388   : > { %4028 = vmatmul.msk.f32.gmra.mxu2 %vm792_vm2, %v2475_v17  ;;  %v3267_v17 = vsel %vm688_vm0, %v6547_v14, %v6856_v47  ;;  %v6965_v14 = vld [vmem:[%s4364_s18 + $0x151] sm:$0xff] }
 0x389   : > { %4222 = vmatmul.msk.f32.gmra.mxu3 %vm792_vm2, %v3328_v33 }
 0x38b   : > { %2945 = vrot.lane.b32.xlu2 %v4197_v40, %s4326_s19  ;;  %2220 = vrot.lane.b32.xlu1 %v6869_v20, %s4327_s20 }
 0x38c   : > { %3199 = vrot.lane.b32.xlu0 %v4198_v27, %s4328_s21  ;;  %v1842_v53 = vpop.f32.mrf.mxu1 }
 0x38d   : > { %v1843_v6 = vadd.f32 %v6242_v12, %v1842_v53  ;;  %v6881_v28 = vpop.permute.xlu2 %3185  ;;  %v2329_v4 = vpop.permute.xlu1 %2328 }
 0x38e   : > { %v2926_v46 = vpop.permute.xlu0 %2925  ;;  %v2476_v15 = vsel %vm754_vm3, %v2444_v21, %v2329_v4 }
 0x38f   : > { %3883 = vst.msk [vmem:[%s5340_s5 + $0x1e0] sm:$0xff] %vm721_vm1, %v1843_v6  ;;  %v3265_v37 = vsel %vm688_vm0, %v6453_v35, %v2926_v46 }
 0x390   : > { %4029 = vmatmul.msk.f32.gmra.mxu2 %vm792_vm2, %v2476_v15  ;;  %v3297_v34 = vsel %vm721_vm1, %v3265_v37, %v6812_v29  ;;  %v7749_v37 = vld [vmem:[#allocation76_spill] sm:$0xff] }
 0x392   : > { %v2612_v13 = vpop.f32.mrf.mxu2 }
 0x393   : > { %v2613_v10 = vadd.f32 %v6242_v12, %v2612_v13  ;;  %3201 = vrot.lane.b32.xlu2 %v6888_v26, %s4328_s21  ;;  %3073 = vrot.lane.b32.xlu1 %v6891_v60, %s4327_s20 }
 0x394   : > { %2348 = vrot.lane.b32.xlu0 %v6891_v60, %s4328_s21  ;;  %v1845_v1 = vpop.f32.mrf.mxu1 }
 0x395   : > { %4049 = vst.msk [vmem:[%s5340_s5 + $0x200] sm:$0xff] %vm721_vm1, %v2613_v10  ;;  %v1846_v31 = vadd.f32 %v6242_v12, %v1845_v1  ;;  %v6905_v40 = vpop.permute.xlu2 %3059  ;;  %v2928_v35 = vpop.permute.xlu1 %2927  ;;  %v4201_v10 = vld [vmem:[%s4364_s18 + $0x152] sm:$0xff] }
 0x396   : > { %v3182_v24 = vpop.permute.xlu0 %3181  ;;  %v3266_v36 = vsel %vm688_vm0, %v6513_v8, %v2928_v35 }
 0x397   : > { %3884 = vst.msk [vmem:[%s5340_s5 + $0x1e8] sm:$0xff] %vm721_vm1, %v1846_v31  ;;  %v3329_v30 = vsel %vm754_vm3, %v3297_v34, %v3182_v24 }
 0x398   : > { %4030 = vmatmul.msk.f32.gmra.mxu2 %vm792_vm2, %v2477_v38  ;;  %4223 = vmatmul.msk.f32.gmra.mxu3 %vm792_vm2, %v3329_v30 }
 0x39a   : > { %v2615_v22 = vpop.f32.mrf.mxu2 }
 0x39b   : > { %v2616_v29 = vadd.f32 %v6242_v12, %v2615_v22  ;;  %v3465_v7 = vpop.f32.mrf.mxu3  ;;  %2350 = vrot.lane.b32.xlu2 %v6917_v63, %s4328_s21  ;;  %2947 = vrot.lane.b32.xlu1 %v4198_v27, %s4326_s19 }
 0x39c   : > { %v3466_v9 = vadd.f32 %v6242_v12, %v3465_v7  ;;  %2222 = vrot.lane.b32.xlu0 %v6920_v25, %s4327_s20  ;;  %v1848_v32 = vpop.f32.mrf.mxu1  ;;  %v7009_v7 = vld [vmem:[%s4364_s18 + $0x159] sm:$0xff] }
 0x39d   : > { %4050 = vst.msk [vmem:[%s5340_s5 + $0x208] sm:$0xff] %vm721_vm1, %v2616_v29  ;;  %v1849_v16 = vadd.f32 %v6242_v12, %v1848_v32  ;;  %v2337_v56 = vpop.permute.xlu2 %2336  ;;  %v3184_v48 = vpop.permute.xlu1 %3183  ;;  %v4202_v29 = vld [vmem:[%s4364_s18 + $0x15a] sm:$0xff] }
 0x39e   : > { %4243 = vst.msk [vmem:[%s5340_s5 + $0x300] sm:$0xff] %vm721_vm1, %v3466_v9  ;;  %v3056_v62 = vpop.permute.xlu0 %3055 }
 0x39f   : > { %3885 = vst.msk [vmem:[%s5340_s5 + $0x1f0] sm:$0xff] %vm721_vm1, %v1849_v16  ;;  %v3298_v18 = vsel %vm721_vm1, %v3266_v36, %v3056_v62 }
 0x3a0   : > { %v3330_v58 = vsel %vm754_vm3, %v3298_v18, %v3184_v48 }
 0x3a1   : > { %4224 = vmatmul.msk.f32.gmra.mxu3 %vm792_vm2, %v3330_v58  ;;  %v7029_v58 = vld [vmem:[%s4364_s18 + $0x169] sm:$0xff] }
 0x3a3   : > { %2224 = vrot.lane.b32.xlu2 %v3975_v43, %s4327_s20  ;;  %3203 = vrot.lane.b32.xlu1 %v4200_v23, %s4328_s21  ;;  %v3977_v43 = vld [vmem:[%s4364_s18 + $0x168] sm:$0xff] }
 0x3a4   : > { %3075 = vrot.lane.b32.xlu0 %v6917_v63, %s4327_s20  ;;  %v3468_v8 = vpop.f32.mrf.mxu3  ;;  %v1851_v52 = vpop.f32.mrf.mxu1 }
 0x3a5   : > { %v3469_v33 = vadd.f32 %v6242_v12, %v3468_v8  ;;  %v1852_v27 = vadd.f32 %v6242_v12, %v1851_v52  ;;  %v6952_v41 = vpop.permute.xlu2 %2935  ;;  %v3058_v57 = vpop.permute.xlu1 %3057 }
 0x3a6   : > { %v3299_v51 = vsel %vm721_vm1, %v3267_v17, %v3058_v57  ;;  %v2333_v53 = vpop.permute.xlu0 %2332 }
 0x3a7   : > { %4244 = vst.msk [vmem:[%s5340_s5 + $0x308] sm:$0xff] %vm721_vm1, %v3469_v33  ;;  %v2478_v3 = vsel %vm754_vm3, %v6444_v50, %v2333_v53  ;;  %v3331_v21 = vsel %vm754_vm3, %v3299_v51, %v6881_v28  ;;  %v6978_v28 = vld [vmem:[%s7434_s2] ss:$0 sm:$0xff]  ;;  %v3978_v53 = vld [vmem:[%s4364_s18 + $0x170] sm:$0xff] }
 0x3a8   : > { %3886 = vst.msk [vmem:[%s5340_s5 + $0x1f8] sm:$0xff] %vm721_vm1, %v1852_v27  ;;  %4031 = vmatmul.msk.f32.gmra.mxu2 %vm792_vm2, %v2478_v3 }
 0x3a9   : > { %4225 = vmatmul.msk.f32.gmra.mxu3 %vm792_vm2, %v3331_v21 }
 0x3ab   : > { %v2618_v47 = vpop.f32.mrf.mxu2  ;;  %3077 = vrot.lane.b32.xlu2 %v6965_v14, %s4327_s20  ;;  %2352 = vrot.lane.b32.xlu1 %v6965_v14, %s4328_s21 }
 0x3ac   : > { %v2619_v50 = vadd.f32 %v6242_v12, %v2618_v47  ;;  %2949 = vrot.lane.b32.xlu0 %v6888_v26, %s4326_s19  ;;  %v3471_v6 = vpop.f32.mrf.mxu3  ;;  %v3976_v26 = vld [vmem:[%s4364_s18 + $0x158] sm:$0xff] }
 0x3ad   : > { %v3472_v4 = vadd.f32 %v6978_v28, %v3471_v6  ;;  %v3192_v46 = vpop.permute.xlu2 %3191  ;;  %v2335_v15 = vpop.permute.xlu1 %2334 }
 0x3ae   : > { %4051 = vst.msk [vmem:[%s5340_s5 + $0x210] sm:$0xff] %vm721_vm1, %v2619_v50  ;;  %v2932_v13 = vpop.permute.xlu0 %2931  ;;  %v2479_v12 = vsel %vm754_vm3, %v7749_v37, %v2335_v15  ;;  %v7065_v15 = vld [vmem:[%s4364_s18 + $0x171] sm:$0xff] }
 0x3af   : > { %4245 = vst.msk [vmem:[%s5340_s5 + $0x310] sm:$0xff] %vm721_vm1, %v3472_v4  ;;  %v3268_v1 = vsel %vm688_vm0, %v6572_v5, %v2932_v13  ;;  %v2480_v5 = vsel %vm754_vm3, %v6482_v42, %v2337_v56  ;;  %v7750_v4 = vld [vmem:[#allocation60_spill] sm:$0xff] }
 0x3b0   : > { %4032 = vmatmul.msk.f32.gmra.mxu2 %vm792_vm2, %v2479_v12  ;;  %v3300_v30 = vsel %vm721_vm1, %v3268_v1, %v6905_v40 }
 0x3b3   : > { %v2621_v31 = vpop.f32.mrf.mxu2  ;;  %2951 = vrot.lane.b32.xlu2 %v4200_v23, %s4326_s19  ;;  %2226 = vrot.lane.b32.xlu1 %v3976_v26, %s4327_s20  ;;  %v3270_v23 = vsel %vm688_vm0, %v6651_v54, %v6952_v41  ;;  %v4203_v54 = vld [vmem:[%s4364_s18 + $0x16a] sm:$0xff] }
 0x3b4   : > { %v2622_v35 = vadd.f32 %v6978_v28, %v2621_v31  ;;  %3205 = vrot.lane.b32.xlu0 %v4201_v10, %s4328_s21 }
 0x3b5   : > { %v6996_v24 = vpop.permute.xlu2 %3065  ;;  %v2934_v34 = vpop.permute.xlu1 %2933 }
 0x3b6   : > { %4052 = vst.msk [vmem:[%s5340_s5 + $0x218] sm:$0xff] %vm721_vm1, %v2622_v35  ;;  %v3188_v38 = vpop.permute.xlu0 %3187  ;;  %v3269_v48 = vsel %vm688_vm0, %v6625_v39, %v2934_v34  ;;  %v3979_v35 = vld [vmem:[%s4364_s18 + $0x180] sm:$0xff]  ;;  %v4204_v34 = vld [vmem:[%s4364_s18 + $0x172] sm:$0xff] }
 0x3b7   : > { %v3332_v22 = vsel %vm754_vm3, %v3300_v30, %v3188_v38 }
 0x3b8   : > { %4033 = vmatmul.msk.f32.gmra.mxu2 %vm792_vm2, %v2480_v5  ;;  %4226 = vmatmul.msk.f32.gmra.mxu3 %vm792_vm2, %v3332_v22 }
 0x3bb   : > { %v2624_v9 = vpop.f32.mrf.mxu2  ;;  %v3474_v32 = vpop.f32.mrf.mxu3  ;;  %3207 = vrot.lane.b32.xlu2 %v4202_v29, %s4328_s21  ;;  %3079 = vrot.lane.b32.xlu1 %v7009_v7, %s4327_s20 }
 0x3bc   : > { %v2625_v42 = vadd.f32 %v6978_v28, %v2624_v9  ;;  %v3475_v40 = vadd.f32 %v6978_v28, %v3474_v32  ;;  %2354 = vrot.lane.b32.xlu0 %v7009_v7, %s4328_s21 }
 0x3bd   : > { %v7018_v16 = vpop.permute.xlu2 %2939  ;;  %v3190_v56 = vpop.permute.xlu1 %3189 }
 0x3be   : > { %4053 = vst.msk [vmem:[%s5340_s5 + $0x220] sm:$0xff] %vm721_vm1, %v2625_v42  ;;  %v3062_v36 = vpop.permute.xlu0 %3061  ;;  %v3272_v32 = vsel %vm688_vm0, %v6710_v44, %v7018_v16  ;;  %v4205_v44 = vld [vmem:[%s4364_s18 + $0x182] sm:$0xff] }
 0x3bf   : > { %4246 = vst.msk [vmem:[%s5340_s5 + $0x318] sm:$0xff] %vm721_vm1, %v3475_v40  ;;  %v3301_v62 = vsel %vm721_vm1, %v3269_v48, %v3062_v36  ;;  %v7110_v16 = vld [vmem:[%s4364_s18 + $0x181] sm:$0xff] }
 0x3c0   : > { %v3333_v18 = vsel %vm754_vm3, %v3301_v62, %v3190_v56 }
 0x3c1   : > { %4227 = vmatmul.msk.f32.gmra.mxu3 %vm792_vm2, %v3333_v18 }
 0x3c3   : > { %2356 = vrot.lane.b32.xlu2 %v7029_v58, %s4328_s21  ;;  %2953 = vrot.lane.b32.xlu1 %v4201_v10, %s4326_s19 }
 0x3c4   : > { %2228 = vrot.lane.b32.xlu0 %v3977_v43, %s4327_s20  ;;  %v3477_v39 = vpop.f32.mrf.mxu3 }
 0x3c5   : > { %v3478_v8 = vadd.f32 %v6978_v28, %v3477_v39  ;;  %v3196_v52 = vpop.permute.xlu2 %3195  ;;  %v3064_v17 = vpop.permute.xlu1 %3063 }
 0x3c6   : > { %v3302_v33 = vsel %vm721_vm1, %v3270_v23, %v3064_v17  ;;  %v2339_v27 = vpop.permute.xlu0 %2338  ;;  %v7752_v17 = vld [vmem:[#allocation14_spill] sm:$0xff] }
 0x3c7   : > { %4247 = vst.msk [vmem:[%s5340_s5 + $0x320] sm:$0xff] %vm721_vm1, %v3478_v8  ;;  %v2481_v57 = vsel %vm754_vm3, %v6477_v0, %v2339_v27  ;;  %v3334_v51 = vsel %vm754_vm3, %v3302_v33, %v3192_v46 }
 0x3c8   : > { %4034 = vmatmul.msk.f32.gmra.mxu2 %vm792_vm2, %v2481_v57 }
 0x3c9   : > { %4228 = vmatmul.msk.f32.gmra.mxu3 %vm792_vm2, %v3334_v51 }
 0x3cb   : > { %v2627_v41 = vpop.f32.mrf.mxu2  ;;  %2230 = vrot.lane.b32.xlu2 %v3978_v53, %s4327_s20  ;;  %3209 = vrot.lane.b32.xlu1 %v4203_v54, %s4328_s21  ;;  %v7128_v53 = vld [vmem:[%s4364_s18 + $0x189] sm:$0xff] }
 0x3cc   : > { %v2628_v3 = vadd.f32 %v6978_v28, %v2627_v41  ;;  %3081 = vrot.lane.b32.xlu0 %v7029_v58, %s4327_s20  ;;  %v3480_v0 = vpop.f32.mrf.mxu3 }
 0x3cd   : > { %v3481_v21 = vadd.f32 %v6978_v28, %v3480_v0  ;;  %v2345_v47 = vpop.permute.xlu2 %2344  ;;  %v2341_v50 = vpop.permute.xlu1 %2340 }
 0x3ce   : > { %4054 = vst.msk [vmem:[%s5340_s5 + $0x228] sm:$0xff] %vm721_vm1, %v2628_v3  ;;  %v2938_v6 = vpop.permute.xlu0 %2937  ;;  %v2482_v46 = vsel %vm754_vm3, %v7750_v4, %v2341_v50 }
 0x3cf   : > { %4248 = vst.msk [vmem:[%s5340_s5 + $0x328] sm:$0xff] %vm721_vm1, %v3481_v21  ;;  %v3271_v13 = vsel %vm688_vm0, %v6666_v45, %v2938_v6 }
 0x3d0   : > { %4035 = vmatmul.msk.f32.gmra.mxu2 %vm792_vm2, %v2482_v46  ;;  %v3303_v45 = vsel %vm721_vm1, %v3271_v13, %v6996_v24  ;;  %v4316_v24 = vld [vmem:[%s4364_s18 + $0xf8] sm:$0xff] }
 0x3d3   : > { %v2630_v37 = vpop.f32.mrf.mxu2  ;;  %3083 = vrot.lane.b32.xlu2 %v7065_v15, %s4327_s20  ;;  %2358 = vrot.lane.b32.xlu1 %v7065_v15, %s4328_s21 }
 0x3d4   : > { %v2631_v12 = vadd.f32 %v6978_v28, %v2630_v37  ;;  %2955 = vrot.lane.b32.xlu0 %v4202_v29, %s4326_s19  ;;  %v7751_v29 = vld [vmem:[#allocation72_spill] sm:$0xff]  ;;  %v3981_v37 = vld [vmem:[%s4364_s18 + $0x198] sm:$0xff] }
 0x3d5   : > { %v7075_v26 = vpop.permute.xlu2 %2218  ;;  %v2215_v10 = vpop.permute.xlu1 %2214  ;;  %v2419_v9 = vsel %vm688_vm0, %v4316_v24, %v7751_v29 }
 0x3d6   : > { %4055 = vst.msk [vmem:[%s5340_s5 + $0x230] sm:$0xff] %vm721_vm1, %v2631_v12  ;;  %v3194_v1 = vpop.permute.xlu0 %3193  ;;  %v2451_v56 = vsel %vm721_vm1, %v2419_v9, %v2215_v10  ;;  %v4206_v12 = vld [vmem:[%s4364_s18 + $0x18a] sm:$0xff] }
 0x3d7   : > { %v3335_v31 = vsel %vm754_vm3, %v3303_v45, %v3194_v1 }
 0x3d8   : > { %4229 = vmatmul.msk.f32.gmra.mxu3 %vm792_vm2, %v3335_v31 }
 0x3db   : > { %v2633_v38 = vpop.f32.mrf.mxu2  ;;  %v3483_v30 = vpop.f32.mrf.mxu3  ;;  %2957 = vrot.lane.b32.xlu2 %v4203_v54, %s4326_s19  ;;  %2232 = vrot.lane.b32.xlu1 %v3979_v35, %s4327_s20  ;;  %v3980_v54 = vld [vmem:[%s4364_s18 + $0x188] sm:$0xff] }
 0x3dc   : > { %v2634_v5 = vadd.f32 %v6978_v28, %v2633_v38  ;;  %v3484_v22 = vadd.f32 %v6978_v28, %v3483_v30  ;;  %3211 = vrot.lane.b32.xlu0 %v4204_v34, %s4328_s21 }
 0x3dd   : > { %v7096_v42 = vpop.permute.xlu2 %3071  ;;  %v3068_v40 = vpop.permute.xlu1 %3067 }
 0x3de   : > { %4056 = vst.msk [vmem:[%s5340_s5 + $0x238] sm:$0xff] %vm721_vm1, %v2634_v5  ;;  %v3304_v48 = vsel %vm721_vm1, %v3272_v32, %v3068_v40  ;;  %v2343_v36 = vpop.permute.xlu0 %2342 }
 0x3df   : > { %4249 = vst.msk [vmem:[%s5340_s5 + $0x330] sm:$0xff] %vm721_vm1, %v3484_v22  ;;  %v2483_v62 = vsel %vm754_vm3, %v2451_v56, %v2343_v36  ;;  %v3336_v18 = vsel %vm754_vm3, %v3304_v48, %v3196_v52  ;;  %v4317_v52 = vld [vmem:[%s4364_s18 + $0x108] sm:$0xff]  ;;  %v3982_v48 = vld [vmem:[%s4364_s18 + $0x1a0] sm:$0xff] }
 0x3e0   : > { %4036 = vmatmul.msk.f32.gmra.mxu2 %vm792_vm2, %v2483_v62  ;;  %4230 = vmatmul.msk.f32.gmra.mxu3 %vm792_vm2, %v3336_v18  ;;  %v2420_v33 = vsel %vm688_vm0, %v4317_v52, %v7752_v17  ;;  %v4207_v36 = vld [vmem:[%s4364_s18 + $0x19a] sm:$0xff] }
 0x3e1   : > { %v7754_v18 = vld [vmem:[#allocation54_spill] sm:$0xff] }
 0x3e3   : > { %3213 = vrot.lane.b32.xlu2 %v4205_v44, %s4328_s21  ;;  %3085 = vrot.lane.b32.xlu1 %v7110_v16, %s4327_s20 }
 0x3e4   : > { %2360 = vrot.lane.b32.xlu0 %v7110_v16, %s4328_s21  ;;  %v3486_v43 = vpop.f32.mrf.mxu3 }
 0x3e5   : > { %v3487_v39 = vadd.f32 %v6978_v28, %v3486_v43  ;;  %v7118_v23 = vpop.permute.xlu2 %2945  ;;  %v2942_v8 = vpop.permute.xlu1 %2941 }
 0x3e6   : > { %v2217_v27 = vpop.permute.xlu0 %2216  ;;  %v3273_v6 = vsel %vm688_vm0, %v6735_v11, %v2942_v8  ;;  %v7753_v11 = vld [vmem:[#allocation73_spill] sm:$0xff] }
 0x3e7   : > { %4250 = vst.msk [vmem:[%s5340_s5 + $0x338] sm:$0xff] %vm721_vm1, %v3487_v39  ;;  %v2452_v57 = vsel %vm721_vm1, %v2420_v33, %v2217_v27  ;;  %v2421_v1 = vsel %vm688_vm0, %v6752_v19, %v7753_v11  ;;  %v4013_v19 = vld [vmem:[%s4364_s18 + $0x199] sm:$0xff] }
 0x3e8   : > { %v2484_v51 = vsel %vm754_vm3, %v2452_v57, %v2345_v47  ;;  %v2453_v31 = vsel %vm721_vm1, %v2421_v1, %v7075_v26 }
 0x3e9   : > { %4037 = vmatmul.msk.f32.gmra.mxu2 %vm792_vm2, %v2484_v51 }
 0x3eb   : > { %v2636_v41 = vpop.f32.mrf.mxu2  ;;  %2362 = vrot.lane.b32.xlu2 %v7128_v53, %s4328_s21  ;;  %2959 = vrot.lane.b32.xlu1 %v4204_v34, %s4326_s19 }
 0x3ec   : > { %v2637_v3 = vadd.f32 %v6978_v28, %v2636_v41  ;;  %2234 = vrot.lane.b32.xlu0 %v3980_v54, %s4327_s20  ;;  %v3489_v0 = vpop.f32.mrf.mxu3 }
 0x3ed   : > { %v3490_v21 = vadd.f32 %v6978_v28, %v3489_v0  ;;  %v3202_v47 = vpop.permute.xlu2 %3201  ;;  %v3198_v50 = vpop.permute.xlu1 %3197  ;;  %v7755_v0 = vld [vmem:[#allocation55_spill] sm:$0xff] }
 0x3ee   : > { %4057 = vst.msk [vmem:[%s5340_s5 + $0x240] sm:$0xff] %vm721_vm1, %v2637_v3  ;;  %v3070_v4 = vpop.permute.xlu0 %3069 }
 0x3ef   : > { %4251 = vst.msk [vmem:[%s5340_s5 + $0x340] sm:$0xff] %vm721_vm1, %v3490_v21  ;;  %v3305_v46 = vsel %vm721_vm1, %v3273_v6, %v3070_v4  ;;  %v2423_v21 = vsel %vm688_vm0, %v6826_v49, %v7755_v0 }
 0x3f0   : > { %v3337_v13 = vsel %vm754_vm3, %v3305_v46, %v3198_v50 }
 0x3f1   : > { %4231 = vmatmul.msk.f32.gmra.mxu3 %vm792_vm2, %v3337_v13 }
 0x3f3   : > { %v2639_v10 = vpop.f32.mrf.mxu2  ;;  %2236 = vrot.lane.b32.xlu2 %v3981_v37, %s4327_s20  ;;  %3215 = vrot.lane.b32.xlu1 %v4206_v12, %s4328_s21 }
 0x3f4   : > { %v2640_v45 = vadd.f32 %v6978_v28, %v2639_v10  ;;  %3087 = vrot.lane.b32.xlu0 %v7128_v53, %s4327_s20 }
 0x3f5   : > { %v2351_v35 = vpop.permute.xlu2 %2350  ;;  %v2347_v34 = vpop.permute.xlu1 %2346 }
 0x3f6   : > { %4058 = vst.msk [vmem:[%s5340_s5 + $0x248] sm:$0xff] %vm721_vm1, %v2640_v45  ;;  %v2944_v38 = vpop.permute.xlu0 %2943  ;;  %v2485_v30 = vsel %vm754_vm3, %v2453_v31, %v2347_v34 }
 0x3f7   : > { %4038 = vmatmul.msk.f32.gmra.mxu2 %vm792_vm2, %v2485_v30  ;;  %v3274_v5 = vsel %vm688_vm0, %v6777_v61, %v2944_v38 }
 0x3f8   : > { %v3306_v61 = vsel %vm721_vm1, %v3274_v5, %v7096_v42  ;;  %v2422_v42 = vsel %vm688_vm0, %v6800_v55, %v7754_v18 }
 0x3fb   : > { %v2642_v22 = vpop.f32.mrf.mxu2  ;;  %v3492_v24 = vpop.f32.mrf.mxu3  ;;  %2364 = vrot.lane.b32.xlu1 %v4013_v19, %s4328_s21  ;;  %3089 = vrot.lane.b32.xlu2 %v4013_v19, %s4327_s20 }
 0x3fc   : > { %v2643_v26 = vadd.f32 %v6978_v28, %v2642_v22  ;;  %v3493_v29 = vadd.f32 %v6978_v28, %v3492_v24  ;;  %2961 = vrot.lane.b32.xlu0 %v4205_v44, %s4326_s19  ;;  %v3275_v44 = vsel %vm688_vm0, %v6797_v2, %v7118_v23  ;;  %v4176_v2 = vld [vmem:[%s4364_s18 + $0x1a1] sm:$0xff] }
 0x3fd   : > { %v2225_v9 = vpop.permute.xlu2 %2224  ;;  %v2221_v32 = vpop.permute.xlu1 %2220  ;;  %v4208_v23 = vld [vmem:[%s4364_s18 + $0x1a2] sm:$0xff] }
 0x3fe   : > { %4059 = vst.msk [vmem:[%s5340_s5 + $0x250] sm:$0xff] %vm721_vm1, %v2643_v26  ;;  %v3200_v40 = vpop.permute.xlu0 %3199  ;;  %v2454_v8 = vsel %vm721_vm1, %v2422_v42, %v2221_v32 }
 0x3ff   : > { %4252 = vst.msk [vmem:[%s5340_s5 + $0x348] sm:$0xff] %vm721_vm1, %v3493_v29  ;;  %v3338_v56 = vsel %vm754_vm3, %v3306_v61, %v3200_v40 }
 0x400   : > { %4232 = vmatmul.msk.f32.gmra.mxu3 %vm792_vm2, %v3338_v56 }
 0x403   : > { %2238 = vrot.lane.b32.xlu1 %v3982_v48, %s4327_s20  ;;  %2963 = vrot.lane.b32.xlu2 %v4206_v12, %s4326_s19 }
 0x404   : > { %3217 = vrot.lane.b32.xlu0 %v4207_v36, %s4328_s21  ;;  %v3495_v62 = vpop.f32.mrf.mxu3  ;;  %v7757_v36 = vld [vmem:[#allocation34_spill] sm:$0xff] }
 0x405   : > { %v3496_v43 = vadd.f32 %v6978_v28, %v3495_v62  ;;  %v3074_v39 = vpop.permute.xlu1 %3073  ;;  %v3078_v52 = vpop.permute.xlu2 %3077  ;;  %v2425_v62 = vsel %vm688_vm0, %v6920_v25, %v7757_v36 }
 0x406   : > { %v3307_v17 = vsel %vm721_vm1, %v3275_v44, %v3074_v39  ;;  %v2349_v33 = vpop.permute.xlu0 %2348 }
 0x407   : > { %4253 = vst.msk [vmem:[%s5340_s5 + $0x350] sm:$0xff] %vm721_vm1, %v3496_v43  ;;  %v2486_v27 = vsel %vm754_vm3, %v2454_v8, %v2349_v33  ;;  %v3339_v55 = vsel %vm754_vm3, %v3307_v17, %v3202_v47 }
 0x408   : > { %4039 = vmatmul.msk.f32.gmra.mxu2 %vm792_vm2, %v2486_v27  ;;  %4233 = vmatmul.msk.f32.gmra.mxu3 %vm792_vm2, %v3339_v55 }
 0x40b   : > { %v2645_v57 = vpop.f32.mrf.mxu2  ;;  %3091 = vrot.lane.b32.xlu1 %v4176_v2, %s4327_s20  ;;  %3219 = vrot.lane.b32.xlu2 %v4208_v23, %s4328_s21 }
 0x40c   : > { %v2646_v51 = vadd.f32 %v6978_v28, %v2645_v57  ;;  %2366 = vrot.lane.b32.xlu0 %v4176_v2, %s4328_s21  ;;  %v3498_v54 = vpop.f32.mrf.mxu3  ;;  %v7758_v2 = vld [vmem:[#allocation20_spill] sm:$0xff] }
 0x40d   : > { %v3499_v41 = vadd.f32 %v6978_v28, %v3498_v54  ;;  %v2948_v3 = vpop.permute.xlu1 %2947  ;;  %v2952_v6 = vpop.permute.xlu2 %2951 }
 0x40e   : > { %4060 = vst.msk [vmem:[%s5340_s5 + $0x258] sm:$0xff] %vm721_vm1, %v2646_v51  ;;  %v2223_v47 = vpop.permute.xlu0 %2222  ;;  %v3276_v49 = vsel %vm688_vm0, %v6841_v59, %v2948_v3  ;;  %v3278_v18 = vsel %vm688_vm0, %v6917_v63, %v2952_v6  ;;  %v3913_v63 = vld [vmem:[%s4364_s18 + $0x150] sm:$0xff] }
 0x40f   : > { %4254 = vst.msk [vmem:[%s5340_s5 + $0x358] sm:$0xff] %vm721_vm1, %v3499_v41  ;;  %v2455_v50 = vsel %vm721_vm1, %v2423_v21, %v2223_v47  ;;  %v2426_v23 = vsel %vm688_vm0, %v3913_v63, %v7758_v2 }
 0x410   : > { %v2487_v4 = vsel %vm754_vm3, %v2455_v50, %v2351_v35  ;;  %v7756_v35 = vld [vmem:[#allocation19_spill] sm:$0xff] }
 0x411   : > { %4040 = vmatmul.msk.f32.gmra.mxu2 %vm792_vm2, %v2487_v4  ;;  %v2424_v34 = vsel %vm688_vm0, %v6869_v20, %v7756_v35 }
 0x412   : > { %v2456_v30 = vsel %vm721_vm1, %v2424_v34, %v2225_v9 }
 0x413   : > { %v2648_v46 = vpop.f32.mrf.mxu2 }
 0x414   : > { %v2649_v13 = vadd.f32 %v6978_v28, %v2648_v46 }
 0x415   : > { %v3204_v37 = vpop.permute.xlu1 %3203  ;;  %v3208_v1 = vpop.permute.xlu2 %3207 }
 0x416   : > { %4061 = vst.msk [vmem:[%s5340_s5 + $0x260] sm:$0xff] %vm721_vm1, %v2649_v13  ;;  %v3076_v12 = vpop.permute.xlu0 %3075 }
 0x417   : > { %v3308_v10 = vsel %vm721_vm1, %v3276_v49, %v3076_v12  ;;  %v7759_v12 = vld [vmem:[#allocation43_spill] sm:$0xff] }
 0x418   : > { %v3340_v11 = vsel %vm754_vm3, %v3308_v10, %v3204_v37  ;;  %v3914_v37 = vld [vmem:[%s4364_s18 + $0x158] sm:$0xff] }
 0x419   : > { %4234 = vmatmul.msk.f32.gmra.mxu3 %vm792_vm2, %v3340_v11  ;;  %v2427_v10 = vsel %vm688_vm0, %v3914_v37, %v7759_v12 }
 0x41b   : > { %v2651_v45 = vpop.f32.mrf.mxu2  ;;  %v3501_v31 = vpop.f32.mrf.mxu3 }
 0x41c   : > { %v2652_v38 = vadd.f32 %v6978_v28, %v2651_v45  ;;  %v3502_v59 = vadd.f32 %v6978_v28, %v3501_v31 }
 0x41d   : > { %v2353_v19 = vpop.permute.xlu1 %2352  ;;  %v2357_v24 = vpop.permute.xlu2 %2356 }
 0x41e   : > { %4062 = vst.msk [vmem:[%s5340_s5 + $0x268] sm:$0xff] %vm721_vm1, %v2652_v38  ;;  %v2488_v5 = vsel %vm754_vm3, %v2456_v30, %v2353_v19  ;;  %v2950_v22 = vpop.permute.xlu0 %2949 }
 0x41f   : > { %4255 = vst.msk [vmem:[%s5340_s5 + $0x360] sm:$0xff] %vm721_vm1, %v3502_v59  ;;  %4041 = vmatmul.msk.f32.gmra.mxu2 %vm792_vm2, %v2488_v5  ;;  %v3277_v20 = vsel %vm688_vm0, %v6891_v60, %v2950_v22 }
 0x420   : > { %v3309_v9 = vsel %vm721_vm1, %v3277_v20, %v3078_v52 }
 0x424   : > { %v3504_v26 = vpop.f32.mrf.mxu3 }
 0x425   : > { %v3505_v29 = vadd.f32 %v6978_v28, %v3504_v26  ;;  %v2227_v32 = vpop.permute.xlu1 %2226  ;;  %v2231_v43 = vpop.permute.xlu2 %2230 }
 0x426   : > { %v3206_v40 = vpop.permute.xlu0 %3205  ;;  %v2457_v39 = vsel %vm721_vm1, %v2425_v62, %v2227_v32 }
 0x427   : > { %4256 = vst.msk [vmem:[%s5340_s5 + $0x368] sm:$0xff] %vm721_vm1, %v3505_v29  ;;  %v3341_v61 = vsel %vm754_vm3, %v3309_v9, %v3206_v40  ;;  %v7760_v9 = vld [vmem:[#allocation74_spill] sm:$0xff] }
 0x428   : > { %4235 = vmatmul.msk.f32.gmra.mxu3 %vm792_vm2, %v3341_v61 }
 0x42b   : > { %v2654_v56 = vpop.f32.mrf.mxu2 }
 0x42c   : > { %v2655_v48 = vadd.f32 %v6978_v28, %v2654_v56  ;;  %v3507_v60 = vpop.f32.mrf.mxu3 }
 0x42d   : > { %v3508_v42 = vadd.f32 %v6978_v28, %v3507_v60  ;;  %v3080_v44 = vpop.permute.xlu1 %3079  ;;  %v3084_v54 = vpop.permute.xlu2 %3083 }
 0x42e   : > { %4063 = vst.msk [vmem:[%s5340_s5 + $0x270] sm:$0xff] %vm721_vm1, %v2655_v48  ;;  %v3310_v8 = vsel %vm721_vm1, %v3278_v18, %v3080_v44  ;;  %v2355_v52 = vpop.permute.xlu0 %2354  ;;  %v3916_v44 = vld [vmem:[%s4364_s18 + $0x170] sm:$0xff] }
 0x42f   : > { %4257 = vst.msk [vmem:[%s5340_s5 + $0x370] sm:$0xff] %vm721_vm1, %v3508_v42  ;;  %v2489_v17 = vsel %vm754_vm3, %v2457_v39, %v2355_v52  ;;  %v3342_v25 = vsel %vm754_vm3, %v3310_v8, %v3208_v1  ;;  %v7761_v8 = vld [vmem:[#allocation13_spill] sm:$0xff] }
 0x430   : > { %4042 = vmatmul.msk.f32.gmra.mxu2 %vm792_vm2, %v2489_v17  ;;  %4236 = vmatmul.msk.f32.gmra.mxu3 %vm792_vm2, %v3342_v25  ;;  %v2429_v52 = vsel %vm688_vm0, %v3916_v44, %v7761_v8 }
 0x433   : > { %v2657_v33 = vpop.f32.mrf.mxu2 }
 0x434   : > { %v2658_v27 = vadd.f32 %v6978_v28, %v2657_v33 }
 0x435   : > { %v2954_v55 = vpop.permute.xlu1 %2953  ;;  %v2958_v49 = vpop.permute.xlu2 %2957 }
 0x436   : > { %4064 = vst.msk [vmem:[%s5340_s5 + $0x278] sm:$0xff] %vm721_vm1, %v2658_v27  ;;  %v2229_v57 = vpop.permute.xlu0 %2228  ;;  %v3279_v6 = vsel %vm688_vm0, %v6965_v14, %v2954_v55  ;;  %v2459_v14 = vsel %vm721_vm1, %v2427_v10, %v2231_v43  ;;  %v3281_v61 = vsel %vm688_vm0, %v7029_v58, %v2958_v49 }
 0x437   : > { %v2458_v51 = vsel %vm721_vm1, %v2426_v23, %v2229_v57 }
 0x438   : > { %v2490_v41 = vsel %vm754_vm3, %v2458_v51, %v2357_v24 }
 0x439   : > { %4043 = vmatmul.msk.f32.gmra.mxu2 %vm792_vm2, %v2490_v41 }
 0x43b   : > { %v2660_v3 = vpop.f32.mrf.mxu2  ;;  %v3510_v0 = vpop.f32.mrf.mxu3 }
 0x43c   : > { %v2661_v21 = vadd.f32 %v6978_v28, %v2660_v3  ;;  %v3511_v47 = vadd.f32 %v6978_v28, %v3510_v0 }
 0x43d   : > { %v3210_v50 = vpop.permute.xlu1 %3209  ;;  %v3214_v59 = vpop.permute.xlu2 %3213 }
 0x43e   : > { %4065 = vst.msk [vmem:[%s5340_s5 + $0x280] sm:$0xff] %vm721_vm1, %v2661_v21  ;;  %v3082_v4 = vpop.permute.xlu0 %3081  ;;  %v3917_v21 = vld [vmem:[%s4364_s18 + $0x180] sm:$0xff] }
 0x43f   : > { %4258 = vst.msk [vmem:[%s5340_s5 + $0x378] sm:$0xff] %vm721_vm1, %v3511_v47  ;;  %v3311_v46 = vsel %vm721_vm1, %v3279_v6, %v3082_v4  ;;  %v7762_v47 = vld [vmem:[#allocation33_spill] sm:$0xff] }
 0x440   : > { %v3343_v13 = vsel %vm754_vm3, %v3311_v46, %v3210_v50  ;;  %v2430_v50 = vsel %vm688_vm0, %v3917_v21, %v7762_v47 }
 0x441   : > { %4237 = vmatmul.msk.f32.gmra.mxu3 %vm792_vm2, %v3343_v13 }
 0x444   : > { %v3513_v11 = vpop.f32.mrf.mxu3 }
 0x445   : > { %v3514_v1 = vadd.f32 %v6978_v28, %v3513_v11  ;;  %v2359_v45 = vpop.permute.xlu1 %2358  ;;  %v2363_v48 = vpop.permute.xlu2 %2362 }
 0x446   : > { %v2491_v31 = vsel %vm754_vm3, %v2459_v14, %v2359_v45  ;;  %v2956_v35 = vpop.permute.xlu0 %2955 }
 0x447   : > { %4259 = vst.msk [vmem:[%s5340_s5 + $0x380] sm:$0xff] %vm721_vm1, %v3514_v1  ;;  %4044 = vmatmul.msk.f32.gmra.mxu2 %vm792_vm2, %v2491_v31  ;;  %v3280_v34 = vsel %vm688_vm0, %v7009_v7, %v2956_v35  ;;  %v3915_v7 = vld [vmem:[%s4364_s18 + $0x168] sm:$0xff] }
 0x448   : > { %v3312_v20 = vsel %vm721_vm1, %v3280_v34, %v3084_v54  ;;  %v2428_v40 = vsel %vm688_vm0, %v3915_v7, %v7760_v9  ;;  %v3918_v35 = vld [vmem:[%s4364_s18 + $0x188] sm:$0xff] }
 0x44b   : > { %v2663_v38 = vpop.f32.mrf.mxu2 }
 0x44c   : > { %v2664_v30 = vadd.f32 %v6978_v28, %v2663_v38  ;;  %v3516_v19 = vpop.f32.mrf.mxu3 }
 0x44d   : > { %v3517_v5 = vadd.f32 %v6978_v28, %v3516_v19  ;;  %v2233_v22 = vpop.permute.xlu1 %2232  ;;  %v2237_v63 = vpop.permute.xlu2 %2236 }
 0x44e   : > { %4066 = vst.msk [vmem:[%s5340_s5 + $0x288] sm:$0xff] %vm721_vm1, %v2664_v30  ;;  %v3212_v24 = vpop.permute.xlu0 %3211  ;;  %v2460_v60 = vsel %vm721_vm1, %v2428_v40, %v2233_v22 }
 0x44f   : > { %4260 = vst.msk [vmem:[%s5340_s5 + $0x388] sm:$0xff] %vm721_vm1, %v3517_v5  ;;  %v3344_v26 = vsel %vm754_vm3, %v3312_v20, %v3212_v24 }
 0x450   : > { %4238 = vmatmul.msk.f32.gmra.mxu3 %vm792_vm2, %v3344_v26 }
 0x453   : > { %v2666_v29 = vpop.f32.mrf.mxu2 }
 0x454   : > { %v2667_v32 = vadd.f32 %v6978_v28, %v2666_v29 }
 0x455   : > { %v3086_v56 = vpop.permute.xlu1 %3085  ;;  %v3090_v0 = vpop.permute.xlu2 %3089 }
 0x456   : > { %4067 = vst.msk [vmem:[%s5340_s5 + $0x290] sm:$0xff] %vm721_vm1, %v2667_v32  ;;  %v3313_v36 = vsel %vm721_vm1, %v3281_v61, %v3086_v56  ;;  %v2361_v62 = vpop.permute.xlu0 %2360 }
 0x457   : > { %v2492_v18 = vsel %vm754_vm3, %v2460_v60, %v2361_v62  ;;  %v3345_v42 = vsel %vm754_vm3, %v3313_v36, %v3214_v59 }
 0x458   : > { %4045 = vmatmul.msk.f32.gmra.mxu2 %vm792_vm2, %v2492_v18  ;;  %4239 = vmatmul.msk.f32.gmra.mxu3 %vm792_vm2, %v3345_v42 }
 0x45b   : > { %v3519_v58 = vpop.f32.mrf.mxu3 }
 0x45c   : > { %v3520_v43 = vadd.f32 %v6978_v28, %v3519_v58 }
 0x45d   : > { %v2960_v39 = vpop.permute.xlu1 %2959  ;;  %v2964_v49 = vpop.permute.xlu2 %2963 }
 0x45e   : > { %4261 = vst.msk [vmem:[%s5340_s5 + $0x390] sm:$0xff] %vm721_vm1, %v3520_v43  ;;  %v2235_v17 = vpop.permute.xlu0 %2234  ;;  %v3282_v51 = vsel %vm688_vm0, %v7065_v15, %v2960_v39  ;;  %v2462_v15 = vsel %vm721_vm1, %v2430_v50, %v2237_v63  ;;  %v3284_v19 = vsel %vm688_vm0, %v7128_v53, %v2964_v49 }
 0x45f   : > { %v2461_v25 = vsel %vm721_vm1, %v2429_v52, %v2235_v17 }
 0x460   : > { %v2493_v33 = vsel %vm754_vm3, %v2461_v25, %v2363_v48 }
 0x461   : > { %4046 = vmatmul.msk.f32.gmra.mxu2 %vm792_vm2, %v2493_v33 }
 0x463   : > { %v2669_v27 = vpop.f32.mrf.mxu2  ;;  %v3522_v55 = vpop.f32.mrf.mxu3 }
 0x464   : > { %v2670_v2 = vadd.f32 %v6978_v28, %v2669_v27  ;;  %v3523_v23 = vadd.f32 %v6978_v28, %v3522_v55 }
 0x465   : > { %v3216_v57 = vpop.permute.xlu1 %3215  ;;  %v3220_v59 = vpop.permute.xlu2 %3219 }
 0x466   : > { %4068 = vst.msk [vmem:[%s5340_s5 + $0x298] sm:$0xff] %vm721_vm1, %v2670_v2  ;;  %v3088_v54 = vpop.permute.xlu0 %3087 }
 0x467   : > { %4262 = vst.msk [vmem:[%s5340_s5 + $0x398] sm:$0xff] %vm721_vm1, %v3523_v23  ;;  %v3314_v41 = vsel %vm721_vm1, %v3282_v51, %v3088_v54 }
 0x468   : > { %v3346_v3 = vsel %vm754_vm3, %v3314_v41, %v3216_v57 }
 0x469   : > { %4240 = vmatmul.msk.f32.gmra.mxu3 %vm792_vm2, %v3346_v3 }
 0x46c   : > { %v2672_v6 = vpop.f32.mrf.mxu2 }
 0x46d   : > { %v2673_v4 = vadd.f32 %v6978_v28, %v2672_v6  ;;  %v2365_v46 = vpop.permute.xlu1 %2364 }
 0x46e   : > { %v2494_v13 = vsel %vm754_vm3, %v2462_v15, %v2365_v46  ;;  %v2962_v37 = vpop.permute.xlu0 %2961 }
 0x46f   : > { %4069 = vst.msk [vmem:[%s5340_s5 + $0x2a0] sm:$0xff] %vm721_vm1, %v2673_v4  ;;  %4047 = vmatmul.msk.f32.gmra.mxu2 %vm792_vm2, %v2494_v13  ;;  %v3283_v12 = vsel %vm688_vm0, %v7110_v16, %v2962_v37  ;;  %v7763_v16 = vld [vmem:[#allocation75_spill] sm:$0xff] }
 0x470   : > { %v3315_v1 = vsel %vm721_vm1, %v3283_v12, %v3090_v0  ;;  %v2431_v30 = vsel %vm688_vm0, %v3918_v35, %v7763_v16 }
 0x474   : > { %v3525_v10 = vpop.f32.mrf.mxu3 }
 0x475   : > { %v3526_v11 = vadd.f32 %v6978_v28, %v3525_v10  ;;  %v2239_v14 = vpop.permute.xlu1 %2238 }
 0x476   : > { %v3218_v45 = vpop.permute.xlu0 %3217  ;;  %v2463_v22 = vsel %vm721_vm1, %v2431_v30, %v2239_v14 }
 0x477   : > { %4263 = vst.msk [vmem:[%s5340_s5 + $0x3a0] sm:$0xff] %vm721_vm1, %v3526_v11  ;;  %v3347_v31 = vsel %vm754_vm3, %v3315_v1, %v3218_v45 }
 0x478   : > { %4241 = vmatmul.msk.f32.gmra.mxu3 %vm792_vm2, %v3347_v31 }
 0x47a   : > { %v2675_v34 = vpop.f32.mrf.mxu2 }
 0x47b   : > { %v2676_v38 = vadd.f32 %v6978_v28, %v2675_v34 }
 0x47d   : > { %4070 = vst.msk [vmem:[%s5340_s5 + $0x2a8] sm:$0xff] %vm721_vm1, %v2676_v38  ;;  %v3092_v5 = vpop.permute.xlu1 %3091 }
 0x47e   : > { %v3316_v20 = vsel %vm721_vm1, %v3284_v19, %v3092_v5  ;;  %v2367_v24 = vpop.permute.xlu0 %2366 }
 0x47f   : > { %v2495_v26 = vsel %vm754_vm3, %v2463_v22, %v2367_v24  ;;  %v3348_v7 = vsel %vm754_vm3, %v3316_v20, %v3220_v59 }
 0x480   : > { %4048 = vmatmul.msk.f32.gmra.mxu2 %vm792_vm2, %v2495_v26  ;;  %4242 = vmatmul.msk.f32.gmra.mxu3 %vm792_vm2, %v3348_v7 }
 0x483   : > { %v3528_v53 = vpop.f32.mrf.mxu3 }
 0x484   : > { %v3529_v29 = vadd.f32 %v6978_v28, %v3528_v53 }
 0x486   : > { %4264 = vst.msk [vmem:[%s5340_s5 + $0x3a8] sm:$0xff] %vm721_vm1, %v3529_v29 }
 0x48b   : > { %v2678_v32 = vpop.f32.mrf.mxu2  ;;  %v3531_v9 = vpop.f32.mrf.mxu3 }
 0x48c   : > { %v2679_v40 = vadd.f32 %v6978_v28, %v2678_v32  ;;  %v3532_v61 = vadd.f32 %v6978_v28, %v3531_v9 }
 0x48e   : > { %4071 = vst.msk [vmem:[%s5340_s5 + $0x2b0] sm:$0xff] %vm721_vm1, %v2679_v40 }
 0x48f   : > { %4265 = vst.msk [vmem:[%s5340_s5 + $0x3b0] sm:$0xff] %vm721_vm1, %v3532_v61 }
 0x494   : > { %v2681_v56 = vpop.f32.mrf.mxu2 }
 0x495   : > { %v2682_v48 = vadd.f32 %v6978_v28, %v2681_v56 }
 0x497   : > { %4072 = vst.msk [vmem:[%s5340_s5 + $0x2b8] sm:$0xff] %vm721_vm1, %v2682_v48 }
 0x49c   : > { %v3534_v60 = vpop.f32.mrf.mxu3 }
 0x49d   : > { %v3535_v36 = vadd.f32 %v6978_v28, %v3534_v60 }
 0x49f   : > { %4266 = vst.msk [vmem:[%s5340_s5 + $0x3b8] sm:$0xff] %vm721_vm1, %v3535_v36 }
 0x4a2   : > { %v2684_v62 = vpop.f32.mrf.mxu2 }
 0x4a3   : > { %v2685_v18 = vadd.f32 %v6978_v28, %v2684_v62 }
 0x4a5   : > { %4073 = vst.msk [vmem:[%s5340_s5 + $0x2c0] sm:$0xff] %vm721_vm1, %v2685_v18 }
 0x4ab   : > { %v3537_v42 = vpop.f32.mrf.mxu3 }
 0x4ac   : > { %v3538_v44 = vadd.f32 %v6978_v28, %v3537_v42 }
 0x4ae   : > { %4267 = vst.msk [vmem:[%s5340_s5 + $0x3c0] sm:$0xff] %vm721_vm1, %v3538_v44 }
 0x4b3   : > { %v2687_v58 = vpop.f32.mrf.mxu2  ;;  %v3540_v43 = vpop.f32.mrf.mxu3 }
 0x4b4   : > { %v2688_v39 = vadd.f32 %v6978_v28, %v2687_v58  ;;  %v3541_v8 = vadd.f32 %v6978_v28, %v3540_v43 }
 0x4b6   : > { %4074 = vst.msk [vmem:[%s5340_s5 + $0x2c8] sm:$0xff] %vm721_vm1, %v2688_v39 }
 0x4b7   : > { %4268 = vst.msk [vmem:[%s5340_s5 + $0x3c8] sm:$0xff] %vm721_vm1, %v3541_v8 }
 0x4bc   : > { %v2690_v52 = vpop.f32.mrf.mxu2 }
 0x4bd   : > { %v2691_v17 = vadd.f32 %v6978_v28, %v2690_v52 }
 0x4bf   : > { %4075 = vst.msk [vmem:[%s5340_s5 + $0x2d0] sm:$0xff] %vm721_vm1, %v2691_v17 }
 0x4c4   : > { %v3543_v25 = vpop.f32.mrf.mxu3 }
 0x4c5   : > { %v3544_v63 = vadd.f32 %v6978_v28, %v3543_v25 }
 0x4c7   : > { %4269 = vst.msk [vmem:[%s5340_s5 + $0x3d0] sm:$0xff] %vm721_vm1, %v3544_v63 }
 0x4ca   : > { %v2693_v33 = vpop.f32.mrf.mxu2 }
 0x4cb   : > { %v2694_v27 = vadd.f32 %v6978_v28, %v2693_v33 }
 0x4cd   : > { %4076 = vst.msk [vmem:[%s5340_s5 + $0x2d8] sm:$0xff] %vm721_vm1, %v2694_v27 }
 0x4d3   : > { %v3546_v55 = vpop.f32.mrf.mxu3 }
 0x4d4   : > { %v3547_v2 = vadd.f32 %v6978_v28, %v3546_v55 }
 0x4d6   : > { %4270 = vst.msk [vmem:[%s5340_s5 + $0x3d8] sm:$0xff] %vm721_vm1, %v3547_v2 }
 0x4db   : > { %v2696_v23 = vpop.f32.mrf.mxu2  ;;  %v3549_v57 = vpop.f32.mrf.mxu3 }
 0x4dc   : > { %v2697_v51 = vadd.f32 %v6978_v28, %v2696_v23  ;;  %v3550_v54 = vadd.f32 %v6978_v28, %v3549_v57 }
 0x4de   : > { %4077 = vst.msk [vmem:[%s5340_s5 + $0x2e0] sm:$0xff] %vm721_vm1, %v2697_v51 }
 0x4df   : > { %4271 = vst.msk [vmem:[%s5340_s5 + $0x3e0] sm:$0xff] %vm721_vm1, %v3550_v54 }
 0x4e4   : > { %v2699_v41 = vpop.f32.mrf.mxu2 }
 0x4e5   : > { %v2700_v3 = vadd.f32 %v6978_v28, %v2699_v41 }
 0x4e7   : > { %4078 = vst.msk [vmem:[%s5340_s5 + $0x2e8] sm:$0xff] %vm721_vm1, %v2700_v3 }
 0x4ec   : > { %v3552_v0 = vpop.f32.mrf.mxu3 }
 0x4ed   : > { %v3553_v21 = vadd.f32 %v6978_v28, %v3552_v0 }
 0x4ef   : > { %4272 = vst.msk [vmem:[%s5340_s5 + $0x3e8] sm:$0xff] %vm721_vm1, %v3553_v21 }
 0x4f2   : > { %v2702_v47 = vpop.f32.mrf.mxu2 }
 0x4f3   : > { %v2703_v50 = vadd.f32 %v6978_v28, %v2702_v47 }
 0x4f5   : > { %4079 = vst.msk [vmem:[%s5340_s5 + $0x2f0] sm:$0xff] %vm721_vm1, %v2703_v50 }
 0x4fb   : > { %v3555_v6 = vpop.f32.mrf.mxu3 }
 0x4fc   : > { %v3556_v15 = vadd.f32 %v6978_v28, %v3555_v6 }
 0x4fe   : > { %4273 = vst.msk [vmem:[%s5340_s5 + $0x3f0] sm:$0xff] %vm721_vm1, %v3556_v15 }
 0x503   : > { %v2705_v4 = vpop.f32.mrf.mxu2  ;;  %v3558_v46 = vpop.f32.mrf.mxu3 }
 0x504   : > { %v2706_v13 = vadd.f32 %v6978_v28, %v2705_v4  ;;  %v3559_v37 = vadd.f32 %v6978_v28, %v3558_v46 }
 0x506   : > { %4080 = vst.msk [vmem:[%s5340_s5 + $0x2f8] sm:$0xff] %vm721_vm1, %v2706_v13 }
 0x507   : > { %4274 = vst.msk [vmem:[%s5340_s5 + $0x3f8] sm:$0xff] %vm721_vm1, %v3559_v37 }
 0x508 PF: > { %s13_s12 = sadd.s32 1, %s4324_s12  }
 0x509   : > { %p10_p5 = scmp.ge.s32.totalorder %s13_s12, 4  }
 0x50b   :  { %12 = sbr.rel (!%p10_p5) target bundleno = 1 (0x1), region = 70 }

</bundles_post_ra>
